<compile_context>
chip_gen: v5e
topology: v5e:2x2
jax: 0.10.0
libtpu: 0.0.40
codegen_flags: <defaults>
</compile_context>

<pallas_src>
import numpy as np
import jax
import jax.numpy as jnp
from jax.experimental import pallas as pl
from jax.experimental.pallas import tpu as pltpu


# ----------------------------- static helpers -------------------------------

def _conv_out(size, k, stride):
    return (size - k) // stride + 1


def _same_pad_mask_np(oh, ow):
    """[oh*ow, 9] f32 mask for a 3x3 stride-1 same-pad conv (tap-major).
    mask[p, t] = 1 iff tap t of output position p lands inside the image."""
    m = np.zeros((oh * ow, 9), np.float32)
    for p in range(oh * ow):
        y, x = divmod(p, ow)
        for t in range(9):
            di, dj = divmod(t, 3)
            yy, xx = y + di - 1, x + dj - 1
            if 0 <= yy < oh and 0 <= xx < ow:
                m[p, t] = 1.0
    return m


def _norm_col_init(key, shape, std):
    x = jax.random.normal(key, shape, dtype=jnp.float32)
    return x * std / jnp.sqrt(jnp.sum(x * x, axis=1, keepdims=True))


def _im2col_nopad(x_chw, k, stride):
    """(C, H, W) -> (oh*ow, k*k*C) patches, tap-major / channel-minor.
    Runs in the jitted JAX wrapper (layer-1 input preprocessing only)."""
    C, H, W = x_chw.shape
    oh = _conv_out(H, k, stride)
    ow = _conv_out(W, k, stride)
    cols = []
    for di in range(k):
        for dj in range(k):
            patch = x_chw[:, di:di + stride * oh:stride,
                          dj:dj + stride * ow:stride]      # (C, oh, ow)
            cols.append(patch.reshape(C, oh * ow).T)        # (P, C)
    return jnp.concatenate(cols, axis=1)                    # (P, k*k*C)


# ----------------------------- in-kernel helpers -----------------------------

def _lstm_gates(xh_bf16, w_ref, b_ref, c_prev, cdim):
    """One fused [x|h] matmul (bf16 in, f32 acc) + LSTM gating (i, f, g, o)."""
    gates = jnp.dot(xh_bf16, w_ref[...],
                    preferred_element_type=jnp.float32) + b_ref[...]
    i = jax.nn.sigmoid(gates[:, 0 * cdim:1 * cdim])
    f = jax.nn.sigmoid(gates[:, 1 * cdim:2 * cdim])
    g = jnp.tanh(gates[:, 2 * cdim:3 * cdim])
    o = jax.nn.sigmoid(gates[:, 3 * cdim:4 * cdim])
    c_new = f * c_prev + i * g
    h_new = o * jnp.tanh(c_new)
    return h_new, c_new


def _same_pad_patch_block(xh_ref, col0, h_old, hpad_ref, mask, oh, ow, C):
    """im2col of a 3x3 stride-1 same-pad conv over h_old ([oh*ow, C],
    row p = y*ow + x), written as ONE lane-aligned (P, 9*C) bf16 store at
    xh_ref[:, col0:col0+9*C] (tap-major, channel-minor).  The zero halo in
    hpad absorbs out-of-range row shifts; the mask kills x-wrap."""
    P = oh * ow
    halo = ow + 1
    zero = jnp.zeros((halo, C), jnp.float32)
    hpad_ref[0:halo, :] = zero
    hpad_ref[halo + P:halo + P + halo, :] = zero
    hpad_ref[halo:halo + P, :] = h_old
    taps = []
    for t in range(9):
        di, dj = t // 3, t % 3
        s = (di - 1) * ow + (dj - 1)
        shifted = hpad_ref[halo + s:halo + s + P, :]          # [P, C] f32
        taps.append(shifted * mask[:, t:t + 1])               # f32 mask math
    block = jnp.concatenate(taps, axis=1).astype(jnp.bfloat16)  # (P, 9*C)
    xh_ref[:, col0:col0 + 9 * C] = block                        # one wide store


# ------------------------------- fused kernel --------------------------------

def _build_kernel(cfg):
    o1, o2 = cfg["o1"], cfg["o2"]
    P1, P2 = o1 * o1, o2 * o2
    c1d, c2d, c3d = cfg["couts"]
    hdim = cfg["hidden"]
    kx1 = cfg["kx1"]
    kx2_pad = cfg["kx2_pad"]
    bf16, f32 = jnp.bfloat16, jnp.float32

    def kernel(xp1_ref, m1_ref, m2_ref, am_ref,
               s1_ref, s2_ref, s3_ref, sx_ref,
               w1_ref, b1_ref, w2_ref, b2_ref, w3_ref, b3_ref,
               wl_ref, bl_ref, whd_ref, bhd_ref,
               heads_ref, s1o_ref, s2o_ref, s3o_ref, sxo_ref,
               hpad1, hpad2, xh1, xh2):
        # ---------------- ConvLSTM layer 1 ----------------
        s1 = s1_ref[...]
        h1_old, c1_old = s1[:, 0:c1d], s1[:, c1d:2 * c1d]
        xh1[:, 0:kx1] = xp1_ref[...]                       # input patches (bf16)
        _same_pad_patch_block(xh1, kx1, h1_old, hpad1, m1_ref[...], o1, o1, c1d)
        h1n, c1n = _lstm_gates(xh1[...], w1_ref, b1_ref, c1_old, c1d)
        s1o_ref[...] = jnp.concatenate([h1n, c1n], axis=1)  # packed (h|c) state

        # ---------------- ConvLSTM layer 2 ----------------
        s2 = s2_ref[...]
        h2_old, c2_old = s2[:, 0:c2d], s2[:, c2d:2 * c2d]
        # 3x3 stride-2 valid input conv over h1n: 27 strided reads of the
        # freshly written layer-1 state, assembled into one lane-aligned store.
        rows = []
        for y in range(o2):
            taps = []
            for t in range(9):
                di, dj = t // 3, t % 3
                start = (2 * y + di) * o1 + dj
                blk = s1o_ref[pl.ds(start, o2, stride=2), :]   # (o2, 2*c1d)
                taps.append(blk[:, 0:c1d])                     # h part only
            rows.append(jnp.concatenate(taps, axis=1))         # (o2, 9*c1d)
        xblk = jnp.concatenate(rows, axis=0)                   # (P2, 9*c1d)
        pad = jnp.zeros((P2, kx2_pad - 9 * c1d), f32)          # matches zero w2 rows
        xh2[:, 0:kx2_pad] = jnp.concatenate([xblk, pad], axis=1).astype(bf16)
        _same_pad_patch_block(xh2, kx2_pad, h2_old, hpad2, m2_ref[...], o2, o2, c2d)
        h2n, c2n = _lstm_gates(xh2[...], w2_ref, b2_ref, c2_old, c2d)
        s2o_ref[...] = jnp.concatenate([h2n, c2n], axis=1)

        # ---------------- ConvLSTM layer 3 (1x1 output, register values) -----
        s3 = s3_ref[...]
        h3_old, c3_old = s3[:, 0:c3d], s3[:, c3d:2 * c3d]
        # valid 3x3 stride-1 over a 3x3 map -> its im2col is h2n flattened
        # position-major; hidden 3x3 same-pad over a 1x1 map -> centre tap only.
        x3 = jnp.concatenate([h2n[r:r + 1, :] for r in range(P2)], axis=1)
        xh3 = jnp.concatenate([x3, h3_old], axis=1).astype(bf16)   # (1, 9*c2d+c3d)
        h3n, c3n = _lstm_gates(xh3, w3_ref, b3_ref, c3_old, c3d)
        s3o_ref[...] = jnp.concatenate([h3n, c3n], axis=1)

        # ---------------- LSTMCell on the flattened layer-3 state -------------
        sx = sx_ref[...]
        hx_old, cx_old = sx[:, 0:hdim], sx[:, hdim:2 * hdim]
        xhl = jnp.concatenate([h3n, hx_old], axis=1).astype(bf16)  # (1, 2*hdim)
        hxn, cxn = _lstm_gates(xhl, wl_ref, bl_ref, cx_old, hdim)
        sxo_ref[...] = jnp.concatenate([hxn, cxn], axis=1)

        # -------- critic / actor / actor2 heads (one fused matmul) -----------
        head = jnp.dot(hxn.astype(bf16), whd_ref[...],
                       preferred_element_type=f32) + bhd_ref[...]
        softsign = head / (1.0 + jnp.abs(head))              # F.softsign
        amask = am_ref[...]                                  # 1.0 on actor lanes
        heads_ref[...] = head + amask * (softsign - head)

    return kernel


def _build_fused_call(cfg):
    o1, o2 = cfg["o1"], cfg["o2"]
    P1, P2 = o1 * o1, o2 * o2
    c1d, c2d, c3d = cfg["couts"]
    hdim = cfg["hidden"]
    K1 = cfg["kx1"] + 9 * c1d
    K2 = cfg["kx2_pad"] + 9 * c2d
    f32, bf16 = jnp.float32, jnp.bfloat16

    out_shape = (
        jax.ShapeDtypeStruct((1, 128), f32),                 # packed heads
        jax.ShapeDtypeStruct((P1, 2 * c1d), f32),            # (h1 | c1)
        jax.ShapeDtypeStruct((P2, 2 * c2d), f32),            # (h2 | c2)
        jax.ShapeDtypeStruct((1, 2 * c3d), f32),             # (h3 | c3)
        jax.ShapeDtypeStruct((1, 2 * hdim), f32),            # (hx | cx)
    )
    scratch = [
        pltpu.VMEM((P1 + 2 * (o1 + 1), c1d), f32),           # hpad1 (halo'd h1)
        pltpu.VMEM((P2 + 2 * (o2 + 1), c2d), f32),           # hpad2 (halo'd h2)
        pltpu.VMEM((P1, K1), bf16),                          # xh1 patches (bf16)
        pltpu.VMEM((P2, K2), bf16),                          # xh2 patches (bf16)
    ]
    vmem = lambda: pl.BlockSpec(memory_space=pltpu.MemorySpace.VMEM)
    return pl.pallas_call(
        _build_kernel(cfg),
        out_shape=out_shape,
        in_specs=[vmem() for _ in range(18)],
        out_specs=tuple(vmem() for _ in range(5)),
        scratch_shapes=scratch,
        # recurrent state updated in place: inputs 4..7 -> outputs 1..4
        input_output_aliases={4 + k: 1 + k for k in range(4)},
    )


# --------------------------- model build + forward ---------------------------

def make_actor_critic(key, in_channels, n_frames, hw, action_dim):
    cin1 = n_frames * in_channels
    c1d, c2d, c3d = 32, 64, 128
    hdim = 128
    A = action_dim
    assert 2 * A + 1 <= 128, "packed head slab assumes 2*A+1 <= 128"

    kk1, st1 = 4, 2
    o1 = _conv_out(hw, kk1, st1)
    o2 = _conv_out(o1, 3, 2)
    o3 = _conv_out(o2, 3, 1)
    # TODO(synk): ConvLSTM class body is not in the reference source; the
    # standard formulation is assumed (stride-s input conv + 3x3 same-pad
    # hidden conv, gate order i,f,g,o, single fused bias = bias_ih + bias_hh).
    assert o3 == 1, "this fused kernel assumes the last ConvLSTM output is 1x1"
    P1, P2 = o1 * o1, o2 * o2

    kx1 = kk1 * kk1 * cin1                     # 128 for this config
    kx2 = 9 * c1d                              # 288
    kx2_pad = ((kx2 + 127) // 128) * 128       # 384 (lane-aligned h-block start)
    kh1, kh2, kh3 = 9 * c1d, 9 * c2d, c3d      # layer-3 hidden: centre tap only
    kx3 = 9 * c2d
    lstm_in = c3d * o3 * o3

    def _normal(k, shape, fan_in):
        return jax.random.normal(k, shape, jnp.float32) / np.sqrt(fan_in)

    keys = jax.random.split(key, 12)
    w1 = jnp.concatenate([_normal(keys[0], (kx1, 4 * c1d), kx1),
                          _normal(keys[1], (kh1, 4 * c1d), kh1)], axis=0)
    w2 = jnp.concatenate([_normal(keys[2], (kx2, 4 * c2d), kx2),
                          jnp.zeros((kx2_pad - kx2, 4 * c2d), jnp.float32),
                          _normal(keys[3], (kh2, 4 * c2d), kh2)], axis=0)
    w3 = jnp.concatenate([_normal(keys[4], (kx3, 4 * c3d), kx3),
                          _normal(keys[5], (kh3, 4 * c3d), kh3)], axis=0)
    wl = jnp.concatenate([_normal(keys[6], (lstm_in, 4 * hdim), lstm_in),
                          _normal(keys[7], (hdim, 4 * hdim), hdim)], axis=0)

    wc = _norm_col_init(keys[8], (1, hdim), 1.0)
    wa = _norm_col_init(keys[9], (A, hdim), 0.01)
    wa2 = _norm_col_init(keys[10], (A, hdim), 0.01)
    whd = jnp.zeros((hdim, 128), jnp.float32)
    whd = whd.at[:, 0:1].set(wc.T)                 # lane 0        -> critic
    whd = whd.at[:, 1:1 + A].set(wa.T)             # lanes 1..A    -> actor
    whd = whd.at[:, 1 + A:1 + 2 * A].set(wa2.T)    # lanes A+1..2A -> actor2

    amask = np.zeros((1, 128), np.float32)
    amask[0, 1:1 + A] = 1.0                        # softsign on actor lanes only

    bf16 = jnp.bfloat16
    params = dict(
        w1=w1.astype(bf16), b1=jnp.zeros((1, 4 * c1d), jnp.float32),
        w2=w2.astype(bf16), b2=jnp.zeros((1, 4 * c2d), jnp.float32),
        w3=w3.astype(bf16), b3=jnp.zeros((1, 4 * c3d), jnp.float32),
        wl=wl.astype(bf16), bl=jnp.zeros((1, 4 * hdim), jnp.float32),
        whd=whd.astype(bf16), bhd=jnp.zeros((1, 128), jnp.float32),
        mask1=jnp.asarray(_same_pad_mask_np(o1, o1)),
        mask2=jnp.asarray(_same_pad_mask_np(o2, o2)),
        amask=jnp.asarray(amask),
    )

    cfg = dict(o1=o1, o2=o2, couts=(c1d, c2d, c3d), hidden=hdim,
               kx1=kx1, kx2_pad=kx2_pad)
    fused_call = _build_fused_call(cfg)

    def initialize_state():
        z = lambda *s: jnp.zeros(s, jnp.float32)
        return (z(P1, 2 * c1d), z(P2, 2 * c2d), z(1, 2 * c3d), z(1, 2 * hdim))

    def initialize_frames():
        return jnp.zeros((1, cin1, hw, hw), jnp.float32)

    def forward(params, ob, state, frames):
        s1, s2, s3, sx = state
        # TODO(synk): senc_NNGrid is not defined in the reference source; `ob`
        # is assumed to already be its (1, C, H, W) grid encoding.
        frames = jnp.concatenate([frames[:, in_channels:], ob], axis=1)
        xp1 = _im2col_nopad(frames[0], kk1, st1).astype(jnp.bfloat16)  # (P1, kx1)
        heads, s1n, s2n, s3n, sxn = fused_call(
            xp1, params["mask1"], params["mask2"], params["amask"],
            s1, s2, s3, sx,
            params["w1"], params["b1"], params["w2"], params["b2"],
            params["w3"], params["b3"], params["wl"], params["bl"],
            params["whd"], params["bhd"])
        critic = heads[:, 0:1]
        actor = heads[:, 1:1 + A]
        actor2 = heads[:, 1 + A:1 + 2 * A]
        return critic, actor, actor2, (s1n, s2n, s3n, sxn), frames

    # Donate the recurrent state so the pallas-level input_output_aliases
    # become true in-place updates (frames kept as a separate, non-donated arg).
    forward_jit = jax.jit(forward, donate_argnums=(2,))
    return params, initialize_state, initialize_frames, forward_jit


# ------------------------------------ main ------------------------------------

if __name__ == "__main__":
    C_IN, HW, N_FRAMES, ACTION_DIM = 4, 16, 2, 6
    key = jax.random.PRNGKey(0)
    k_param, k_ob1, k_ob2 = jax.random.split(key, 3)

    params, init_state, init_frames, forward = make_actor_critic(
        k_param, C_IN, N_FRAMES, HW, ACTION_DIM)
    state = init_state()
    frames = init_frames()

    ob1 = jax.random.normal(k_ob1, (1, C_IN, HW, HW), dtype=jnp.float32)
    ob2 = jax.random.normal(k_ob2, (1, C_IN, HW, HW), dtype=jnp.float32)

    # two recurrent steps (second step exercises the non-zero hidden state)
    critic, actor, actor2, state, frames = forward(params, ob1, state, frames)
    critic, actor, actor2, state, frames = forward(params, ob2, state, frames)
    jax.block_until_ready((critic, actor, actor2, state, frames))

    assert critic.shape == (1, 1)
    assert actor.shape == (1, ACTION_DIM)
    assert actor2.shape == (1, ACTION_DIM)
    assert state[0].shape == (49, 64) and state[1].shape == (9, 128)
    assert state[2].shape == (1, 256) and state[3].shape == (1, 256)
    assert frames.shape == (1, N_FRAMES * C_IN, HW, HW)
    assert bool(jnp.all(jnp.isfinite(critic)))
    assert bool(jnp.all(jnp.isfinite(actor)))
    assert bool(jnp.all(jnp.isfinite(actor2)))
    assert bool(jnp.all(jnp.abs(actor) <= 1.0))   # softsign range
    print("KERNEL_OK")
</pallas_src>

<mosaic_0001>
module attributes {stable_mosaic.version = 11 : i64} {
  func.func @kernel(%arg0: memref<49x128xbf16, #tpu.memory_space<vmem>>, %arg1: memref<49x9xf32, #tpu.memory_space<vmem>>, %arg2: memref<9x9xf32, #tpu.memory_space<vmem>>, %arg3: memref<1x128xf32, #tpu.memory_space<vmem>>, %arg4: memref<49x64xf32, #tpu.memory_space<vmem>>, %arg5: memref<9x128xf32, #tpu.memory_space<vmem>>, %arg6: memref<1x256xf32, #tpu.memory_space<vmem>>, %arg7: memref<1x256xf32, #tpu.memory_space<vmem>>, %arg8: memref<416x128xbf16, #tpu.memory_space<vmem>>, %arg9: memref<1x128xf32, #tpu.memory_space<vmem>>, %arg10: memref<960x256xbf16, #tpu.memory_space<vmem>>, %arg11: memref<1x256xf32, #tpu.memory_space<vmem>>, %arg12: memref<704x512xbf16, #tpu.memory_space<vmem>>, %arg13: memref<1x512xf32, #tpu.memory_space<vmem>>, %arg14: memref<256x512xbf16, #tpu.memory_space<vmem>>, %arg15: memref<1x512xf32, #tpu.memory_space<vmem>>, %arg16: memref<128x128xbf16, #tpu.memory_space<vmem>>, %arg17: memref<1x128xf32, #tpu.memory_space<vmem>>, %arg18: memref<1x128xf32, #tpu.memory_space<vmem>>, %arg19: memref<49x64xf32, #tpu.memory_space<vmem>>, %arg20: memref<9x128xf32, #tpu.memory_space<vmem>>, %arg21: memref<1x256xf32, #tpu.memory_space<vmem>>, %arg22: memref<1x256xf32, #tpu.memory_space<vmem>>, %arg23: memref<65x32xf32, #tpu.memory_space<vmem>>, %arg24: memref<17x64xf32, #tpu.memory_space<vmem>>, %arg25: memref<49x416xbf16, #tpu.memory_space<vmem>>, %arg26: memref<9x960xbf16, #tpu.memory_space<vmem>>) attributes {dimension_semantics = [], scalar_prefetch = 0 : i64, scratch_operands = 4 : i64, tpu.core_type = #tpu.core_type<tc>} {
    %c0 = arith.constant 0 : index
    %c0_0 = arith.constant 0 : index
    %0 = vector.load %arg4[%c0, %c0_0] : memref<49x64xf32, #tpu.memory_space<vmem>>, vector<49x64xf32>
    %1 = vector.extract_strided_slice %0 {offsets = [0, 0], sizes = [49, 32], strides = [1, 1]} : vector<49x64xf32> to vector<49x32xf32>
    %2 = vector.extract_strided_slice %0 {offsets = [0, 32], sizes = [49, 32], strides = [1, 1]} : vector<49x64xf32> to vector<49x32xf32>
    %c0_1 = arith.constant 0 : index
    %c0_2 = arith.constant 0 : index
    %3 = vector.load %arg0[%c0_1, %c0_2] : memref<49x128xbf16, #tpu.memory_space<vmem>>, vector<49x128xbf16>
    %c0_3 = arith.constant 0 : index
    %c0_4 = arith.constant 0 : index
    %4 = vector.load %arg25[%c0_3, %c0_4] : memref<49x416xbf16, #tpu.memory_space<vmem>>, vector<49x128xbf16>
    tpu.vector_store %arg25[%c0_3, %c0_4], %3 {strides = array<i32>} : memref<49x416xbf16, #tpu.memory_space<vmem>>, vector<49x128xbf16>,
    %c0_5 = arith.constant 0 : index
    %c0_6 = arith.constant 0 : index
    %5 = vector.load %arg1[%c0_5, %c0_6] : memref<49x9xf32, #tpu.memory_space<vmem>>, vector<49x9xf32>
    %cst = arith.constant 0.000000e+00 : f32
    %6 = vector.broadcast %cst : f32 to vector<8x32xf32>
    %c0_7 = arith.constant 0 : index
    %c0_8 = arith.constant 0 : index
    %7 = vector.load %arg23[%c0_7, %c0_8] : memref<65x32xf32, #tpu.memory_space<vmem>>, vector<8x32xf32>
    tpu.vector_store %arg23[%c0_7, %c0_8], %6 {strides = array<i32>} : memref<65x32xf32, #tpu.memory_space<vmem>>, vector<8x32xf32>,
    %c57 = arith.constant 57 : index
    %c0_9 = arith.constant 0 : index
    %8 = vector.load %arg23[%c57, %c0_9] : memref<65x32xf32, #tpu.memory_space<vmem>>, vector<8x32xf32>
    tpu.vector_store %arg23[%c57, %c0_9], %6 {strides = array<i32>} : memref<65x32xf32, #tpu.memory_space<vmem>>, vector<8x32xf32>,
    %c8 = arith.constant 8 : index
    %c0_10 = arith.constant 0 : index
    %9 = vector.load %arg23[%c8, %c0_10] : memref<65x32xf32, #tpu.memory_space<vmem>>, vector<49x32xf32>
    tpu.vector_store %arg23[%c8, %c0_10], %1 {strides = array<i32>} : memref<65x32xf32, #tpu.memory_space<vmem>>, vector<49x32xf32>,
    %c0_11 = arith.constant 0 : index
    %c0_12 = arith.constant 0 : index
    %10 = vector.load %arg23[%c0_11, %c0_12] : memref<65x32xf32, #tpu.memory_space<vmem>>, vector<49x32xf32>
    %11 = vector.extract_strided_slice %5 {offsets = [0, 0], sizes = [49, 1], strides = [1, 1]} : vector<49x9xf32> to vector<49x1xf32>
    %12 = vector.broadcast %11 : vector<49x1xf32> to vector<49x32xf32>
    %13 = arith.mulf %10, %12 : vector<49x32xf32>
    %c1 = arith.constant 1 : index
    %c0_13 = arith.constant 0 : index
    %14 = vector.load %arg23[%c1, %c0_13] : memref<65x32xf32, #tpu.memory_space<vmem>>, vector<49x32xf32>
    %15 = vector.extract_strided_slice %5 {offsets = [0, 1], sizes = [49, 1], strides = [1, 1]} : vector<49x9xf32> to vector<49x1xf32>
    %16 = vector.broadcast %15 : vector<49x1xf32> to vector<49x32xf32>
    %17 = arith.mulf %14, %16 : vector<49x32xf32>
    %c2 = arith.constant 2 : index
    %c0_14 = arith.constant 0 : index
    %18 = vector.load %arg23[%c2, %c0_14] : memref<65x32xf32, #tpu.memory_space<vmem>>, vector<49x32xf32>
    %19 = vector.extract_strided_slice %5 {offsets = [0, 2], sizes = [49, 1], strides = [1, 1]} : vector<49x9xf32> to vector<49x1xf32>
    %20 = vector.broadcast %19 : vector<49x1xf32> to vector<49x32xf32>
    %21 = arith.mulf %18, %20 : vector<49x32xf32>
    %c7 = arith.constant 7 : index
    %c0_15 = arith.constant 0 : index
    %22 = vector.load %arg23[%c7, %c0_15] : memref<65x32xf32, #tpu.memory_space<vmem>>, vector<49x32xf32>
    %23 = vector.extract_strided_slice %5 {offsets = [0, 3], sizes = [49, 1], strides = [1, 1]} : vector<49x9xf32> to vector<49x1xf32>
    %24 = vector.broadcast %23 : vector<49x1xf32> to vector<49x32xf32>
    %25 = arith.mulf %22, %24 : vector<49x32xf32>
    %c8_16 = arith.constant 8 : index
    %c0_17 = arith.constant 0 : index
    %26 = vector.load %arg23[%c8_16, %c0_17] : memref<65x32xf32, #tpu.memory_space<vmem>>, vector<49x32xf32>
    %27 = vector.extract_strided_slice %5 {offsets = [0, 4], sizes = [49, 1], strides = [1, 1]} : vector<49x9xf32> to vector<49x1xf32>
    %28 = vector.broadcast %27 : vector<49x1xf32> to vector<49x32xf32>
    %29 = arith.mulf %26, %28 : vector<49x32xf32>
    %c9 = arith.constant 9 : index
    %c0_18 = arith.constant 0 : index
    %30 = vector.load %arg23[%c9, %c0_18] : memref<65x32xf32, #tpu.memory_space<vmem>>, vector<49x32xf32>
    %31 = vector.extract_strided_slice %5 {offsets = [0, 5], sizes = [49, 1], strides = [1, 1]} : vector<49x9xf32> to vector<49x1xf32>
    %32 = vector.broadcast %31 : vector<49x1xf32> to vector<49x32xf32>
    %33 = arith.mulf %30, %32 : vector<49x32xf32>
    %c14 = arith.constant 14 : index
    %c0_19 = arith.constant 0 : index
    %34 = vector.load %arg23[%c14, %c0_19] : memref<65x32xf32, #tpu.memory_space<vmem>>, vector<49x32xf32>
    %35 = vector.extract_strided_slice %5 {offsets = [0, 6], sizes = [49, 1], strides = [1, 1]} : vector<49x9xf32> to vector<49x1xf32>
    %36 = vector.broadcast %35 : vector<49x1xf32> to vector<49x32xf32>
    %37 = arith.mulf %34, %36 : vector<49x32xf32>
    %c15 = arith.constant 15 : index
    %c0_20 = arith.constant 0 : index
    %38 = vector.load %arg23[%c15, %c0_20] : memref<65x32xf32, #tpu.memory_space<vmem>>, vector<49x32xf32>
    %39 = vector.extract_strided_slice %5 {offsets = [0, 7], sizes = [49, 1], strides = [1, 1]} : vector<49x9xf32> to vector<49x1xf32>
    %40 = vector.broadcast %39 : vector<49x1xf32> to vector<49x32xf32>
    %41 = arith.mulf %38, %40 : vector<49x32xf32>
    %c16 = arith.constant 16 : index
    %c0_21 = arith.constant 0 : index
    %42 = vector.load %arg23[%c16, %c0_21] : memref<65x32xf32, #tpu.memory_space<vmem>>, vector<49x32xf32>
    %43 = vector.extract_strided_slice %5 {offsets = [0, 8], sizes = [49, 1], strides = [1, 1]} : vector<49x9xf32> to vector<49x1xf32>
    %44 = vector.broadcast %43 : vector<49x1xf32> to vector<49x32xf32>
    %45 = arith.mulf %42, %44 : vector<49x32xf32>
    %46 = tpu.concatenate %13, %17, %21, %25, %29, %33, %37, %41, %45 in 1 : vector<49x32xf32>, vector<49x32xf32>, vector<49x32xf32>, vector<49x32xf32>, vector<49x32xf32>, vector<49x32xf32>, vector<49x32xf32>, vector<49x32xf32>, vector<49x32xf32> -> vector<49x288xf32>
    %47 = arith.truncf %46 : vector<49x288xf32> to vector<49x288xbf16>
    %c0_22 = arith.constant 0 : index
    %c128 = arith.constant 128 : index
    %48 = vector.load %arg25[%c0_22, %c128] : memref<49x416xbf16, #tpu.memory_space<vmem>>, vector<49x288xbf16>
    tpu.vector_store %arg25[%c0_22, %c128], %47 {strides = array<i32>} : memref<49x416xbf16, #tpu.memory_space<vmem>>, vector<49x288xbf16>,
    %c0_23 = arith.constant 0 : index
    %c0_24 = arith.constant 0 : index
    %49 = vector.load %arg25[%c0_23, %c0_24] : memref<49x416xbf16, #tpu.memory_space<vmem>>, vector<49x416xbf16>
    %c0_25 = arith.constant 0 : index
    %c0_26 = arith.constant 0 : index
    %50 = vector.load %arg8[%c0_25, %c0_26] : memref<416x128xbf16, #tpu.memory_space<vmem>>, vector<416x128xbf16>
    %cst_27 = arith.constant dense<0.000000e+00> : vector<49x128xf32>
    %51 = tpu.matmul %49, %50, %cst_27 {dimension_numbers = #tpu.dot_dimension_numbers<[1], [0], [0], [1], [0, 0, 1, 1], [], []>} : vector<49x416xbf16>, vector<416x128xbf16>, vector<49x128xf32> -> vector<49x128xf32>
    %c0_28 = arith.constant 0 : index
    %c0_29 = arith.constant 0 : index
    %52 = vector.load %arg9[%c0_28, %c0_29] : memref<1x128xf32, #tpu.memory_space<vmem>>, vector<1x128xf32>
    %53 = vector.broadcast %52 : vector<1x128xf32> to vector<49x128xf32>
    %54 = arith.addf %51, %53 : vector<49x128xf32>
    %55 = vector.extract_strided_slice %54 {offsets = [0, 0], sizes = [49, 32], strides = [1, 1]} : vector<49x128xf32> to vector<49x32xf32>
    %56 = arith.negf %55 : vector<49x32xf32>
    %57 = math.exp %56 : vector<49x32xf32>
    %cst_30 = arith.constant 1.000000e+00 : f32
    %58 = vector.broadcast %cst_30 : f32 to vector<49x32xf32>
    %59 = arith.addf %58, %57 : vector<49x32xf32>
    %60 = arith.divf %58, %59 : vector<49x32xf32>
    %61 = vector.extract_strided_slice %54 {offsets = [0, 32], sizes = [49, 32], strides = [1, 1]} : vector<49x128xf32> to vector<49x32xf32>
    %62 = arith.negf %61 : vector<49x32xf32>
    %63 = math.exp %62 : vector<49x32xf32>
    %cst_31 = arith.constant 1.000000e+00 : f32
    %64 = vector.broadcast %cst_31 : f32 to vector<49x32xf32>
    %65 = arith.addf %64, %63 : vector<49x32xf32>
    %66 = arith.divf %64, %65 : vector<49x32xf32>
    %67 = vector.extract_strided_slice %54 {offsets = [0, 64], sizes = [49, 32], strides = [1, 1]} : vector<49x128xf32> to vector<49x32xf32>
    %68 = math.tanh %67 : vector<49x32xf32>
    %69 = vector.extract_strided_slice %54 {offsets = [0, 96], sizes = [49, 32], strides = [1, 1]} : vector<49x128xf32> to vector<49x32xf32>
    %70 = arith.negf %69 : vector<49x32xf32>
    %71 = math.exp %70 : vector<49x32xf32>
    %cst_32 = arith.constant 1.000000e+00 : f32
    %72 = vector.broadcast %cst_32 : f32 to vector<49x32xf32>
    %73 = arith.addf %72, %71 : vector<49x32xf32>
    %74 = arith.divf %72, %73 : vector<49x32xf32>
    %75 = arith.mulf %66, %2 : vector<49x32xf32>
    %76 = arith.mulf %60, %68 : vector<49x32xf32>
    %77 = arith.addf %75, %76 : vector<49x32xf32>
    %78 = math.tanh %77 : vector<49x32xf32>
    %79 = arith.mulf %74, %78 : vector<49x32xf32>
    %80 = tpu.concatenate %79, %77 in 1 : vector<49x32xf32>, vector<49x32xf32> -> vector<49x64xf32>
    %c0_33 = arith.constant 0 : index
    %c0_34 = arith.constant 0 : index
    %81 = vector.load %arg19[%c0_33, %c0_34] : memref<49x64xf32, #tpu.memory_space<vmem>>, vector<49x64xf32>
    tpu.vector_store %arg19[%c0_33, %c0_34], %80 {strides = array<i32>} : memref<49x64xf32, #tpu.memory_space<vmem>>, vector<49x64xf32>,
    %c0_35 = arith.constant 0 : index
    %c0_36 = arith.constant 0 : index
    %82 = vector.load %arg5[%c0_35, %c0_36] : memref<9x128xf32, #tpu.memory_space<vmem>>, vector<9x128xf32>
    %83 = vector.extract_strided_slice %82 {offsets = [0, 0], sizes = [9, 64], strides = [1, 1]} : vector<9x128xf32> to vector<9x64xf32>
    %84 = vector.extract_strided_slice %82 {offsets = [0, 64], sizes = [9, 64], strides = [1, 1]} : vector<9x128xf32> to vector<9x64xf32>
    %c0_37 = arith.constant 0 : index
    %c0_38 = arith.constant 0 : index
    %85 = tpu.strided_load %arg19[%c0_37, %c0_38] {strides = array<i32: 2, 1>} : memref<49x64xf32, #tpu.memory_space<vmem>>, vector<3x64xf32>
    %86 = vector.extract_strided_slice %85 {offsets = [0, 0], sizes = [3, 32], strides = [1, 1]} : vector<3x64xf32> to vector<3x32xf32>
    %c1_39 = arith.constant 1 : index
    %c0_40 = arith.constant 0 : index
    %87 = tpu.strided_load %arg19[%c1_39, %c0_40] {strides = array<i32: 2, 1>} : memref<49x64xf32, #tpu.memory_space<vmem>>, vector<3x64xf32>
    %88 = vector.extract_strided_slice %87 {offsets = [0, 0], sizes = [3, 32], strides = [1, 1]} : vector<3x64xf32> to vector<3x32xf32>
    %c2_41 = arith.constant 2 : index
    %c0_42 = arith.constant 0 : index
    %89 = tpu.strided_load %arg19[%c2_41, %c0_42] {strides = array<i32: 2, 1>} : memref<49x64xf32, #tpu.memory_space<vmem>>, vector<3x64xf32>
    %90 = vector.extract_strided_slice %89 {offsets = [0, 0], sizes = [3, 32], strides = [1, 1]} : vector<3x64xf32> to vector<3x32xf32>
    %c7_43 = arith.constant 7 : index
    %c0_44 = arith.constant 0 : index
    %91 = tpu.strided_load %arg19[%c7_43, %c0_44] {strides = array<i32: 2, 1>} : memref<49x64xf32, #tpu.memory_space<vmem>>, vector<3x64xf32>
    %92 = vector.extract_strided_slice %91 {offsets = [0, 0], sizes = [3, 32], strides = [1, 1]} : vector<3x64xf32> to vector<3x32xf32>
    %c8_45 = arith.constant 8 : index
    %c0_46 = arith.constant 0 : index
    %93 = tpu.strided_load %arg19[%c8_45, %c0_46] {strides = array<i32: 2, 1>} : memref<49x64xf32, #tpu.memory_space<vmem>>, vector<3x64xf32>
    %94 = vector.extract_strided_slice %93 {offsets = [0, 0], sizes = [3, 32], strides = [1, 1]} : vector<3x64xf32> to vector<3x32xf32>
    %c9_47 = arith.constant 9 : index
    %c0_48 = arith.constant 0 : index
    %95 = tpu.strided_load %arg19[%c9_47, %c0_48] {strides = array<i32: 2, 1>} : memref<49x64xf32, #tpu.memory_space<vmem>>, vector<3x64xf32>
    %96 = vector.extract_strided_slice %95 {offsets = [0, 0], sizes = [3, 32], strides = [1, 1]} : vector<3x64xf32> to vector<3x32xf32>
    %c14_49 = arith.constant 14 : index
    %c0_50 = arith.constant 0 : index
    %97 = tpu.strided_load %arg19[%c14_49, %c0_50] {strides = array<i32: 2, 1>} : memref<49x64xf32, #tpu.memory_space<vmem>>, vector<3x64xf32>
    %98 = vector.extract_strided_slice %97 {offsets = [0, 0], sizes = [3, 32], strides = [1, 1]} : vector<3x64xf32> to vector<3x32xf32>
    %c15_51 = arith.constant 15 : index
    %c0_52 = arith.constant 0 : index
    %99 = tpu.strided_load %arg19[%c15_51, %c0_52] {strides = array<i32: 2, 1>} : memref<49x64xf32, #tpu.memory_space<vmem>>, vector<3x64xf32>
    %100 = vector.extract_strided_slice %99 {offsets = [0, 0], sizes = [3, 32], strides = [1, 1]} : vector<3x64xf32> to vector<3x32xf32>
    %c16_53 = arith.constant 16 : index
    %c0_54 = arith.constant 0 : index
    %101 = tpu.strided_load %arg19[%c16_53, %c0_54] {strides = array<i32: 2, 1>} : memref<49x64xf32, #tpu.memory_space<vmem>>, vector<3x64xf32>
    %102 = vector.extract_strided_slice %101 {offsets = [0, 0], sizes = [3, 32], strides = [1, 1]} : vector<3x64xf32> to vector<3x32xf32>
    %103 = tpu.concatenate %86, %88, %90, %92, %94, %96, %98, %100, %102 in 1 : vector<3x32xf32>, vector<3x32xf32>, vector<3x32xf32>, vector<3x32xf32>, vector<3x32xf32>, vector<3x32xf32>, vector<3x32xf32>, vector<3x32xf32>, vector<3x32xf32> -> vector<3x288xf32>
    %c14_55 = arith.constant 14 : index
    %c0_56 = arith.constant 0 : index
    %104 = tpu.strided_load %arg19[%c14_55, %c0_56] {strides = array<i32: 2, 1>} : memref<49x64xf32, #tpu.memory_space<vmem>>, vector<3x64xf32>
    %105 = vector.extract_strided_slice %104 {offsets = [0, 0], sizes = [3, 32], strides = [1, 1]} : vector<3x64xf32> to vector<3x32xf32>
    %c15_57 = arith.constant 15 : index
    %c0_58 = arith.constant 0 : index
    %106 = tpu.strided_load %arg19[%c15_57, %c0_58] {strides = array<i32: 2, 1>} : memref<49x64xf32, #tpu.memory_space<vmem>>, vector<3x64xf32>
    %107 = vector.extract_strided_slice %106 {offsets = [0, 0], sizes = [3, 32], strides = [1, 1]} : vector<3x64xf32> to vector<3x32xf32>
    %c16_59 = arith.constant 16 : index
    %c0_60 = arith.constant 0 : index
    %108 = tpu.strided_load %arg19[%c16_59, %c0_60] {strides = array<i32: 2, 1>} : memref<49x64xf32, #tpu.memory_space<vmem>>, vector<3x64xf32>
    %109 = vector.extract_strided_slice %108 {offsets = [0, 0], sizes = [3, 32], strides = [1, 1]} : vector<3x64xf32> to vector<3x32xf32>
    %c21 = arith.constant 21 : index
    %c0_61 = arith.constant 0 : index
    %110 = tpu.strided_load %arg19[%c21, %c0_61] {strides = array<i32: 2, 1>} : memref<49x64xf32, #tpu.memory_space<vmem>>, vector<3x64xf32>
    %111 = vector.extract_strided_slice %110 {offsets = [0, 0], sizes = [3, 32], strides = [1, 1]} : vector<3x64xf32> to vector<3x32xf32>
    %c22 = arith.constant 22 : index
    %c0_62 = arith.constant 0 : index
    %112 = tpu.strided_load %arg19[%c22, %c0_62] {strides = array<i32: 2, 1>} : memref<49x64xf32, #tpu.memory_space<vmem>>, vector<3x64xf32>
    %113 = vector.extract_strided_slice %112 {offsets = [0, 0], sizes = [3, 32], strides = [1, 1]} : vector<3x64xf32> to vector<3x32xf32>
    %c23 = arith.constant 23 : index
    %c0_63 = arith.constant 0 : index
    %114 = tpu.strided_load %arg19[%c23, %c0_63] {strides = array<i32: 2, 1>} : memref<49x64xf32, #tpu.memory_space<vmem>>, vector<3x64xf32>
    %115 = vector.extract_strided_slice %114 {offsets = [0, 0], sizes = [3, 32], strides = [1, 1]} : vector<3x64xf32> to vector<3x32xf32>
    %c28 = arith.constant 28 : index
    %c0_64 = arith.constant 0 : index
    %116 = tpu.strided_load %arg19[%c28, %c0_64] {strides = array<i32: 2, 1>} : memref<49x64xf32, #tpu.memory_space<vmem>>, vector<3x64xf32>
    %117 = vector.extract_strided_slice %116 {offsets = [0, 0], sizes = [3, 32], strides = [1, 1]} : vector<3x64xf32> to vector<3x32xf32>
    %c29 = arith.constant 29 : index
    %c0_65 = arith.constant 0 : index
    %118 = tpu.strided_load %arg19[%c29, %c0_65] {strides = array<i32: 2, 1>} : memref<49x64xf32, #tpu.memory_space<vmem>>, vector<3x64xf32>
    %119 = vector.extract_strided_slice %118 {offsets = [0, 0], sizes = [3, 32], strides = [1, 1]} : vector<3x64xf32> to vector<3x32xf32>
    %c30 = arith.constant 30 : index
    %c0_66 = arith.constant 0 : index
    %120 = tpu.strided_load %arg19[%c30, %c0_66] {strides = array<i32: 2, 1>} : memref<49x64xf32, #tpu.memory_space<vmem>>, vector<3x64xf32>
    %121 = vector.extract_strided_slice %120 {offsets = [0, 0], sizes = [3, 32], strides = [1, 1]} : vector<3x64xf32> to vector<3x32xf32>
    %122 = tpu.concatenate %105, %107, %109, %111, %113, %115, %117, %119, %121 in 1 : vector<3x32xf32>, vector<3x32xf32>, vector<3x32xf32>, vector<3x32xf32>, vector<3x32xf32>, vector<3x32xf32>, vector<3x32xf32>, vector<3x32xf32>, vector<3x32xf32> -> vector<3x288xf32>
    %c28_67 = arith.constant 28 : index
    %c0_68 = arith.constant 0 : index
    %123 = tpu.strided_load %arg19[%c28_67, %c0_68] {strides = array<i32: 2, 1>} : memref<49x64xf32, #tpu.memory_space<vmem>>, vector<3x64xf32>
    %124 = vector.extract_strided_slice %123 {offsets = [0, 0], sizes = [3, 32], strides = [1, 1]} : vector<3x64xf32> to vector<3x32xf32>
    %c29_69 = arith.constant 29 : index
    %c0_70 = arith.constant 0 : index
    %125 = tpu.strided_load %arg19[%c29_69, %c0_70] {strides = array<i32: 2, 1>} : memref<49x64xf32, #tpu.memory_space<vmem>>, vector<3x64xf32>
    %126 = vector.extract_strided_slice %125 {offsets = [0, 0], sizes = [3, 32], strides = [1, 1]} : vector<3x64xf32> to vector<3x32xf32>
    %c30_71 = arith.constant 30 : index
    %c0_72 = arith.constant 0 : index
    %127 = tpu.strided_load %arg19[%c30_71, %c0_72] {strides = array<i32: 2, 1>} : memref<49x64xf32, #tpu.memory_space<vmem>>, vector<3x64xf32>
    %128 = vector.extract_strided_slice %127 {offsets = [0, 0], sizes = [3, 32], strides = [1, 1]} : vector<3x64xf32> to vector<3x32xf32>
    %c35 = arith.constant 35 : index
    %c0_73 = arith.constant 0 : index
    %129 = tpu.strided_load %arg19[%c35, %c0_73] {strides = array<i32: 2, 1>} : memref<49x64xf32, #tpu.memory_space<vmem>>, vector<3x64xf32>
    %130 = vector.extract_strided_slice %129 {offsets = [0, 0], sizes = [3, 32], strides = [1, 1]} : vector<3x64xf32> to vector<3x32xf32>
    %c36 = arith.constant 36 : index
    %c0_74 = arith.constant 0 : index
    %131 = tpu.strided_load %arg19[%c36, %c0_74] {strides = array<i32: 2, 1>} : memref<49x64xf32, #tpu.memory_space<vmem>>, vector<3x64xf32>
    %132 = vector.extract_strided_slice %131 {offsets = [0, 0], sizes = [3, 32], strides = [1, 1]} : vector<3x64xf32> to vector<3x32xf32>
    %c37 = arith.constant 37 : index
    %c0_75 = arith.constant 0 : index
    %133 = tpu.strided_load %arg19[%c37, %c0_75] {strides = array<i32: 2, 1>} : memref<49x64xf32, #tpu.memory_space<vmem>>, vector<3x64xf32>
    %134 = vector.extract_strided_slice %133 {offsets = [0, 0], sizes = [3, 32], strides = [1, 1]} : vector<3x64xf32> to vector<3x32xf32>
    %c42 = arith.constant 42 : index
    %c0_76 = arith.constant 0 : index
    %135 = tpu.strided_load %arg19[%c42, %c0_76] {strides = array<i32: 2, 1>} : memref<49x64xf32, #tpu.memory_space<vmem>>, vector<3x64xf32>
    %136 = vector.extract_strided_slice %135 {offsets = [0, 0], sizes = [3, 32], strides = [1, 1]} : vector<3x64xf32> to vector<3x32xf32>
    %c43 = arith.constant 43 : index
    %c0_77 = arith.constant 0 : index
    %137 = tpu.strided_load %arg19[%c43, %c0_77] {strides = array<i32: 2, 1>} : memref<49x64xf32, #tpu.memory_space<vmem>>, vector<3x64xf32>
    %138 = vector.extract_strided_slice %137 {offsets = [0, 0], sizes = [3, 32], strides = [1, 1]} : vector<3x64xf32> to vector<3x32xf32>
    %c44 = arith.constant 44 : index
    %c0_78 = arith.constant 0 : index
    %139 = tpu.strided_load %arg19[%c44, %c0_78] {strides = array<i32: 2, 1>} : memref<49x64xf32, #tpu.memory_space<vmem>>, vector<3x64xf32>
    %140 = vector.extract_strided_slice %139 {offsets = [0, 0], sizes = [3, 32], strides = [1, 1]} : vector<3x64xf32> to vector<3x32xf32>
    %141 = tpu.concatenate %124, %126, %128, %130, %132, %134, %136, %138, %140 in 1 : vector<3x32xf32>, vector<3x32xf32>, vector<3x32xf32>, vector<3x32xf32>, vector<3x32xf32>, vector<3x32xf32>, vector<3x32xf32>, vector<3x32xf32>, vector<3x32xf32> -> vector<3x288xf32>
    %142 = tpu.concatenate %103, %122, %141 in 0 : vector<3x288xf32>, vector<3x288xf32>, vector<3x288xf32> -> vector<9x288xf32>
    %cst_79 = arith.constant 0.000000e+00 : f32
    %143 = vector.broadcast %cst_79 : f32 to vector<9x96xf32>
    %144 = tpu.concatenate %142, %143 in 1 : vector<9x288xf32>, vector<9x96xf32> -> vector<9x384xf32>
    %145 = arith.truncf %144 : vector<9x384xf32> to vector<9x384xbf16>
    %c0_80 = arith.constant 0 : index
    %c0_81 = arith.constant 0 : index
    %146 = vector.load %arg26[%c0_80, %c0_81] : memref<9x960xbf16, #tpu.memory_space<vmem>>, vector<9x384xbf16>
    tpu.vector_store %arg26[%c0_80, %c0_81], %145 {strides = array<i32>} : memref<9x960xbf16, #tpu.memory_space<vmem>>, vector<9x384xbf16>,
    %c0_82 = arith.constant 0 : index
    %c0_83 = arith.constant 0 : index
    %147 = vector.load %arg2[%c0_82, %c0_83] : memref<9x9xf32, #tpu.memory_space<vmem>>, vector<9x9xf32>
    %cst_84 = arith.constant 0.000000e+00 : f32
    %148 = vector.broadcast %cst_84 : f32 to vector<4x64xf32>
    %c0_85 = arith.constant 0 : index
    %c0_86 = arith.constant 0 : index
    %149 = vector.load %arg24[%c0_85, %c0_86] : memref<17x64xf32, #tpu.memory_space<vmem>>, vector<4x64xf32>
    tpu.vector_store %arg24[%c0_85, %c0_86], %148 {strides = array<i32>} : memref<17x64xf32, #tpu.memory_space<vmem>>, vector<4x64xf32>,
    %c13 = arith.constant 13 : index
    %c0_87 = arith.constant 0 : index
    %150 = vector.load %arg24[%c13, %c0_87] : memref<17x64xf32, #tpu.memory_space<vmem>>, vector<4x64xf32>
    tpu.vector_store %arg24[%c13, %c0_87], %148 {strides = array<i32>} : memref<17x64xf32, #tpu.memory_space<vmem>>, vector<4x64xf32>,
    %c4 = arith.constant 4 : index
    %c0_88 = arith.constant 0 : index
    %151 = vector.load %arg24[%c4, %c0_88] : memref<17x64xf32, #tpu.memory_space<vmem>>, vector<9x64xf32>
    tpu.vector_store %arg24[%c4, %c0_88], %83 {strides = array<i32>} : memref<17x64xf32, #tpu.memory_space<vmem>>, vector<9x64xf32>,
    %c0_89 = arith.constant 0 : index
    %c0_90 = arith.constant 0 : index
    %152 = vector.load %arg24[%c0_89, %c0_90] : memref<17x64xf32, #tpu.memory_space<vmem>>, vector<9x64xf32>
    %153 = vector.extract_strided_slice %147 {offsets = [0, 0], sizes = [9, 1], strides = [1, 1]} : vector<9x9xf32> to vector<9x1xf32>
    %154 = vector.broadcast %153 : vector<9x1xf32> to vector<9x64xf32>
    %155 = arith.mulf %152, %154 : vector<9x64xf32>
    %c1_91 = arith.constant 1 : index
    %c0_92 = arith.constant 0 : index
    %156 = vector.load %arg24[%c1_91, %c0_92] : memref<17x64xf32, #tpu.memory_space<vmem>>, vector<9x64xf32>
    %157 = vector.extract_strided_slice %147 {offsets = [0, 1], sizes = [9, 1], strides = [1, 1]} : vector<9x9xf32> to vector<9x1xf32>
    %158 = vector.broadcast %157 : vector<9x1xf32> to vector<9x64xf32>
    %159 = arith.mulf %156, %158 : vector<9x64xf32>
    %c2_93 = arith.constant 2 : index
    %c0_94 = arith.constant 0 : index
    %160 = vector.load %arg24[%c2_93, %c0_94] : memref<17x64xf32, #tpu.memory_space<vmem>>, vector<9x64xf32>
    %161 = vector.extract_strided_slice %147 {offsets = [0, 2], sizes = [9, 1], strides = [1, 1]} : vector<9x9xf32> to vector<9x1xf32>
    %162 = vector.broadcast %161 : vector<9x1xf32> to vector<9x64xf32>
    %163 = arith.mulf %160, %162 : vector<9x64xf32>
    %c3 = arith.constant 3 : index
    %c0_95 = arith.constant 0 : index
    %164 = vector.load %arg24[%c3, %c0_95] : memref<17x64xf32, #tpu.memory_space<vmem>>, vector<9x64xf32>
    %165 = vector.extract_strided_slice %147 {offsets = [0, 3], sizes = [9, 1], strides = [1, 1]} : vector<9x9xf32> to vector<9x1xf32>
    %166 = vector.broadcast %165 : vector<9x1xf32> to vector<9x64xf32>
    %167 = arith.mulf %164, %166 : vector<9x64xf32>
    %c4_96 = arith.constant 4 : index
    %c0_97 = arith.constant 0 : index
    %168 = vector.load %arg24[%c4_96, %c0_97] : memref<17x64xf32, #tpu.memory_space<vmem>>, vector<9x64xf32>
    %169 = vector.extract_strided_slice %147 {offsets = [0, 4], sizes = [9, 1], strides = [1, 1]} : vector<9x9xf32> to vector<9x1xf32>
    %170 = vector.broadcast %169 : vector<9x1xf32> to vector<9x64xf32>
    %171 = arith.mulf %168, %170 : vector<9x64xf32>
    %c5 = arith.constant 5 : index
    %c0_98 = arith.constant 0 : index
    %172 = vector.load %arg24[%c5, %c0_98] : memref<17x64xf32, #tpu.memory_space<vmem>>, vector<9x64xf32>
    %173 = vector.extract_strided_slice %147 {offsets = [0, 5], sizes = [9, 1], strides = [1, 1]} : vector<9x9xf32> to vector<9x1xf32>
    %174 = vector.broadcast %173 : vector<9x1xf32> to vector<9x64xf32>
    %175 = arith.mulf %172, %174 : vector<9x64xf32>
    %c6 = arith.constant 6 : index
    %c0_99 = arith.constant 0 : index
    %176 = vector.load %arg24[%c6, %c0_99] : memref<17x64xf32, #tpu.memory_space<vmem>>, vector<9x64xf32>
    %177 = vector.extract_strided_slice %147 {offsets = [0, 6], sizes = [9, 1], strides = [1, 1]} : vector<9x9xf32> to vector<9x1xf32>
    %178 = vector.broadcast %177 : vector<9x1xf32> to vector<9x64xf32>
    %179 = arith.mulf %176, %178 : vector<9x64xf32>
    %c7_100 = arith.constant 7 : index
    %c0_101 = arith.constant 0 : index
    %180 = vector.load %arg24[%c7_100, %c0_101] : memref<17x64xf32, #tpu.memory_space<vmem>>, vector<9x64xf32>
    %181 = vector.extract_strided_slice %147 {offsets = [0, 7], sizes = [9, 1], strides = [1, 1]} : vector<9x9xf32> to vector<9x1xf32>
    %182 = vector.broadcast %181 : vector<9x1xf32> to vector<9x64xf32>
    %183 = arith.mulf %180, %182 : vector<9x64xf32>
    %c8_102 = arith.constant 8 : index
    %c0_103 = arith.constant 0 : index
    %184 = vector.load %arg24[%c8_102, %c0_103] : memref<17x64xf32, #tpu.memory_space<vmem>>, vector<9x64xf32>
    %185 = vector.extract_strided_slice %147 {offsets = [0, 8], sizes = [9, 1], strides = [1, 1]} : vector<9x9xf32> to vector<9x1xf32>
    %186 = vector.broadcast %185 : vector<9x1xf32> to vector<9x64xf32>
    %187 = arith.mulf %184, %186 : vector<9x64xf32>
    %188 = tpu.concatenate %155, %159, %163, %167, %171, %175, %179, %183, %187 in 1 : vector<9x64xf32>, vector<9x64xf32>, vector<9x64xf32>, vector<9x64xf32>, vector<9x64xf32>, vector<9x64xf32>, vector<9x64xf32>, vector<9x64xf32>, vector<9x64xf32> -> vector<9x576xf32>
    %189 = arith.truncf %188 : vector<9x576xf32> to vector<9x576xbf16>
    %c0_104 = arith.constant 0 : index
    %c384 = arith.constant 384 : index
    %190 = vector.load %arg26[%c0_104, %c384] : memref<9x960xbf16, #tpu.memory_space<vmem>>, vector<9x576xbf16>
    tpu.vector_store %arg26[%c0_104, %c384], %189 {strides = array<i32>} : memref<9x960xbf16, #tpu.memory_space<vmem>>, vector<9x576xbf16>,
    %c0_105 = arith.constant 0 : index
    %c0_106 = arith.constant 0 : index
    %191 = vector.load %arg26[%c0_105, %c0_106] : memref<9x960xbf16, #tpu.memory_space<vmem>>, vector<9x960xbf16>
    %c0_107 = arith.constant 0 : index
    %c0_108 = arith.constant 0 : index
    %192 = vector.load %arg10[%c0_107, %c0_108] : memref<960x256xbf16, #tpu.memory_space<vmem>>, vector<960x256xbf16>
    %cst_109 = arith.constant dense<0.000000e+00> : vector<9x256xf32>
    %193 = tpu.matmul %191, %192, %cst_109 {dimension_numbers = #tpu.dot_dimension_numbers<[1], [0], [0], [1], [0, 0, 1, 1], [], []>} : vector<9x960xbf16>, vector<960x256xbf16>, vector<9x256xf32> -> vector<9x256xf32>
    %c0_110 = arith.constant 0 : index
    %c0_111 = arith.constant 0 : index
    %194 = vector.load %arg11[%c0_110, %c0_111] : memref<1x256xf32, #tpu.memory_space<vmem>>, vector<1x256xf32>
    %195 = vector.broadcast %194 : vector<1x256xf32> to vector<9x256xf32>
    %196 = arith.addf %193, %195 : vector<9x256xf32>
    %197 = vector.extract_strided_slice %196 {offsets = [0, 0], sizes = [9, 64], strides = [1, 1]} : vector<9x256xf32> to vector<9x64xf32>
    %198 = arith.negf %197 : vector<9x64xf32>
    %199 = math.exp %198 : vector<9x64xf32>
    %cst_112 = arith.constant 1.000000e+00 : f32
    %200 = vector.broadcast %cst_112 : f32 to vector<9x64xf32>
    %201 = arith.addf %200, %199 : vector<9x64xf32>
    %202 = arith.divf %200, %201 : vector<9x64xf32>
    %203 = vector.extract_strided_slice %196 {offsets = [0, 64], sizes = [9, 64], strides = [1, 1]} : vector<9x256xf32> to vector<9x64xf32>
    %204 = arith.negf %203 : vector<9x64xf32>
    %205 = math.exp %204 : vector<9x64xf32>
    %cst_113 = arith.constant 1.000000e+00 : f32
    %206 = vector.broadcast %cst_113 : f32 to vector<9x64xf32>
    %207 = arith.addf %206, %205 : vector<9x64xf32>
    %208 = arith.divf %206, %207 : vector<9x64xf32>
    %209 = vector.extract_strided_slice %196 {offsets = [0, 128], sizes = [9, 64], strides = [1, 1]} : vector<9x256xf32> to vector<9x64xf32>
    %210 = math.tanh %209 : vector<9x64xf32>
    %211 = vector.extract_strided_slice %196 {offsets = [0, 192], sizes = [9, 64], strides = [1, 1]} : vector<9x256xf32> to vector<9x64xf32>
    %212 = arith.negf %211 : vector<9x64xf32>
    %213 = math.exp %212 : vector<9x64xf32>
    %cst_114 = arith.constant 1.000000e+00 : f32
    %214 = vector.broadcast %cst_114 : f32 to vector<9x64xf32>
    %215 = arith.addf %214, %213 : vector<9x64xf32>
    %216 = arith.divf %214, %215 : vector<9x64xf32>
    %217 = arith.mulf %208, %84 : vector<9x64xf32>
    %218 = arith.mulf %202, %210 : vector<9x64xf32>
    %219 = arith.addf %217, %218 : vector<9x64xf32>
    %220 = math.tanh %219 : vector<9x64xf32>
    %221 = arith.mulf %216, %220 : vector<9x64xf32>
    %222 = tpu.concatenate %221, %219 in 1 : vector<9x64xf32>, vector<9x64xf32> -> vector<9x128xf32>
    %c0_115 = arith.constant 0 : index
    %c0_116 = arith.constant 0 : index
    %223 = vector.load %arg20[%c0_115, %c0_116] : memref<9x128xf32, #tpu.memory_space<vmem>>, vector<9x128xf32>
    tpu.vector_store %arg20[%c0_115, %c0_116], %222 {strides = array<i32>} : memref<9x128xf32, #tpu.memory_space<vmem>>, vector<9x128xf32>,
    %c0_117 = arith.constant 0 : index
    %c0_118 = arith.constant 0 : index
    %224 = vector.load %arg6[%c0_117, %c0_118] : memref<1x256xf32, #tpu.memory_space<vmem>>, vector<1x256xf32>
    %225 = vector.extract_strided_slice %224 {offsets = [0, 0], sizes = [1, 128], strides = [1, 1]} : vector<1x256xf32> to vector<1x128xf32>
    %226 = vector.extract_strided_slice %224 {offsets = [0, 128], sizes = [1, 128], strides = [1, 1]} : vector<1x256xf32> to vector<1x128xf32>
    %227 = vector.extract_strided_slice %221 {offsets = [0, 0], sizes = [1, 64], strides = [1, 1]} : vector<9x64xf32> to vector<1x64xf32>
    %228 = vector.extract_strided_slice %221 {offsets = [1, 0], sizes = [1, 64], strides = [1, 1]} : vector<9x64xf32> to vector<1x64xf32>
    %229 = vector.extract_strided_slice %221 {offsets = [2, 0], sizes = [1, 64], strides = [1, 1]} : vector<9x64xf32> to vector<1x64xf32>
    %230 = vector.extract_strided_slice %221 {offsets = [3, 0], sizes = [1, 64], strides = [1, 1]} : vector<9x64xf32> to vector<1x64xf32>
    %231 = vector.extract_strided_slice %221 {offsets = [4, 0], sizes = [1, 64], strides = [1, 1]} : vector<9x64xf32> to vector<1x64xf32>
    %232 = vector.extract_strided_slice %221 {offsets = [5, 0], sizes = [1, 64], strides = [1, 1]} : vector<9x64xf32> to vector<1x64xf32>
    %233 = vector.extract_strided_slice %221 {offsets = [6, 0], sizes = [1, 64], strides = [1, 1]} : vector<9x64xf32> to vector<1x64xf32>
    %234 = vector.extract_strided_slice %221 {offsets = [7, 0], sizes = [1, 64], strides = [1, 1]} : vector<9x64xf32> to vector<1x64xf32>
    %235 = vector.extract_strided_slice %221 {offsets = [8, 0], sizes = [1, 64], strides = [1, 1]} : vector<9x64xf32> to vector<1x64xf32>
    %236 = tpu.concatenate %227, %228, %229, %230, %231, %232, %233, %234, %235 in 1 : vector<1x64xf32>, vector<1x64xf32>, vector<1x64xf32>, vector<1x64xf32>, vector<1x64xf32>, vector<1x64xf32>, vector<1x64xf32>, vector<1x64xf32>, vector<1x64xf32> -> vector<1x576xf32>
    %237 = tpu.concatenate %236, %225 in 1 : vector<1x576xf32>, vector<1x128xf32> -> vector<1x704xf32>
    %238 = arith.truncf %237 : vector<1x704xf32> to vector<1x704xbf16>
    %c0_119 = arith.constant 0 : index
    %c0_120 = arith.constant 0 : index
    %239 = vector.load %arg12[%c0_119, %c0_120] : memref<704x512xbf16, #tpu.memory_space<vmem>>, vector<704x512xbf16>
    %cst_121 = arith.constant dense<0.000000e+00> : vector<1x512xf32>
    %240 = tpu.matmul %238, %239, %cst_121 {dimension_numbers = #tpu.dot_dimension_numbers<[1], [0], [0], [1], [0, 0, 1, 1], [], []>} : vector<1x704xbf16>, vector<704x512xbf16>, vector<1x512xf32> -> vector<1x512xf32>
    %c0_122 = arith.constant 0 : index
    %c0_123 = arith.constant 0 : index
    %241 = vector.load %arg13[%c0_122, %c0_123] : memref<1x512xf32, #tpu.memory_space<vmem>>, vector<1x512xf32>
    %242 = arith.addf %240, %241 : vector<1x512xf32>
    %243 = vector.extract_strided_slice %242 {offsets = [0, 0], sizes = [1, 128], strides = [1, 1]} : vector<1x512xf32> to vector<1x128xf32>
    %244 = arith.negf %243 : vector<1x128xf32>
    %245 = math.exp %244 : vector<1x128xf32>
    %cst_124 = arith.constant 1.000000e+00 : f32
    %246 = vector.broadcast %cst_124 : f32 to vector<1x128xf32>
    %247 = arith.addf %246, %245 : vector<1x128xf32>
    %248 = arith.divf %246, %247 : vector<1x128xf32>
    %249 = vector.extract_strided_slice %242 {offsets = [0, 128], sizes = [1, 128], strides = [1, 1]} : vector<1x512xf32> to vector<1x128xf32>
    %250 = arith.negf %249 : vector<1x128xf32>
    %251 = math.exp %250 : vector<1x128xf32>
    %cst_125 = arith.constant 1.000000e+00 : f32
    %252 = vector.broadcast %cst_125 : f32 to vector<1x128xf32>
    %253 = arith.addf %252, %251 : vector<1x128xf32>
    %254 = arith.divf %252, %253 : vector<1x128xf32>
    %255 = vector.extract_strided_slice %242 {offsets = [0, 256], sizes = [1, 128], strides = [1, 1]} : vector<1x512xf32> to vector<1x128xf32>
    %256 = math.tanh %255 : vector<1x128xf32>
    %257 = vector.extract_strided_slice %242 {offsets = [0, 384], sizes = [1, 128], strides = [1, 1]} : vector<1x512xf32> to vector<1x128xf32>
    %258 = arith.negf %257 : vector<1x128xf32>
    %259 = math.exp %258 : vector<1x128xf32>
    %cst_126 = arith.constant 1.000000e+00 : f32
    %260 = vector.broadcast %cst_126 : f32 to vector<1x128xf32>
    %261 = arith.addf %260, %259 : vector<1x128xf32>
    %262 = arith.divf %260, %261 : vector<1x128xf32>
    %263 = arith.mulf %254, %226 : vector<1x128xf32>
    %264 = arith.mulf %248, %256 : vector<1x128xf32>
    %265 = arith.addf %263, %264 : vector<1x128xf32>
    %266 = math.tanh %265 : vector<1x128xf32>
    %267 = arith.mulf %262, %266 : vector<1x128xf32>
    %268 = tpu.concatenate %267, %265 in 1 : vector<1x128xf32>, vector<1x128xf32> -> vector<1x256xf32>
    %c0_127 = arith.constant 0 : index
    %c0_128 = arith.constant 0 : index
    %269 = vector.load %arg21[%c0_127, %c0_128] : memref<1x256xf32, #tpu.memory_space<vmem>>, vector<1x256xf32>
    tpu.vector_store %arg21[%c0_127, %c0_128], %268 {strides = array<i32>} : memref<1x256xf32, #tpu.memory_space<vmem>>, vector<1x256xf32>,
    %c0_129 = arith.constant 0 : index
    %c0_130 = arith.constant 0 : index
    %270 = vector.load %arg7[%c0_129, %c0_130] : memref<1x256xf32, #tpu.memory_space<vmem>>, vector<1x256xf32>
    %271 = vector.extract_strided_slice %270 {offsets = [0, 0], sizes = [1, 128], strides = [1, 1]} : vector<1x256xf32> to vector<1x128xf32>
    %272 = vector.extract_strided_slice %270 {offsets = [0, 128], sizes = [1, 128], strides = [1, 1]} : vector<1x256xf32> to vector<1x128xf32>
    %273 = tpu.concatenate %267, %271 in 1 : vector<1x128xf32>, vector<1x128xf32> -> vector<1x256xf32>
    %274 = arith.truncf %273 : vector<1x256xf32> to vector<1x256xbf16>
    %c0_131 = arith.constant 0 : index
    %c0_132 = arith.constant 0 : index
    %275 = vector.load %arg14[%c0_131, %c0_132] : memref<256x512xbf16, #tpu.memory_space<vmem>>, vector<256x512xbf16>
    %cst_133 = arith.constant dense<0.000000e+00> : vector<1x512xf32>
    %276 = tpu.matmul %274, %275, %cst_133 {dimension_numbers = #tpu.dot_dimension_numbers<[1], [0], [0], [1], [0, 0, 1, 1], [], []>} : vector<1x256xbf16>, vector<256x512xbf16>, vector<1x512xf32> -> vector<1x512xf32>
    %c0_134 = arith.constant 0 : index
    %c0_135 = arith.constant 0 : index
    %277 = vector.load %arg15[%c0_134, %c0_135] : memref<1x512xf32, #tpu.memory_space<vmem>>, vector<1x512xf32>
    %278 = arith.addf %276, %277 : vector<1x512xf32>
    %279 = vector.extract_strided_slice %278 {offsets = [0, 0], sizes = [1, 128], strides = [1, 1]} : vector<1x512xf32> to vector<1x128xf32>
    %280 = arith.negf %279 : vector<1x128xf32>
    %281 = math.exp %280 : vector<1x128xf32>
    %cst_136 = arith.constant 1.000000e+00 : f32
    %282 = vector.broadcast %cst_136 : f32 to vector<1x128xf32>
    %283 = arith.addf %282, %281 : vector<1x128xf32>
    %284 = arith.divf %282, %283 : vector<1x128xf32>
    %285 = vector.extract_strided_slice %278 {offsets = [0, 128], sizes = [1, 128], strides = [1, 1]} : vector<1x512xf32> to vector<1x128xf32>
    %286 = arith.negf %285 : vector<1x128xf32>
    %287 = math.exp %286 : vector<1x128xf32>
    %cst_137 = arith.constant 1.000000e+00 : f32
    %288 = vector.broadcast %cst_137 : f32 to vector<1x128xf32>
    %289 = arith.addf %288, %287 : vector<1x128xf32>
    %290 = arith.divf %288, %289 : vector<1x128xf32>
    %291 = vector.extract_strided_slice %278 {offsets = [0, 256], sizes = [1, 128], strides = [1, 1]} : vector<1x512xf32> to vector<1x128xf32>
    %292 = math.tanh %291 : vector<1x128xf32>
    %293 = vector.extract_strided_slice %278 {offsets = [0, 384], sizes = [1, 128], strides = [1, 1]} : vector<1x512xf32> to vector<1x128xf32>
    %294 = arith.negf %293 : vector<1x128xf32>
    %295 = math.exp %294 : vector<1x128xf32>
    %cst_138 = arith.constant 1.000000e+00 : f32
    %296 = vector.broadcast %cst_138 : f32 to vector<1x128xf32>
    %297 = arith.addf %296, %295 : vector<1x128xf32>
    %298 = arith.divf %296, %297 : vector<1x128xf32>
    %299 = arith.mulf %290, %272 : vector<1x128xf32>
    %300 = arith.mulf %284, %292 : vector<1x128xf32>
    %301 = arith.addf %299, %300 : vector<1x128xf32>
    %302 = math.tanh %301 : vector<1x128xf32>
    %303 = arith.mulf %298, %302 : vector<1x128xf32>
    %304 = tpu.concatenate %303, %301 in 1 : vector<1x128xf32>, vector<1x128xf32> -> vector<1x256xf32>
    %c0_139 = arith.constant 0 : index
    %c0_140 = arith.constant 0 : index
    %305 = vector.load %arg22[%c0_139, %c0_140] : memref<1x256xf32, #tpu.memory_space<vmem>>, vector<1x256xf32>
    tpu.vector_store %arg22[%c0_139, %c0_140], %304 {strides = array<i32>} : memref<1x256xf32, #tpu.memory_space<vmem>>, vector<1x256xf32>,
    %306 = arith.truncf %303 : vector<1x128xf32> to vector<1x128xbf16>
    %c0_141 = arith.constant 0 : index
    %c0_142 = arith.constant 0 : index
    %307 = vector.load %arg16[%c0_141, %c0_142] : memref<128x128xbf16, #tpu.memory_space<vmem>>, vector<128x128xbf16>
    %cst_143 = arith.constant dense<0.000000e+00> : vector<1x128xf32>
    %308 = tpu.matmul %306, %307, %cst_143 {dimension_numbers = #tpu.dot_dimension_numbers<[1], [0], [0], [1], [0, 0, 1, 1], [], []>} : vector<1x128xbf16>, vector<128x128xbf16>, vector<1x128xf32> -> vector<1x128xf32>
    %c0_144 = arith.constant 0 : index
    %c0_145 = arith.constant 0 : index
    %309 = vector.load %arg17[%c0_144, %c0_145] : memref<1x128xf32, #tpu.memory_space<vmem>>, vector<1x128xf32>
    %310 = arith.addf %308, %309 : vector<1x128xf32>
    %311 = math.absf %310 : vector<1x128xf32>
    %cst_146 = arith.constant 1.000000e+00 : f32
    %312 = vector.broadcast %cst_146 : f32 to vector<1x128xf32>
    %313 = arith.addf %312, %311 : vector<1x128xf32>
    %314 = arith.divf %310, %313 : vector<1x128xf32>
    %c0_147 = arith.constant 0 : index
    %c0_148 = arith.constant 0 : index
    %315 = vector.load %arg3[%c0_147, %c0_148] : memref<1x128xf32, #tpu.memory_space<vmem>>, vector<1x128xf32>
    %316 = arith.subf %314, %310 : vector<1x128xf32>
    %317 = arith.mulf %315, %316 : vector<1x128xf32>
    %318 = arith.addf %310, %317 : vector<1x128xf32>
    %c0_149 = arith.constant 0 : index
    %c0_150 = arith.constant 0 : index
    %319 = vector.load %arg18[%c0_149, %c0_150] : memref<1x128xf32, #tpu.memory_space<vmem>>, vector<1x128xf32>
    tpu.vector_store %arg18[%c0_149, %c0_150], %318 {strides = array<i32>} : memref<1x128xf32, #tpu.memory_space<vmem>>, vector<1x128xf32>,
    return
  }
}

</mosaic_0001>

<bundles_post_ra>
// kernel: forward.1
= control target key start
LH: loop header
LB: loop body
LE: loop exit
PB: predicated region body
PF: predicated region fallthrough
CT: control target
= control target key end

     0   :  { %s11220_s0 = inlined_call_operand.vmem [shape: bf16[49,128], index: 0, kind: input, shape index: {}]   ;;  %s11221_s1 = inlined_call_operand.vmem [shape: f32[49,9], index: 1, kind: input, shape index: {}]   ;;  %s11222_s2 = inlined_call_operand.vmem [shape: f32[9,9], index: 2, kind: input, shape index: {}]   ;;  %s11223_s3 = inlined_call_operand.hbm [shape: f32[1,128], index: 3, kind: input, shape index: {}]   ;;  %s11224_s4 = inlined_call_operand.vmem [shape: f32[49,64], index: 4, kind: input, shape index: {}, may-alias: {4,19}]   ;;  %s11225_s5 = inlined_call_operand.vmem [shape: f32[9,128], index: 5, kind: input, shape index: {}, may-alias: {5,20}]   ;;  %s11226_s6 = inlined_call_operand.vmem [shape: f32[1,256], index: 6, kind: input, shape index: {}, may-alias: {6,21}]   ;;  %s11227_s7 = inlined_call_operand.vmem [shape: f32[1,256], index: 7, kind: input, shape index: {}, may-alias: {7,22}]   ;;  %s11228_s8 = inlined_call_operand.hbm [shape: bf16[416,128], index: 8, kind: input, shape index: {}]   ;;  %s11229_s9 = inlined_call_operand.hbm [shape: f32[1,128], index: 9, kind: input, shape index: {}]   ;;  %s11230_s10 = inlined_call_operand.vmem [shape: bf16[960,256], index: 10, kind: input, shape index: {}]   ;;  %s11231_s11 = inlined_call_operand.hbm [shape: f32[1,256], index: 11, kind: input, shape index: {}]   ;;  %s11232_s12 = inlined_call_operand.vmem [shape: bf16[704,512], index: 12, kind: input, shape index: {}]   ;;  %s11233_s13 = inlined_call_operand.vmem [shape: f32[1,512], index: 13, kind: input, shape index: {}]   ;;  %s11234_s14 = inlined_call_operand.vmem [shape: bf16[256,512], index: 14, kind: input, shape index: {}]   ;;  %s11235_s15 = inlined_call_operand.vmem [shape: f32[1,512], index: 15, kind: input, shape index: {}]   ;;  %s11236_s16 = inlined_call_operand.hbm [shape: bf16[128,128], index: 16, kind: input, shape index: {}]   ;;  %s11237_s17 = inlined_call_operand.hbm [shape: f32[1,128], index: 17, kind: input, shape index: {}]   ;;  %s11238_s18 = inlined_call_operand.vmem [shape: f32[1,128], index: 18, kind: output, shape index: {0}]   ;;  %s11239_s19 = inlined_call_operand.vmem [shape: f32[49,64], index: 19, kind: output, shape index: {1}, may-alias: {4,19}]   ;;  %s11240_s20 = inlined_call_operand.vmem [shape: f32[9,128], index: 20, kind: output, shape index: {2}, may-alias: {5,20}]   ;;  %s11241_s21 = inlined_call_operand.vmem [shape: f32[1,256], index: 21, kind: output, shape index: {3}, may-alias: {6,21}]   ;;  %s11242_s22 = inlined_call_operand.vmem [shape: f32[1,256], index: 22, kind: output, shape index: {4}, may-alias: {7,22}]  }
   0x1   :  { %11251 = sst [smem:[#allocation20_spill]] %s11220_s0 }
   0x2   :  { %11252 = sst [smem:[#allocation21_spill]] %s11221_s1 }
   0x3   :  { %11253 = sst [smem:[#allocation22_spill]] %s11222_s2 }
   0x4   :  { %11254 = sst [smem:[#allocation23_spill]] %s11223_s3 }
   0x5   :  { %11255 = sst [smem:[#allocation24_spill]] %s11224_s4 }
   0x6   :  { %11256 = sst [smem:[#allocation25_spill]] %s11225_s5 }
   0x7   :  { %11257 = sst [smem:[#allocation26_spill]] %s11226_s6 }
   0x8   :  { %28 = vsyncpa [#allocation7], 0 }
   0x9   :  { %29 = vsyncpa [#allocation9], 0 }
   0xa   :  { %30 = vsyncpa [#allocation12], 0  ;;  %s61_s29 = sshll.u32 %s11228_s8, 4  ;;  %s62_s29 = int_to_ptr.hbm [resolvable:$true] %s61_s29 }
   0xb   :  { %31 = vsyncpa [#allocation15], 0  ;;  %s7853_s30 = smov [#allocation8]   ;;  %s88_s1 = sshll.u32 %s11231_s11, 4  ;;  %s89_s1 = int_to_ptr.hbm [resolvable:$true] %s88_s1 }
   0xc   :  { %s63_s4 = sshll.u32 %s7853_s30, 4  ;;  %s11249_s5 = smov 64   ;;  %s64_s4 = int_to_ptr.vmem [resolvable:$true] %s63_s4 }
   0xd   :  { %s7855_s24 = smov 4   ;;  %s7856_s6 = smov [#allocation11]  }
   0xe   :  { %69 = dma.hbm_to_vmem [thread:$0]  %s62_s29, 3328, %s64_s4, [#allocation9], %s11249_s5, %s11249_s5, %s7855_s24  }
   0xf   :  { %s90_s25 = sshll.u32 %s7856_s6, 4  ;;  %s11258_s2 = sld [smem:[#allocation23_spill]]  ;;  %s91_s25 = int_to_ptr.vmem [resolvable:$true] %s90_s25 }
  0x10   :  { %93 = dma.hbm_to_vmem [thread:$0]  %s89_s1, 32, %s91_s25, [#allocation12]  }
  0x11   :  { %s75_s11 = sshll.u32 %s11229_s9, 4  ;;  %s7857_s30 = smov [#allocation6]   ;;  %s76_s11 = int_to_ptr.hbm [resolvable:$true] %s75_s11 }
  0x12   :  { %s45_s0 = sshll.u32 %s7857_s30, 4  ;;  %s7858_s29 = smov [#allocation10]   ;;  %s46_s0 = int_to_ptr.vmem [resolvable:$true] %s45_s0 }
  0x13   :  { %s77_s4 = sshll.u32 %s7858_s29, 4  ;;  %s106_s5 = sshll.u32 %s11236_s16, 4  ;;  %s78_s4 = int_to_ptr.vmem [resolvable:$true] %s77_s4  ;;  %s107_s5 = int_to_ptr.hbm [resolvable:$true] %s106_s5 }
  0x14   :  { %80 = dma.hbm_to_vmem [thread:$0]  %s76_s11, 16, %s78_s4, [#allocation9]  }
  0x15   :  { %s43_s27 = sshll.u32 %s11258_s2, 4  ;;  %s120_s25 = sshll.u32 %s11237_s17, 4  ;;  %s44_s27 = int_to_ptr.hbm [resolvable:$true] %s43_s27  ;;  %s121_s25 = int_to_ptr.hbm [resolvable:$true] %s120_s25 }
  0x16   :  { %48 = dma.hbm_to_vmem [thread:$0]  %s44_s27, 16, %s46_s0, [#allocation7]  }
  0x17   :  { %s7859_s8 = smov [#allocation13]   ;;  %s11259_s2 = smov 64  }
  0x18   :  { %s108_s9 = sshll.u32 %s7859_s8, 4  ;;  %s7860_s27 = smov [#allocation14]   ;;  %s109_s9 = int_to_ptr.vmem [resolvable:$true] %s108_s9 }
  0x19   :  { %114 = dma.hbm_to_vmem [thread:$0]  %s107_s5, 1024, %s109_s9, [#allocation12], %s11259_s2, %s11259_s2, %s7855_s24  }
  0x1a   :  { %s122_s3 = sshll.u32 %s7860_s27, 4  ;;  %s123_s3 = int_to_ptr.vmem [resolvable:$true] %s122_s3 }
  0x1b   :  { %125 = dma.hbm_to_vmem [thread:$0]  %s121_s25, 16, %s123_s3, [#allocation15]  }
  0x1c   :  { %7845 = dma.done.wait [#allocation7], 16  }
  0x1d   :  { %7846 = vsyncadd [#allocation7], 4294967280 }
  0x1e   :  { %7847 = dma.done.wait [#allocation9], 3344  }
  0x1f   :  { %7848 = vsyncadd [#allocation9], 4294963952 }
  0x20   :  { %7849 = dma.done.wait [#allocation12], 1056  }
  0x21   :  { %7850 = vsyncadd [#allocation12], 4294966240 }
  0x22   :  { %7851 = dma.done.wait [#allocation15], 16  }
  0x23   :  { %7852 = vsyncadd [#allocation15], 4294967280  ;;  %v7861_v0 = vmov 5   ;;  %v7862_v1 = vmov 2   ;;  %v7863_v2 = vmov 1   ;;  %s11260_s5 = sld [smem:[#allocation21_spill]] }
  0x24   :  { %7338 = vset.pattern.permute.xlu1 %v7861_v0  ;;  %7339 = vset.pattern.permute.xlu2 %v7862_v1  ;;  %v7864_v5 = vmov 3   ;;  %v7865_v6 = vmov 6   ;;  %v7866_v7 = vmov 7   ;;  %vm184_vm0 = vcmask 261120   ;;  %s11261_s1 = sld [smem:[#allocation24_spill]]  ;;  %s7871_s29 = smov 32  }
  0x25   :  { %7337 = vset.pattern.permute.xlu0 %v7863_v2  ;;  %v7867_v13 = vmov 0.0   ;;  %v7868_v28 = vmov 8   ;;  %v7869_v32 = vmov 4   ;;  %v7870_v33 = vmov 0   ;;  %s7872_s6 = smov 96   ;;  %s11262_s8 = sld [smem:[#allocation20_spill]] }
  0x26   :  { %185 = vst.msk [vmem:[#allocation2] sm:$0xff] %vm184_vm0, %v7867_v13  ;;  %vm193_vm1 = vcmask 253952   ;;  %vm755_vm2 = vcmask 523264   ;;  %vm763_vm3 = vcmask 785408   ;;  %vm807_vm4 = vcmask 257024   ;;  %s11268_s3 = sld [smem:[#allocation25_spill]] }
  0x27   :  { %186 = vst.msk [vmem:[#allocation2 + $0x39] sm:$0xff] %vm184_vm0, %v7867_v13  ;;  %vm171_vm5 = vcmask 1040384   ;;  %vm172_vm6 = vsmask.f32 256  ;;  %vm819_vm9 = vcmask 1044484   ;;  %s11271_s17 = sld [smem:[#allocation26_spill]] }
  0x28   :  { %vm8373_vm7 = vmand %vm171_vm5, %vm172_vm6  ;;  %vm820_vm10 = vsmask.f32 4352 }
  0x29   :  { %v8018_v3 = vld [vmem:[%s11260_s5] sm:$0xff]  ;;  %v8026_v4 = vld [vmem:[%s11260_s5 + $0x8] sm:$0xff]  ;;  %v8041_v8 = vld [vmem:[%s11260_s5 + $0x10] sm:$0xff] }
  0x2a   :  { %294 = vperm.xlu2 %7339, %v8018_v3   ;;  %420 = vperm.xlu1 %7338, %v8018_v3   ;;  %v8051_v9 = vld [vmem:[%s11260_s5 + $0x18] sm:$0xff]  ;;  %v8063_v10 = vld [vmem:[%s11260_s5 + $0x20] sm:$0xff]  ;;  %v8084_v12 = vld [vmem:[%s11260_s5 + $0x28] sm:$0xff] }
  0x2b   :  { %252 = vperm.xlu0 %7337, %v8018_v3   ;;  %v8079_v11 = vld [vmem:[%s11261_s1] sm:$0xff]  ;;  %v8100_v14 = vld [vmem:[%s11261_s1 + $0x8] sm:$0xff]  ;;  %v8115_v15 = vld [vmem:[%s11261_s1 + $0x10] sm:$0xff] }
  0x2c   :  { %187 = vst.msk [vmem:[#allocation2 + $0x8] sm:$0xff] %vm184_vm0, %v8079_v11  ;;  %v8126_v16 = vld [vmem:[%s11261_s1 + $0x18] sm:$0xff]  ;;  %v8137_v18 = vld [vmem:[%s11261_s1 + $0x20] sm:$0xff]  ;;  %v8153_v30 = vld [vmem:[%s11261_s1 + $0x28] sm:$0xff] }
  0x2d   :  { %188 = vst.msk [vmem:[#allocation2 + $0x10] sm:$0xff] %vm184_vm0, %v8100_v14  ;;  %v8169_v43 = vld [vmem:[%s11261_s1 + $0x30] sm:$0x1]  ;;  %vm827_vm8 = vmand %vm193_vm1, %vm172_vm6 }
  0x2e   :  { %189 = vst.msk [vmem:[#allocation2 + $0x18] sm:$0xff] %vm184_vm0, %v8115_v15  ;;  %vm821_vm11 = vmand %vm819_vm9, %vm820_vm10 }
  0x2f   :  { %190 = vst.msk [vmem:[#allocation2 + $0x20] sm:$0xff] %vm184_vm0, %v8126_v16  ;;  %vm8409_vm12 = vmor %vm821_vm11, %vm8373_vm7 }
  0x30   :  { %191 = vst.msk [vmem:[#allocation2 + $0x28] sm:$0xff] %vm184_vm0, %v8137_v18 }
  0x31   :  { %192 = vst.msk [vmem:[#allocation2 + $0x30] sm:$0xff] %vm184_vm0, %v8153_v30 }
  0x32   :  { %298 = vperm.xlu2 %7339, %v8026_v4   ;;  %424 = vperm.xlu1 %7338, %v8026_v4   ;;  %194 = vst.msk [vmem:[#allocation2 + $0x38] sm:$0x1] %vm193_vm1, %v8169_v43 }
  0x33   :  { %256 = vperm.xlu0 %7337, %v8026_v4   ;;  %v244_v34 = vld [vmem:[#allocation2 + $0x1] sm:$0xff] }
  0x34   :  { %v412_v22 = vld [vmem:[#allocation2 + $0x9] sm:$0xff] }
  0x35   :  { %v413_v23 = vld [vmem:[#allocation2 + $0x11] sm:$0xff]  ;;  %v286_v41 = vld [vmem:[#allocation2 + $0x2] sm:$0xff] }
  0x36   :  { %v287_v42 = vld [vmem:[#allocation2 + $0xa] sm:$0xff]  ;;  %v497_v54 = vld [vmem:[#allocation2 + $0x17] sm:$0xff] }
  0x37   :  { %v328_v46 = vld [vmem:[#allocation2 + $0x7] sm:$0xff]  ;;  %v496_v47 = vld [vmem:[#allocation2 + $0xf] sm:$0xff]  ;;  %v247_v62 = vld [vmem:[#allocation2 + $0x19] sm:$0xff] }
  0x3a   :  { %7341 = vset.pattern.permute.xlu2 %v7864_v5  ;;  %7340 = vset.pattern.permute.xlu1 %v7865_v6 }
  0x3b   :  { %7344 = vset.pattern.permute.xlu0 %v7866_v7  ;;  %336 = vperm.xlu2 %7341, %v8018_v3  }
  0x3c   :  { %466 = vperm.xlu1 %7340, %v8026_v4   ;;  %508 = vperm.xlu0 %7344, %v8026_v4  }
  0x43   :  { %7343 = vset.pattern.permute.xlu2 %v7866_v7 }
  0x44   :  { %7342 = vset.pattern.permute.xlu1 %v7864_v5  ;;  %7349 = vset.pattern.permute.xlu0 %v7862_v1 }
  0x45   :  { %504 = vperm.xlu2 %7343, %v8018_v3   ;;  %340 = vperm.xlu1 %7342, %v8026_v4  }
  0x46   :  { %302 = vperm.xlu0 %7349, %v8041_v8  }
  0x4d   :  { %7346 = vset.pattern.permute.xlu2 %v7863_v2  ;;  %7345 = vset.pattern.permute.xlu1 %v7863_v2 }
  0x4e   :  { %7354 = vset.pattern.permute.xlu0 %v7864_v5  ;;  %264 = vperm.xlu2 %7346, %v8051_v9  }
  0x4f   :  { %260 = vperm.xlu1 %7345, %v8041_v8   ;;  %348 = vperm.xlu0 %7354, %v8051_v9  }
  0x56   :  { %7348 = vset.pattern.permute.xlu2 %v7861_v0 }
  0x57   :  { %7347 = vset.pattern.permute.xlu1 %v7861_v0  ;;  %7359 = vset.pattern.permute.xlu0 %v7861_v0 }
  0x58   :  { %432 = vperm.xlu2 %7348, %v8051_v9   ;;  %428 = vperm.xlu1 %7347, %v8041_v8  }
  0x59   :  { %436 = vperm.xlu0 %7359, %v8063_v10  }
  0x60   :  { %7351 = vset.pattern.permute.xlu2 %v7865_v6  ;;  %7350 = vset.pattern.permute.xlu1 %v7862_v1 }
  0x61   :  { %7360 = vset.pattern.permute.xlu0 %v7865_v6  ;;  %470 = vperm.xlu2 %7351, %v8041_v8  }
  0x62   :  { %306 = vperm.xlu1 %7350, %v8051_v9   ;;  %462 = vperm.xlu0 %7360, %v8018_v3  }
  0x69   :  { %7353 = vset.pattern.permute.xlu2 %v7864_v5 }
  0x6a   :  { %7352 = vset.pattern.permute.xlu1 %v7865_v6  ;;  %482 = vperm.xlu0 %7360, %v8084_v12  }
  0x6b   :  { %344 = vperm.xlu2 %7353, %v8041_v8   ;;  %474 = vperm.xlu1 %7352, %v8051_v9  }
  0x72   :  { %7403 = vset.pattern.permute.xlu0 %v7868_v28 }
  0x73   :  { %7356 = vset.pattern.permute.xlu2 %v7866_v7  ;;  %7355 = vset.pattern.permute.xlu1 %v7866_v7 }
  0x74   :  { %516 = vperm.xlu2 %7356, %v8051_v9   ;;  %512 = vperm.xlu1 %7355, %v8041_v8  }
  0x7c   :  { %7358 = vset.pattern.permute.xlu2 %v7863_v2  ;;  %7357 = vset.pattern.permute.xlu1 %v7863_v2 }
  0x7d   :  { %272 = vperm.xlu2 %7358, %v8084_v12   ;;  %268 = vperm.xlu1 %7357, %v8063_v10  }
  0x84   :  { %v295_v17 = vpop.permute.xlu2 %294 }
  0x85   :  { %7362 = vset.pattern.permute.xlu2 %v7862_v1  ;;  %7361 = vset.pattern.permute.xlu1 %v7861_v0  ;;  %v321_v44 = vmul.f32 %v295_v17, %v286_v41  ;;  %v457_v41 = vld [vmem:[#allocation2 + $0x26] sm:$0xff] }
  0x86   :  { %310 = vperm.xlu2 %7362, %v8063_v10   ;;  %440 = vperm.xlu1 %7361, %v8084_v12  }
  0x8c   :  { %v299_v19 = vpop.permute.xlu2 %298 }
  0x8d   :  { %v322_v45 = vmul.f32 %v299_v19, %v287_v42 }
  0x8e   :  { %7364 = vset.pattern.permute.xlu2 %v7865_v6  ;;  %7363 = vset.pattern.permute.xlu1 %v7862_v1 }
  0x8f   :  { %478 = vperm.xlu2 %7364, %v8063_v10   ;;  %314 = vperm.xlu1 %7363, %v8084_v12   ;;  %v7382_v53 = vpack.i.bf16 %v322_v45, %v321_v44 }
  0x95   :  { %v337_v24 = vpop.permute.xlu2 %336 }
  0x96   :  { %v363_v49 = vmul.f32 %v337_v24, %v328_v46  ;;  %v455_v24 = vld [vmem:[#allocation2 + $0x16] sm:$0xff] }
  0x97   :  { %7366 = vset.pattern.permute.xlu2 %v7864_v5  ;;  %7365 = vset.pattern.permute.xlu1 %v7864_v5 }
  0x98   :  { %356 = vperm.xlu2 %7366, %v8084_v12   ;;  %352 = vperm.xlu1 %7365, %v8063_v10  }
  0x9c   :  { %v421_v20 = vpop.permute.xlu1 %420 }
  0x9d   :  { %v253_v21 = vpop.permute.xlu0 %252  ;;  %v447_v26 = vmul.f32 %v421_v20, %v412_v22 }
  0x9e   :  { %v279_v37 = vmul.f32 %v253_v21, %v244_v34 }
  0x9f   :  { %v505_v36 = vpop.permute.xlu2 %504 }
  0xa0   :  { %7368 = vset.pattern.permute.xlu2 %v7866_v7  ;;  %7367 = vset.pattern.permute.xlu1 %v7866_v7  ;;  %v531_v56 = vmul.f32 %v505_v36, %v496_v47 }
  0xa1   :  { %524 = vperm.xlu2 %7368, %v8084_v12   ;;  %520 = vperm.xlu1 %7367, %v8063_v10  }
  0xa4   :  { %v425_v25 = vpop.permute.xlu1 %424 }
  0xa5   :  { %v448_v27 = vmul.f32 %v425_v25, %v413_v23  ;;  %v257_v29 = vpop.permute.xlu0 %256  ;;  %v454_v25 = vld [vmem:[#allocation2 + $0xe] sm:$0xff] }
  0xa6   :  { %v280_v35 = vmul.f32 %v412_v22, %v257_v29 }
  0xa7   :  { %v7377_v31 = vpack.i.bf16 %v448_v27, %v447_v26  ;;  %v415_v26 = vld [vmem:[#allocation2 + $0x21] sm:$0xff] }
  0xa8   :  { %v7372_v40 = vpack.i.bf16 %v280_v35, %v279_v37  ;;  %v265_v50 = vpop.permute.xlu2 %264 }
  0xa9   :  { %7370 = vset.pattern.permute.xlu2 %v7869_v32  ;;  %7369 = vset.pattern.permute.xlu1 %v7870_v33  ;;  %v282_v63 = vmul.f32 %v265_v50, %v247_v62 }
  0xaa   :  { %378 = vperm.xlu2 %7370, %v8018_v3   ;;  %209 = vperm.xlu1 %7369, %v8026_v4  }
  0xab   :  { %7378 = vrot.lane.b32.xlu0 %v7377_v31, %s7871_s29 }
  0xae   :  { %v467_v38 = vpop.permute.xlu1 %466  ;;  %v509_v39 = vpop.permute.xlu0 %508 }
  0xaf   :  { %v532_v57 = vmul.f32 %v509_v39, %v497_v54  ;;  %v456_v39 = vld [vmem:[#allocation2 + $0x1e] sm:$0xff] }
  0xb1   :  { %v7397_v58 = vpack.i.bf16 %v532_v57, %v531_v56  ;;  %v288_v56 = vld [vmem:[#allocation2 + $0x12] sm:$0xff] }
  0xb2   :  { %7371 = vset.pattern.permute.xlu1 %v7869_v32  ;;  %7373 = vrot.lane.b32.xlu2 %v7372_v40, %s7871_s29  ;;  %v433_v61 = vpop.permute.xlu2 %432  ;;  %v331_v40 = vld [vmem:[#allocation2 + $0x1f] sm:$0xff] }
  0xb3   :  { %382 = vperm.xlu1 %7371, %v8026_v4   ;;  %7402 = vset.pattern.permute.xlu2 %v7868_v28  ;;  %v450_v31 = vmul.f32 %v433_v61, %v415_v26 }
  0xb7   :  { %v341_v48 = vpop.permute.xlu1 %340 }
  0xb8   :  { %v364_v51 = vmul.f32 %v496_v47, %v341_v48  ;;  %v8173_v52 = vpop.permute.xlu0 %302 }
  0xba   :  { %v7392_v55 = vpack.i.bf16 %v364_v51, %v363_v49 }
  0xbb   :  { %7383 = vrot.lane.b32.xlu1 %v7382_v53, %s11259_s2  ;;  %v471_v22 = vpop.permute.xlu2 %470 }
  0xbc   :  { %7393 = vrot.lane.b32.xlu0 %v7392_v55, %s7872_s6  ;;  %7404 = vset.pattern.permute.xlu1 %v7870_v33  ;;  %v491_v44 = vmul.f32 %v471_v22, %v456_v39  ;;  %v501_v39 = vld [vmem:[#allocation2 + $0x37] sm:$0xff] }
  0xc1   :  { %v261_v59 = vpop.permute.xlu1 %260  ;;  %v349_v60 = vpop.permute.xlu0 %348 }
  0xc2   :  { %v281_v17 = vmul.f32 %v413_v23, %v261_v59  ;;  %v366_v45 = vmul.f32 %v349_v60, %v331_v40 }
  0xc3   :  { %7398 = vrot.lane.b32.xlu1 %v7397_v58, %s7872_s6  ;;  %v323_v58 = vmul.f32 %v8173_v52, %v288_v56  ;;  %v459_v52 = vld [vmem:[#allocation2 + $0x36] sm:$0xff] }
  0xc4   :  { %550 = vperm.xlu0 %7403, %v8026_v4   ;;  %v7408_v19 = vpack.i.bf16 %v282_v63, %v281_v17  ;;  %v490_v4 = vmul.f32 %v467_v38, %v455_v24  ;;  %v499_v63 = vld [vmem:[#allocation2 + $0x27] sm:$0xff] }
  0xc5   :  { %v345_v34 = vpop.permute.xlu2 %344  ;;  %v290_v24 = vld [vmem:[#allocation2 + $0x22] sm:$0xff] }
  0xc6   :  { %v365_v46 = vmul.f32 %v497_v54, %v345_v34  ;;  %v289_v54 = vld [vmem:[#allocation2 + $0x1a] sm:$0xff] }
  0xc8   :  { %v7428_v49 = vpack.i.bf16 %v366_v45, %v365_v46  ;;  %v8218_v46 = vld [vmem:[%s11260_s5 + $0x30] sm:$0x1]  ;;  %s11267_s5 = sld [smem:[#allocation22_spill]] }
  0xca   :  { %v429_v20 = vpop.permute.xlu1 %428 }
  0xcb   :  { %214 = vperm.xlu1 %7404, %v8041_v8   ;;  %v8181_v21 = vpop.permute.xlu0 %436  ;;  %v449_v35 = vmul.f32 %v429_v20, %v247_v62 }
  0xcc   :  { %7409 = vrot.lane.b32.xlu0 %v7408_v19, %s7871_s29 }
  0xcd   :  { %v7413_v37 = vpack.i.bf16 %v450_v31, %v449_v35 }
  0xce   :  { %v517_v38 = vpop.permute.xlu2 %516 }
  0xcf   :  { %v534_v19 = vmul.f32 %v517_v38, %v499_v63 }
  0xd3   :  { %7406 = vset.pattern.permute.xlu1 %v7869_v32 }
  0xd4   :  { %v307_v27 = vpop.permute.xlu1 %306  ;;  %v463_v29 = vpop.permute.xlu0 %462  ;;  %386 = vperm.xlu1 %7406, %v8041_v8  }
  0xd5   :  { %v489_v23 = vmul.f32 %v463_v29, %v454_v25  ;;  %v324_v57 = vmul.f32 %v307_v27, %v289_v54 }
  0xd7   :  { %v7387_v36 = vpack.i.bf16 %v490_v4, %v489_v23  ;;  %v273_v51 = vpop.permute.xlu2 %272  ;;  %v7418_v62 = vpack.i.bf16 %v324_v57, %v323_v58  ;;  %v6939_v57 = vld [vmem:[#allocation8 + $0xc0] sm:$0xff] }
  0xd9   :  { %7388 = vrot.lane.b32.xlu2 %v7387_v36, %s11259_s2 }
  0xdc   :  { %7414 = vrot.lane.b32.xlu1 %v7413_v37, %s7871_s29  ;;  %v483_v22 = vpop.permute.xlu0 %482 }
  0xdd   :  { %v475_v42 = vpop.permute.xlu1 %474  ;;  %7439 = vset.pattern.permute.xlu1 %v7868_v28  ;;  %v494_v27 = vmul.f32 %v483_v22, %v459_v52  ;;  %v8262_v52 = vld [vmem:[#allocation2 + $0x18] sm:$0xff] }
  0xde   :  { %v492_v47 = vmul.f32 %v475_v42, %v457_v41  ;;  %v333_v42 = vld [vmem:[#allocation2 + $0x2f] sm:$0xff] }
  0xe0   :  { %v7423_v48 = vpack.i.bf16 %v492_v47, %v491_v44  ;;  %v311_v55 = vpop.permute.xlu2 %310  ;;  %v417_v44 = vld [vmem:[#allocation2 + $0x31] sm:$0xff] }
  0xe1   :  { %546 = vperm.xlu2 %7402, %v8018_v3   ;;  %v325_v23 = vmul.f32 %v311_v55, %v290_v24  ;;  %v6940_v55 = vld [vmem:[#allocation8 + $0xc8] sm:$0xff]  ;;  %v6922_v24 = vld [vmem:[#allocation8 + $0x38] sm:$0xff] }
  0xe2   :  { %7424 = vrot.lane.b32.xlu0 %v7423_v48, %s11259_s2  ;;  %1229 = vmatpush.bf16.msra.mxu3 %v6940_v55 }
  0xe3   :  { %1139 = vmatpush.bf16.msra.mxu0 %v6922_v24 }
  0xe4   :  { %7429 = vrot.lane.b32.xlu1 %v7428_v49, %s7872_s6 }
  0xe6   :  { %v513_v50 = vpop.permute.xlu1 %512  ;;  %1230 = vmatpush.bf16.msra.mxu3 %v6939_v57 }
  0xe7   :  { %v533_v20 = vmul.f32 %v513_v50, %v331_v40 }
  0xe9   :  { %7405 = vset.pattern.permute.xlu2 %v7870_v33  ;;  %v7433_v29 = vpack.i.bf16 %v534_v19, %v533_v20 }
  0xea   :  { %554 = vperm.xlu0 %7403, %v8041_v8   ;;  %219 = vperm.xlu2 %7405, %v8051_v9   ;;  %v416_v8 = vld [vmem:[#allocation2 + $0x29] sm:$0xff] }
  0xeb   :  { %v284_v59 = vmul.f32 %v416_v8, %v273_v51  ;;  %v451_v48 = vmul.f32 %v8181_v21, %v416_v8 }
  0xec   :  { %558 = vperm.xlu1 %7439, %v8051_v9  }
  0xef   :  { %v269_v53 = vpop.permute.xlu1 %268 }
  0xf0   :  { %v283_v60 = vmul.f32 %v415_v26, %v269_v53  ;;  %v291_v26 = vld [vmem:[#allocation2 + $0x2a] sm:$0xff] }
  0xf2   :  { %7438 = vset.pattern.permute.xlu0 %v7870_v33  ;;  %7407 = vset.pattern.permute.xlu2 %v7869_v32  ;;  %v7443_v17 = vpack.i.bf16 %v284_v59, %v283_v60  ;;  %v8244_v60 = vld [vmem:[#allocation2 + $0x10] sm:$0xff] }
  0xf3   :  { %204 = vperm.xlu0 %7438, %v8018_v3   ;;  %390 = vperm.xlu2 %7407, %v8051_v9   ;;  %v479_v3 = vpop.permute.xlu2 %478  ;;  %v458_v9 = vld [vmem:[#allocation2 + $0x2e] sm:$0xff] }
  0xf4   :  { %7441 = vset.pattern.permute.xlu1 %v7869_v32  ;;  %v493_v25 = vmul.f32 %v479_v3, %v458_v9 }
  0xf5   :  { %394 = vperm.xlu1 %7441, %v8063_v10  }
  0xf6   :  { %v7458_v34 = vpack.i.bf16 %v494_v27, %v493_v25 }
  0xf8   :  { %v441_v61 = vpop.permute.xlu1 %440 }
  0xf9   :  { %v452_v47 = vmul.f32 %v441_v61, %v417_v44  ;;  %v6929_v44 = vld [vmem:[#allocation8 + $0x70] sm:$0xff] }
  0xfb   :  { %7419 = vrot.lane.b32.xlu2 %v7418_v62, %s11259_s2  ;;  %229 = vperm.xlu0 %7438, %v8084_v12   ;;  %v357_v36 = vpop.permute.xlu2 %356  ;;  %v7448_v49 = vpack.i.bf16 %v452_v47, %v451_v48  ;;  %v8248_v62 = vld [vmem:[#allocation2 + $0x8] sm:$0xff]  ;;  %v6920_v48 = vld [vmem:[#allocation8 + $0x28] sm:$0xff] }
  0xfc   :  { %7440 = vset.pattern.permute.xlu2 %v7870_v33  ;;  %v368_v51 = vmul.f32 %v357_v36, %v333_v42 }
  0xfd   :  { %7444 = vrot.lane.b32.xlu1 %v7443_v17, %s7871_s29 }
  0xfe   :  { %7473 = vset.pattern.permute.xlu1 %v7868_v28 }
 0x101   :  { %v315_v4 = vpop.permute.xlu1 %314 }
 0x102   :  { %v326_v31 = vmul.f32 %v315_v4, %v291_v26 }
 0x103   :  { %7434 = vrot.lane.b32.xlu2 %v7433_v29, %s7872_s6  ;;  %7475 = vset.pattern.permute.xlu0 %v7863_v2  ;;  %v525_v40 = vpop.permute.xlu2 %524 }
 0x104   :  { %v7453_v35 = vpack.i.bf16 %v326_v31, %v325_v23  ;;  %v536_v41 = vmul.f32 %v525_v40, %v501_v39  ;;  %v6930_v31 = vld [vmem:[#allocation8 + $0x78] sm:$0xff]  ;;  %v6921_v40 = vld [vmem:[#allocation8 + $0x30] sm:$0xff] }
 0x105   :  { %7459 = vrot.lane.b32.xlu1 %v7458_v34, %s11259_s2  ;;  %v6938_v34 = vld [vmem:[#allocation8 + $0xb8] sm:$0xff]  ;;  %1167 = vmatpush.bf16.msra.mxu1 %v6930_v31 }
 0x106   :  { %7454 = vrot.lane.b32.xlu0 %v7453_v35, %s11259_s2  ;;  %1195 = vmatpush.bf16.msra.mxu2 %v6938_v34  ;;  %v6916_v34 = vld [vmem:[#allocation8 + $0x8] sm:$0xff] }
 0x107   :  { %1140 = vmatpush.bf16.msra.mxu0 %v6921_v40  ;;  %v6931_v40 = vld [vmem:[#allocation8 + $0x80] sm:$0xff] }
 0x109   :  { %1168 = vmatpush.bf16.msra.mxu1 %v6929_v44 }
 0x10a   :  { %v353_v37 = vpop.permute.xlu1 %352 }
 0x10b   :  { %224 = vperm.xlu2 %7440, %v8063_v10   ;;  %v367_v53 = vmul.f32 %v499_v63, %v353_v37  ;;  %v8230_v54 = vpop.permute.xlu2 %378  ;;  %1141 = vmatpush.bf16.msra.mxu0 %v6920_v48  ;;  %v8293_v48 = vld [vmem:[#allocation2 + $0x20] sm:$0xff] }
 0x10d   :  { %562 = vperm.xlu1 %7473, %v8063_v10   ;;  %v7463_v21 = vpack.i.bf16 %v368_v51, %v367_v53  ;;  %v6936_v51 = vld [vmem:[#allocation8 + $0xa8] sm:$0xff]  ;;  %v6919_v53 = vld [vmem:[#allocation8 + $0x20] sm:$0xff] }
 0x10f   :  { %1142 = vmatpush.bf16.msra.mxu0 %v6919_v53 }
 0x113   :  { %v521_v45 = vpop.permute.xlu1 %520  ;;  %7442 = vset.pattern.permute.xlu2 %v7869_v32  ;;  %v8239_v58 = vpop.permute.xlu2 %7373 }
 0x114   :  { %v535_v38 = vmul.f32 %v521_v45, %v333_v42  ;;  %398 = vperm.xlu2 %7442, %v8084_v12   ;;  %v7376_v19 = vunpack.i.h.bf16 %v8239_v58  ;;  %v6937_v45 = vld [vmem:[#allocation8 + $0xb0] sm:$0xff] }
 0x115   :  { %7476 = vset.pattern.permute.xlu1 %v7861_v0  ;;  %1196 = vmatpush.bf16.msra.mxu2 %v6937_v45 }
 0x116   :  { %v7468_v10 = vpack.i.bf16 %v536_v41, %v535_v38  ;;  %444 = vperm.xlu1 %7476, %v8218_v46  }
 0x118   :  { %7469 = vrot.lane.b32.xlu0 %v7468_v10, %s7872_s6 }
 0x119   :  { %1197 = vmatpush.bf16.msra.mxu2 %v6936_v51 }
 0x11c   :  { %v210_v50 = vpop.permute.xlu1 %209  ;;  %7449 = vrot.lane.b32.xlu2 %v7448_v49, %s7871_s29 }
 0x11d   :  { %7474 = vset.pattern.permute.xlu2 %v7868_v28  ;;  %v8233_v8 = vpop.permute.xlu0 %7378  ;;  %v238_v17 = vmul.f32 %v8248_v62, %v210_v50  ;;  %v6928_v50 = vld [vmem:[#allocation8 + $0x68] sm:$0xff] }
 0x11e   :  { %7478 = vset.pattern.permute.xlu1 %v7865_v6  ;;  %v7381_v3 = vunpack.i.h.bf16 %v8233_v8  ;;  %1169 = vmatpush.bf16.msra.mxu1 %v6928_v50 }
 0x11f   :  { %486 = vperm.xlu1 %7478, %v8218_v46   ;;  %v749_v27 = vsel %vm184_vm0, %v238_v17, %v7376_v19  ;;  %v6918_v17 = vld [vmem:[#allocation8 + $0x18] sm:$0xff] }
 0x120   :  { %276 = vperm.xlu0 %7475, %v8218_v46   ;;  %1143 = vmatpush.bf16.msra.mxu0 %v6918_v17  ;;  %v6926_v19 = vld [vmem:[#allocation8 + $0x58] sm:$0xff] }
 0x124   :  { %7464 = vrot.lane.b32.xlu2 %v7463_v21, %s7872_s6  ;;  %v6927_v21 = vld [vmem:[#allocation8 + $0x60] sm:$0xff] }
 0x125   :  { %v383_v56 = vpop.permute.xlu1 %382  ;;  %1170 = vmatpush.bf16.msra.mxu1 %v6927_v21 }
 0x126   :  { %v406_v63 = vmul.f32 %v383_v56, %v8244_v60  ;;  %v6935_v56 = vld [vmem:[#allocation8 + $0xa0] sm:$0xff] }
 0x127   :  { %7481 = vset.pattern.permute.xlu1 %v7870_v33  ;;  %1198 = vmatpush.bf16.msra.mxu2 %v6935_v56 }
 0x128   :  { %7480 = vset.pattern.permute.xlu0 %v7866_v7  ;;  %234 = vperm.xlu1 %7481, %v8218_v46   ;;  %v772_v25 = vsel %vm184_vm0, %v406_v63, %v7381_v3 }
 0x129   :  { %528 = vperm.xlu0 %7480, %v8218_v46   ;;  %1171 = vmatpush.bf16.msra.mxu1 %v6926_v19 }
 0x12c   :  { %566 = vperm.xlu2 %7474, %v8084_v12  }
 0x12d   :  { %v8242_v59 = vpop.permute.xlu1 %7383 }
 0x12e   :  { %v8246_v61 = vpop.permute.xlu0 %7393  ;;  %v7386_v12 = vunpack.i.h.bf16 %v8242_v59 }
 0x12f   :  { %v7396_v20 = vunpack.i.h.bf16 %v8246_v61 }
 0x130   :  { %7501 = vset.pattern.permute.xlu1 %v7863_v2  ;;  %v757_v35 = vsel %vm755_vm2, %v749_v27, %v7386_v12  ;;  %v6933_v27 = vld [vmem:[#allocation8 + $0x90] sm:$0xff] }
 0x131   :  { %7500 = vset.pattern.permute.xlu0 %v7864_v5  ;;  %v765_v37 = vsel %vm763_vm3, %v757_v35, %v7396_v20  ;;  %v6934_v20 = vld [vmem:[#allocation8 + $0x98] sm:$0xff]  ;;  %v6924_v35 = vld [vmem:[#allocation8 + $0x48] sm:$0xff] }
 0x132   :  { %1199 = vmatpush.bf16.msra.mxu2 %v6934_v20 }
 0x133   :  { %v8256_v9 = vpop.permute.xlu2 %7388 }
 0x134   :  { %v7391_v22 = vunpack.i.h.bf16 %v8256_v9  ;;  %7477 = vset.pattern.permute.xlu2 %v7862_v1 }
 0x135   :  { %v8265_v26 = vpop.permute.xlu1 %7398  ;;  %318 = vperm.xlu2 %7477, %v8218_v46  }
 0x136   :  { %v779_v29 = vsel %vm755_vm2, %v772_v25, %v7391_v22  ;;  %v7401_v4 = vunpack.i.h.bf16 %v8265_v26  ;;  %v551_v23 = vpop.permute.xlu0 %550  ;;  %v6917_v22 = vld [vmem:[#allocation8 + $0x10] sm:$0xff]  ;;  %1200 = vmatpush.bf16.msra.mxu2 %v6933_v27 }
 0x137   :  { %v574_v36 = vmul.f32 %v551_v23, %v8262_v52  ;;  %1144 = vmatpush.bf16.msra.mxu0 %v6917_v22  ;;  %v6925_v25 = vld [vmem:[#allocation8 + $0x50] sm:$0xff] }
 0x138   :  { %v786_v39 = vsel %vm763_vm3, %v779_v29, %v7401_v4  ;;  %v158_v29 = vld [vmem:[%s11262_s8] sm:$0xf]  ;;  %v159_v23 = vld [vmem:[%s11262_s8 + $0x4] sm:$0xf]  ;;  %1172 = vmatpush.bf16.msra.mxu1 %v6925_v25 }
 0x139   :  { %v794_v41 = vpack.c.bf16 %v786_v39, %v765_v37  ;;  %v795_v42 = vpack.c.bf16 %v574_v36, %v574_v36  ;;  %165 = vst [vmem:[#allocation4] sm:$0xf] %v158_v29  ;;  %v6932_v36 = vld [vmem:[#allocation8 + $0x88] sm:$0xff]  ;;  %v6915_v37 = vld [vmem:[#allocation8] sm:$0xff] }
 0x13a   :  { %166 = vst [vmem:[#allocation4 + $0x10] sm:$0xf] %v159_v23  ;;  %v6923_v39 = vld [vmem:[#allocation8 + $0x40] sm:$0xff]  ;;  %1201 = vmatpush.bf16.msra.mxu2 %v6932_v36 }
 0x13b   :  { %809 = vst [vmem:[#allocation4 + $0x14] sm:$0xff] %v794_v41  ;;  %v547_v38 = vpop.permute.xlu2 %546  ;;  %1145 = vmatpush.bf16.msra.mxu0 %v6916_v34 }
 0x13c   :  { %810 = vst.msk [vmem:[#allocation4 + $0x1c] sm:$0xf] %vm807_vm4, %v795_v42  ;;  %v573_v47 = vmul.f32 %v547_v38, %v8244_v60  ;;  %1173 = vmatpush.bf16.msra.mxu1 %v6924_v35 }
 0x13d   :  { %v8277_v10 = vpop.permute.xlu1 %214  ;;  %7479 = vset.pattern.permute.xlu2 %v7864_v5 }
 0x13e   :  { %v793_v49 = vpack.c.bf16 %v573_v47, %v573_v47  ;;  %360 = vperm.xlu2 %7479, %v8218_v46   ;;  %v7410_v24 = vpop.permute.xlu0 %7409  ;;  %1202 = vmatpush.bf16.msra.mxu2 %v6931_v40 }
 0x13f   :  { %1146 = vmatpush.bf16.msra.mxu0 %v6915_v37  ;;  %v7412_v51 = vunpack.i.h.bf16 %v7410_v24 }
 0x140   :  { %808 = vst.msk [vmem:[#allocation4 + $0xc] sm:$0xf] %vm807_vm4, %v793_v49  ;;  %v5202_v42 = vld [vmem:[#allocation4] sm:$0xf]  ;;  %1174 = vmatpush.bf16.msra.mxu1 %v6923_v39  ;;  %v239_v49 = vmul.f32 %v8244_v60, %v8277_v10 }
 0x141   :  { %v6905_v45 = vld [vmem:[#allocation4 + $0xc] sm:$0xf0] }
 0x142   :  { %v5203_v47 = vor.u32 %v6905_v45, %v5202_v42 }
 0x143   :  { %v5212_v57 = vld [vmem:[#allocation4 + $0x18] sm:$0xf0] }
 0x144   :  { %v220_v55 = vpop.permute.xlu2 %219  ;;  %1147 = vmatmul.bf16.vlgmr.msra.gmra.mxu0 %v5203_v47 }
 0x145   :  { %v240_v50 = vmul.f32 %v8262_v52, %v220_v55 }
 0x146   :  { %v387_v63 = vpop.permute.xlu1 %386  ;;  %7482 = vset.pattern.permute.xlu2 %v7869_v32 }
 0x147   :  { %v6904_v3 = vld [vmem:[#allocation4 + $0xc] sm:$0xf]  ;;  %402 = vperm.xlu2 %7482, %v8218_v46   ;;  %v407_v56 = vmul.f32 %v8262_v52, %v387_v63  ;;  %v751_v60 = vsel %vm184_vm0, %v240_v50, %v7412_v51  ;;  %v7380_v50 = vunpack.i.l.bf16 %v8233_v8  ;;  %v7390_v51 = vunpack.i.l.bf16 %v8256_v9 }
 0x148   :  { %v5215_v12 = vor.u32 %v6904_v3, %v5212_v57  ;;  %v161_v52 = vld [vmem:[%s11262_s8 + $0xc] sm:$0xf]  ;;  %v7385_v8 = vunpack.i.l.bf16 %v8242_v59 }
 0x149   :  { %168 = vst [vmem:[#allocation4 + $0x30] sm:$0xf] %v161_v52 }
 0x14a   :  { %5352 = vmatmul.msk.bf16.vlgmr.msra.gmra.mxu3 %vm184_vm0, %v5215_v12 }
 0x14d   :  { %v391_v4 = vpop.permute.xlu2 %390 }
 0x14e   :  { %v7415_v31 = vpop.permute.xlu1 %7414  ;;  %v408_v57 = vmul.f32 %v391_v4, %v8293_v48 }
 0x14f   :  { %7488 = vset.pattern.permute.xlu2 %v7868_v28  ;;  %v7417_v17 = vunpack.i.h.bf16 %v7415_v31  ;;  %v7416_v3 = vunpack.i.l.bf16 %v7415_v31 }
 0x150   :  { %570 = vperm.xlu2 %7488, %v8218_v46   ;;  %v7411_v46 = vunpack.i.l.bf16 %v7410_v24  ;;  %v8303_v24 = vld [vmem:[#allocation2 + $0x28] sm:$0xff] }
 0x151   :  { %v773_v4 = vsel %vm184_vm0, %v407_v56, %v7416_v3  ;;  %v774_v23 = vsel %vm184_vm0, %v408_v57, %v7417_v17  ;;  %v7375_v56 = vunpack.i.l.bf16 %v8239_v58  ;;  %v6909_v3 = vld [vmem:[#allocation4 + $0x2c] sm:$0xf0] }
 0x152   :  { %v750_v20 = vsel %vm184_vm0, %v239_v49, %v7411_v46  ;;  %v405_v46 = vmul.f32 %v8230_v54, %v8248_v62 }
 0x154   :  { %v7425_v41 = vpop.permute.xlu0 %7424 }
 0x155   :  { %v7420_v44 = vpop.permute.xlu2 %7419  ;;  %v7427_v12 = vunpack.i.h.bf16 %v7425_v41  ;;  %v7426_v19 = vunpack.i.l.bf16 %v7425_v41 }
 0x156   :  { %v7430_v38 = vpop.permute.xlu1 %7429  ;;  %v7422_v53 = vunpack.i.h.bf16 %v7420_v44  ;;  %v7421_v21 = vunpack.i.l.bf16 %v7420_v44 }
 0x157   :  { %v7432_v10 = vunpack.i.h.bf16 %v7430_v38  ;;  %v7431_v55 = vunpack.i.l.bf16 %v7430_v38  ;;  %v780_v36 = vsel %vm755_vm2, %v773_v4, %v7426_v19  ;;  %v781_v37 = vsel %vm755_vm2, %v774_v23, %v7427_v12 }
 0x158   :  { %7499 = vset.pattern.permute.xlu2 %v7863_v2  ;;  %v160_v2 = vld [vmem:[%s11262_s8 + $0x8] sm:$0xf]  ;;  %v759_v63 = vsel %vm755_vm2, %v751_v60, %v7422_v53  ;;  %v758_v25 = vsel %vm755_vm2, %v750_v20, %v7421_v21  ;;  %v195_v53 = vld [vmem:[#allocation2] sm:$0xff]  ;;  %v771_v12 = vsel %vm184_vm0, %v405_v46, %v7380_v50  ;;  %v7400_v19 = vunpack.i.l.bf16 %v8265_v26 }
 0x159   :  { %167 = vst [vmem:[#allocation4 + $0x20] sm:$0xf] %v160_v2  ;;  %v766_v41 = vsel %vm763_vm3, %v758_v25, %v7431_v55  ;;  %v767_v42 = vsel %vm763_vm3, %v759_v63, %v7432_v10  ;;  %v778_v9 = vsel %vm755_vm2, %v771_v12, %v7390_v51  ;;  %v7395_v60 = vunpack.i.l.bf16 %v8246_v61  ;;  %v162_v61 = vld [vmem:[%s11262_s8 + $0x10] sm:$0xf] }
 0x15a   :  { %v785_v55 = vsel %vm763_vm3, %v778_v9, %v7400_v19  ;;  %169 = vst [vmem:[#allocation4 + $0x40] sm:$0xf] %v162_v61 }
 0x15c   :  { %v555_v22 = vpop.permute.xlu0 %554 }
 0x15d   :  { %v575_v27 = vmul.f32 %v555_v22, %v8293_v48  ;;  %v7435_v29 = vpop.permute.xlu2 %7434 }
 0x15e   :  { %v7437_v31 = vunpack.i.h.bf16 %v7435_v29  ;;  %v7436_v34 = vunpack.i.l.bf16 %v7435_v29  ;;  %v559_v35 = vpop.permute.xlu1 %558  ;;  %v5204_v29 = vld [vmem:[#allocation4 + $0x10] sm:$0xf0] }
 0x15f   :  { %v797_v39 = vpack.c.bf16 %v575_v27, %v575_v27  ;;  %v576_v40 = vmul.f32 %v559_v35, %v8303_v24  ;;  %v163_v27 = vld [vmem:[%s11262_s8 + $0x14] sm:$0xf] }
 0x160   :  { %v788_v44 = vsel %vm763_vm3, %v781_v37, %v7437_v31  ;;  %v787_v45 = vsel %vm763_vm3, %v780_v36, %v7436_v34  ;;  %v5218_v21 = vld [vmem:[#allocation4 + $0x20] sm:$0xf]  ;;  %170 = vst [vmem:[#allocation4 + $0x50] sm:$0xf] %v163_v27  ;;  %v6906_v31 = vld [vmem:[#allocation4 + $0x14] sm:$0xf0] }
 0x161   :  { %812 = vst.msk [vmem:[#allocation4 + $0x2c] sm:$0xf] %vm807_vm4, %v797_v39  ;;  %v796_v38 = vpack.c.bf16 %v787_v45, %v766_v41  ;;  %v798_v47 = vpack.c.bf16 %v788_v44, %v767_v42  ;;  %v799_v49 = vpack.c.bf16 %v576_v40, %v576_v40  ;;  %v5219_v62 = vor.u32 %v6909_v3, %v5218_v21  ;;  %v5234_v39 = vld [vmem:[#allocation4 + $0x40] sm:$0xf]  ;;  %v375_v45 = vld [vmem:[#allocation2 + $0x30] sm:$0xff] }
 0x163   :  { %811 = vst [vmem:[#allocation4 + $0x24] sm:$0xff] %v796_v38  ;;  %1152 = vmatmul.bf16.gmra.mxu0 %v5219_v62 }
 0x164   :  { %813 = vst [vmem:[#allocation4 + $0x34] sm:$0xff] %v798_v47 }
 0x165   :  { %814 = vst.msk [vmem:[#allocation4 + $0x3c] sm:$0xf] %vm807_vm4, %v799_v49  ;;  %v205_v57 = vpop.permute.xlu0 %204  ;;  %v225_v17 = vpop.permute.xlu2 %224 }
 0x166   :  { %v237_v54 = vmul.f32 %v205_v57, %v195_v53  ;;  %v543_v57 = vld [vmem:[#allocation2 + $0x38] sm:$0xff] }
 0x167   :  { %v395_v20 = vpop.permute.xlu1 %394  ;;  %v6913_v41 = vld [vmem:[#allocation4 + $0x4c] sm:$0xf0] }
 0x168   :  { %v748_v58 = vsel %vm184_vm0, %v237_v54, %v7375_v56  ;;  %v6908_v26 = vld [vmem:[#allocation4 + $0x2c] sm:$0xf]  ;;  %v5235_v42 = vor.u32 %v6913_v41, %v5234_v39  ;;  %v241_v54 = vmul.f32 %v8293_v48, %v225_v17  ;;  %v409_v62 = vmul.f32 %v8303_v24, %v395_v20  ;;  %v292_v41 = vld [vmem:[#allocation2 + $0x32] sm:$0x1] }
 0x169   :  { %v756_v10 = vsel %vm755_vm2, %v748_v58, %v7385_v8 }
 0x16a   :  { %v764_v22 = vsel %vm763_vm3, %v756_v10, %v7395_v60  ;;  %v6907_v49 = vld [vmem:[#allocation4 + $0x24] sm:$0xf]  ;;  %v5226_v53 = vld [vmem:[#allocation4 + $0x28] sm:$0xf] }
 0x16b   :  { %v792_v2 = vpack.c.bf16 %v785_v55, %v764_v22  ;;  %v5220_v51 = vld [vmem:[#allocation4 + $0x30] sm:$0xf0]  ;;  %v6910_v21 = vld [vmem:[#allocation4 + $0x34] sm:$0xf0] }
 0x16c   :  { %v5228_v52 = vld [vmem:[#allocation4 + $0x38] sm:$0xf0]  ;;  %v5223_v12 = vor.u32 %v6907_v49, %v5220_v51  ;;  %v5227_v19 = vor.u32 %v6910_v21, %v5226_v53  ;;  %v250_v49 = vld [vmem:[#allocation2 + $0x31] sm:$0x1] }
 0x16d   :  { %806 = vst [vmem:[#allocation4 + $0x4] sm:$0xff] %v792_v2  ;;  %v5231_v63 = vor.u32 %v6908_v26, %v5228_v52  ;;  %v230_v40 = vpop.permute.xlu0 %229 }
 0x16e   :  { %v399_v59 = vpop.permute.xlu2 %398  ;;  %v242_v9 = vmul.f32 %v8303_v24, %v230_v40 }
 0x16f   :  { %5353 = vmatmul.msk.bf16.gmra.mxu3 %vm184_vm0, %v5231_v63  ;;  %v7445_v25 = vpop.permute.xlu1 %7444  ;;  %v410_v8 = vmul.f32 %v399_v59, %v375_v45 }
 0x170   :  { %v7447_v58 = vunpack.i.h.bf16 %v7445_v25  ;;  %v7446_v10 = vunpack.i.l.bf16 %v7445_v25 }
 0x172   :  { %v753_v24 = vsel %vm184_vm0, %v242_v9, %v7447_v58  ;;  %v752_v25 = vsel %vm184_vm0, %v241_v54, %v7446_v10  ;;  %v334_v9 = vld [vmem:[#allocation2 + $0x37] sm:$0x1] }
 0x173   :  { %1157 = vmatmul.bf16.gmra.mxu0 %v5235_v42 }
 0x174   :  { %v6903_v4 = vld [vmem:[#allocation4 + $0x4] sm:$0xf]  ;;  %v5210_v23 = vld [vmem:[#allocation4 + $0x8] sm:$0xf] }
 0x175   :  { %v5207_v34 = vor.u32 %v6903_v4, %v5204_v29  ;;  %v5211_v35 = vor.u32 %v6906_v31, %v5210_v23 }
 0x176   :  { %v7450_v36 = vpop.permute.xlu2 %7449 }
 0x177   :  { %v7460_v37 = vpop.permute.xlu1 %7459  ;;  %1175 = vmatmul.bf16.vlgmr.msra.gmra.mxu1 %v5207_v34  ;;  %1203 = vmatmul.bf16.vlgmr.msra.gmra.mxu2 %v5211_v35  ;;  %v7452_v56 = vunpack.i.h.bf16 %v7450_v36  ;;  %v7451_v3 = vunpack.i.l.bf16 %v7450_v36 }
 0x178   :  { %v7455_v46 = vpop.permute.xlu0 %7454  ;;  %v7462_v55 = vunpack.i.h.bf16 %v7460_v37  ;;  %v7461_v26 = vunpack.i.l.bf16 %v7460_v37 }
 0x179   :  { %v776_v2 = vsel %vm184_vm0, %v410_v8, %v7452_v56  ;;  %v7457_v52 = vunpack.i.h.bf16 %v7455_v46  ;;  %v7456_v63 = vunpack.i.l.bf16 %v7455_v46  ;;  %v775_v48 = vsel %vm184_vm0, %v409_v62, %v7451_v3 }
 0x17a   :  { %v782_v23 = vsel %vm755_vm2, %v775_v48, %v7461_v26  ;;  %v783_v31 = vsel %vm755_vm2, %v776_v2, %v7462_v55  ;;  %v502_v2 = vld [vmem:[#allocation2 + $0x3f] sm:$0x1] }
 0x17b   :  { %v760_v34 = vsel %vm755_vm2, %v752_v25, %v7456_v63  ;;  %v761_v35 = vsel %vm755_vm2, %v753_v24, %v7457_v52 }
 0x17e   :  { %v7465_v44 = vpop.permute.xlu2 %7464 }
 0x17f   :  { %v563_v38 = vpop.permute.xlu1 %562  ;;  %v7467_v17 = vunpack.i.h.bf16 %v7465_v44  ;;  %v7466_v20 = vunpack.i.l.bf16 %v7465_v44 }
 0x180   :  { %v577_v47 = vmul.f32 %v563_v38, %v375_v45  ;;  %v418_v45 = vld [vmem:[#allocation2 + $0x39] sm:$0x1]  ;;  %v460_v38 = vld [vmem:[#allocation2 + $0x3e] sm:$0x1] }
 0x181   :  { %v769_v36 = vsel %vm763_vm3, %v761_v35, %v7467_v17  ;;  %v768_v37 = vsel %vm763_vm3, %v760_v34, %v7466_v20  ;;  %v174_v34 = vld [vmem:[#allocation4 + $0x60] sm:$0x1] }
 0x182   :  { %v801_v50 = vpack.c.bf16 %v577_v47, %v577_v47 }
 0x184   :  { %816 = vst.msk [vmem:[#allocation4 + $0x4c] sm:$0xf] %vm807_vm4, %v801_v50 }
 0x186   :  { %v567_v60 = vpop.permute.xlu2 %566 }
 0x187   :  { %v578_v22 = vmul.f32 %v567_v60, %v543_v57  ;;  %1180 = vmatmul.bf16.gmra.mxu1 %v5223_v12  ;;  %1208 = vmatmul.bf16.gmra.mxu2 %v5227_v19 }
 0x188   :  { %v445_v61 = vpop.permute.xlu1 %444 }
 0x189   :  { %v803_v59 = vpack.c.bf16 %v578_v22, %v578_v22  ;;  %v453_v51 = vmul.f32 %v445_v61, %v418_v45 }
 0x18a   :  { %v7470_v27 = vpop.permute.xlu0 %7469 }
 0x18b   :  { %818 = vst.msk [vmem:[#allocation4 + $0x5c] sm:$0xf] %vm807_vm4, %v803_v59  ;;  %v7472_v29 = vunpack.i.h.bf16 %v7470_v27  ;;  %v7471_v4 = vunpack.i.l.bf16 %v7470_v27  ;;  %v6912_v50 = vld [vmem:[#allocation4 + $0x4c] sm:$0xf]  ;;  %v544_v27 = vld [vmem:[#allocation2 + $0x40] sm:$0x1] }
 0x18d   :  { %v789_v39 = vsel %vm763_vm3, %v782_v23, %v7471_v4  ;;  %v790_v40 = vsel %vm763_vm3, %v783_v31, %v7472_v29  ;;  %v164_v31 = vld [vmem:[%s11262_s8 + $0x18] sm:$0x1] }
 0x18e   :  { %v800_v42 = vpack.c.bf16 %v789_v39, %v768_v37  ;;  %v802_v44 = vpack.c.bf16 %v790_v40, %v769_v36  ;;  %v175_v36 = vsel %vm8373_vm7, %v164_v31, %v174_v34  ;;  %v828_v37 = vld [vmem:[#allocation4 + $0x6c] sm:$0x1]  ;;  %v8384_v39 = vld [vmem:[#allocation10] ss:$0 sm:$0xff]  ;;  %v6952_v4 = vld [vmem:[%s11230_s10 + $0x14] sm:$0xf0] }
 0x18f   :  { %v319_v47 = vpop.permute.xlu2 %318  ;;  %176 = vst [vmem:[#allocation4 + $0x60] sm:$0x1] %v175_v36 }
 0x190   :  { %815 = vst [vmem:[#allocation4 + $0x44] sm:$0xff] %v800_v42  ;;  %v327_v46 = vmul.f32 %v319_v47, %v292_v41 }
 0x191   :  { %817 = vst [vmem:[#allocation4 + $0x54] sm:$0xff] %v802_v44  ;;  %v487_v53 = vpop.permute.xlu1 %486 }
 0x192   :  { %v277_v21 = vpop.permute.xlu0 %276  ;;  %v495_v56 = vmul.f32 %v487_v53, %v460_v38  ;;  %v5244_v57 = vld [vmem:[#allocation4 + $0x58] sm:$0xf0] }
 0x193   :  { %v285_v3 = vmul.f32 %v277_v21, %v250_v49  ;;  %v5247_v12 = vor.u32 %v6912_v50, %v5244_v57  ;;  %v376_v57 = vld [vmem:[#allocation2 + $0x38] sm:$0x1] }
 0x194   :  { %v7489_v19 = vpack.i.bf16 %v495_v56, %v327_v46 }
 0x195   :  { %v7483_v54 = vpack.i.bf16 %v453_v51, %v285_v3  ;;  %5354 = vmatmul.msk.bf16.gmra.mxu3 %vm184_vm0, %v5247_v12 }
 0x196   :  { %7490 = vrot.lane.b32.xlu0 %v7489_v19, %s11259_s2 }
 0x197   :  { %7484 = vrot.lane.b32.xlu1 %v7483_v54, %s7871_s29  ;;  %v6911_v62 = vld [vmem:[#allocation4 + $0x44] sm:$0xf]  ;;  %v5242_v8 = vld [vmem:[#allocation4 + $0x48] sm:$0xf] }
 0x198   :  { %v5236_v60 = vld [vmem:[#allocation4 + $0x50] sm:$0xf0]  ;;  %v6914_v58 = vld [vmem:[#allocation4 + $0x54] sm:$0xf0]  ;;  %v361_v10 = vpop.permute.xlu2 %360 }
 0x199   :  { %v5239_v55 = vor.u32 %v6911_v62, %v5236_v60  ;;  %v5243_v22 = vor.u32 %v6914_v58, %v5242_v8  ;;  %v369_v26 = vmul.f32 %v361_v10, %v334_v9  ;;  %v201_v62 = vld [vmem:[#allocation2 + $0x30] sm:$0x1] }
 0x19a   :  { %v235_v44 = vpop.permute.xlu1 %234 }
 0x19b   :  { %1185 = vmatmul.bf16.gmra.mxu1 %v5239_v55  ;;  %1213 = vmatmul.bf16.gmra.mxu2 %v5243_v22  ;;  %v529_v52 = vpop.permute.xlu0 %528 }
 0x19c   :  { %v537_v63 = vmul.f32 %v529_v52, %v502_v2 }
 0x19e   :  { %v7494_v61 = vpack.i.bf16 %v537_v63, %v369_v26  ;;  %v243_v26 = vmul.f32 %v235_v44, %v201_v62 }
 0x1a0   :  { %7495 = vrot.lane.b32.xlu1 %v7494_v61, %s7872_s6 }
 0x1a1   :  { %v403_v17 = vpop.permute.xlu2 %402 }
 0x1a2   :  { %v411_v8 = vmul.f32 %v403_v17, %v376_v57 }
 0x1aa   :  { %v571_v24 = vpop.permute.xlu2 %570 }
 0x1ab   :  { %v579_v25 = vmul.f32 %v571_v24, %v544_v27 }
 0x1ad   :  { %v805_v23 = vpack.c.bf16 %v579_v25, %v579_v25 }
 0x1af   :  { %v829_v41 = vsel %vm827_vm8, %v805_v23, %v828_v37 }
 0x1b0   :  { %830 = vst [vmem:[#allocation4 + $0x6c] sm:$0x1] %v829_v41 }
 0x1c1   :  { %v1148_v48 = vpop.f32.mrf.mxu0 }
 0x1c2   :  { %v1149_v27 = vadd.f32 %v8384_v39, %v1148_v48  ;;  %v5587_v48 = vld [vmem:[%s11230_s10 + $0x158] sm:$0xf0] }
 0x1c9   :  { %v1150_v59 = vpop.f32.mrf.mxu0 }
 0x1ca   :  { %v1151_v42 = vadd.f32 %v8384_v39, %v1150_v59 }
 0x1cd   :  { %v8369_v29 = vpop.f32.mrf.mxu3 }
 0x1d5   :  { %v1234_v47 = vpop.f32.mrf.mxu3 }
 0x1e0   :  { %v1153_v45 = vpop.f32.mrf.mxu0 }
 0x1e1   :  { %v1154_v51 = vadd.f32 %v8384_v39, %v1153_v45 }
 0x1e8   :  { %v1155_v3 = vpop.f32.mrf.mxu0 }
 0x1e9   :  { %v1156_v55 = vadd.f32 %v8384_v39, %v1155_v3 }
 0x1f0   :  { %v1158_v36 = vpop.f32.mrf.mxu0 }
 0x1f2   :  { %v1237_v12 = vpop.f32.mrf.mxu3 }
 0x1f4   :  { %v8367_v20 = vpop.f32.mrf.mxu1 }
 0x1fa   :  { %v8380_v35 = vpop.f32.mrf.mxu2  ;;  %v1239_v37 = vpop.f32.mrf.mxu3 }
 0x1fc   :  { %v1178_v40 = vpop.f32.mrf.mxu1 }
 0x1fd   :  { %v1179_v38 = vadd.f32 %v1178_v40, %v1151_v42 }
 0x202   :  { %v1206_v49 = vpop.f32.mrf.mxu2 }
 0x203   :  { %v1207_v46 = vadd.f32 %v1206_v49, %v1179_v38  ;;  %v1177_v49 = vadd.f32 %v8367_v20, %v1149_v27  ;;  %v1160_v20 = vpop.f32.mrf.mxu0 }
 0x204   :  { %v1181_v50 = vpop.f32.mrf.mxu1 }
 0x205   :  { %v8390_v53 = vadd.f32 %v1234_v47, %v1207_v46  ;;  %v1182_v21 = vadd.f32 %v1181_v50, %v1154_v51  ;;  %v823_v47 = vld [vmem:[#allocation4 + $0x64] sm:$0x11]  ;;  %v1205_v50 = vadd.f32 %v8380_v35, %v1177_v49 }
 0x207   :  { %7586 = vtanh.f32 %v8390_v53  ;;  %v8421_v57 = vadd.f32 %v8369_v29, %v1205_v50 }
 0x208   :  { %v7491_v10 = vpop.permute.xlu0 %7490 }
 0x209   :  { %v7485_v56 = vpop.permute.xlu1 %7484  ;;  %v7493_v52 = vunpack.i.h.bf16 %v7491_v10  ;;  %v7492_v63 = vunpack.i.l.bf16 %v7491_v10 }
 0x20a   :  { %v1209_v19 = vpop.f32.mrf.mxu2  ;;  %v7487_v60 = vunpack.i.h.bf16 %v7485_v56  ;;  %v7486_v58 = vunpack.i.l.bf16 %v7485_v56  ;;  %v1159_v56 = vadd.f32 %v8384_v39, %v1158_v36  ;;  %v5357_v36 = vmul.f32 -1.442695, %v8390_v53 }
 0x20b   :  { %v1210_v54 = vadd.f32 %v1209_v19, %v1182_v21 }
 0x20c   :  { %v1183_v2 = vpop.f32.mrf.mxu1  ;;  %v754_v61 = vsel %vm184_vm0, %v243_v26, %v7486_v58  ;;  %v777_v17 = vsel %vm184_vm0, %v411_v8, %v7487_v60 }
 0x20d   :  { %v7587_v9 = vpop.eup %7586  ;;  %v8394_v22 = vadd.f32 %v1237_v12, %v1210_v54  ;;  %v1184_v59 = vadd.f32 %v1183_v2, %v1156_v55  ;;  %v762_v40 = vsel %vm755_vm2, %v754_v61, %v7492_v63  ;;  %v784_v41 = vsel %vm755_vm2, %v777_v17, %v7493_v52 }
 0x20e   :  { %1407 = vrot.lane.b32.xlu2 %v7587_v9, %s11259_s2  ;;  %v1161_v9 = vadd.f32 %v8384_v39, %v1160_v20 }
 0x20f   :  { %7588 = vtanh.f32 %v8394_v22 }
 0x212   :  { %v7496_v24 = vpop.permute.xlu1 %7495  ;;  %v1211_v25 = vpop.f32.mrf.mxu2 }
 0x213   :  { %v7498_v23 = vunpack.i.h.bf16 %v7496_v24  ;;  %v7497_v31 = vunpack.i.l.bf16 %v7496_v24  ;;  %v1212_v34 = vadd.f32 %v1211_v25, %v1184_v59 }
 0x215   :  { %v7589_v42 = vpop.eup %7588  ;;  %v770_v44 = vsel %vm763_vm3, %v762_v40, %v7497_v31  ;;  %v791_v45 = vsel %vm763_vm3, %v784_v41, %v7498_v23  ;;  %v8405_v38 = vadd.f32 %v1239_v37, %v1212_v34 }
 0x216   :  { %v804_v46 = vpack.c.bf16 %v791_v45, %v770_v44  ;;  %1409 = vrot.lane.b32.xlu0 %v7589_v42, %s11259_s2 }
 0x217   :  { %7590 = vtanh.f32 %v8405_v38 }
 0x218   :  { %v824_v51 = vsel %vm8409_vm12, %v804_v46, %v823_v47  ;;  %v1186_v21 = vpop.f32.mrf.mxu1  ;;  %v1242_v19 = vpop.f32.mrf.mxu3  ;;  %7592 = vtanh.f32 %v8421_v57  ;;  %v5358_v47 = vmul.f32 -1.442695, %v8394_v22 }
 0x219   :  { %825 = vst [vmem:[#allocation4 + $0x64] sm:$0x11] %v824_v51  ;;  %v1187_v12 = vadd.f32 %v1186_v21, %v1159_v56  ;;  %v5359_v21 = vmul.f32 -1.442695, %v8405_v38 }
 0x21d   :  { %v7591_v3 = vpop.eup %7590 }
 0x21e   :  { %v1214_v54 = vpop.f32.mrf.mxu2  ;;  %1411 = vrot.lane.b32.xlu1 %v7591_v3, %s11259_s2  ;;  %v7593_v59 = vpop.eup %7592 }
 0x21f   :  { %v1215_v62 = vadd.f32 %v1214_v54, %v1187_v12 }
 0x220   :  { %v843_v35 = vld [vmem:[#allocation4 + $0x60] sm:$0x11]  ;;  %v844_v8 = vld [vmem:[#allocation4 + $0x68] sm:$0x11]  ;;  %v1188_v55 = vpop.f32.mrf.mxu1  ;;  %v1244_v25 = vpop.f32.mrf.mxu3 }
 0x221   :  { %v1243_v60 = vadd.f32 %v1242_v19, %v1215_v62  ;;  %v939_v58 = vunpack.c.l.b16 %v843_v35  ;;  %v940_v10 = vunpack.c.h.b16 %v843_v35  ;;  %v941_v29 = vunpack.c.l.b16 %v844_v8 }
 0x222   :  { %v942_v2 = vunpack.c.h.b16 %v844_v8  ;;  %v1189_v17 = vadd.f32 %v1188_v55, %v1161_v9  ;;  %v5356_v35 = vmul.f32 -1.442695, %v8421_v57 }
 0x223   :  { %7594 = vtanh.f32 %v1243_v60  ;;  %v955_v26 = vpack.c.b16 %v939_v58, %v939_v58  ;;  %v956_v52 = vpack.c.b16 %v940_v10, %v940_v10  ;;  %v957_v63 = vpack.c.b16 %v941_v29, %v941_v29 }
 0x224   :  { %v958_v61 = vpack.c.b16 %v942_v2, %v942_v2  ;;  %v5360_v44 = vmul.f32 -1.442695, %v1243_v60 }
 0x225   :  { %1162 = vmatmul.bf16.gmra.mxu0 %v955_v26  ;;  %1190 = vmatmul.bf16.gmra.mxu1 %v956_v52 }
 0x226   :  { %v1216_v27 = vpop.f32.mrf.mxu2  ;;  %1218 = vmatmul.bf16.gmra.mxu2 %v957_v63  ;;  %5355 = vmatmul.msk.bf16.gmra.mxu3 %vm184_vm0, %v958_v61 }
 0x227   :  { %v1217_v24 = vadd.f32 %v1216_v27, %v1189_v17  ;;  %1405 = vrot.lane.b32.xlu1 %v7593_v59, %s11259_s2 }
 0x229   :  { %v7595_v23 = vpop.eup %7594  ;;  %v1245_v31 = vadd.f32 %v1244_v25, %v1217_v24 }
 0x22a   :  { %1413 = vrot.lane.b32.xlu2 %v7595_v23, %s11259_s2 }
 0x22b   :  { %7596 = vtanh.f32 %v1245_v31  ;;  %v5361_v2 = vmul.f32 -1.442695, %v1245_v31 }
 0x22c   :  { %7598 = vpow2.f32 %v5357_v36 }
 0x231   :  { %v7597_v34 = vpop.eup %7596 }
 0x232   :  { %1415 = vrot.lane.b32.xlu0 %v7597_v34, %s11259_s2  ;;  %v7599_v37 = vpop.eup %7598 }
 0x233   :  { %v1273_v40 = vadd.f32 1.0, %v7599_v37 }
 0x235   :  { %7600 = vrcp.f32 %v1273_v40  ;;  %v1305_v51 = vand.u32 2147483648, %v1273_v40  ;;  %vm1299_vm14 = vweird.f32 %v1273_v40  ;;  %v1303_v53 = vand.u32 2147483647, %v1273_v40 }
 0x236   :  { %7602 = vpow2.f32 %v5360_v44 }
 0x237   :  { %7604 = vpow2.f32 %v5358_v47  ;;  %v1306_v20 = vor.u32 1.1754944e-38, %v1305_v51  ;;  %vm1304_vm1 = vcmp.eq.f32.partialorder %v1303_v53, 8.507059e+37 }
 0x238   :  { %7606 = vpow2.f32 %v5359_v21 }
 0x23b   :  { %v7601_v41 = vpop.eup %7600 }
 0x23c   :  { %v1295_v42 = vmul.f32 %v7601_v41, %v1273_v40  ;;  %v7603_v46 = vpop.eup %7602  ;;  %vm1300_vm13 = vweird.f32 %v7601_v41 }
 0x23d   :  { %v1276_v56 = vadd.f32 1.0, %v7603_v46  ;;  %vm1301_vm15 = vmor %vm1299_vm14, %vm1300_vm13  ;;  %v7605_v3 = vpop.eup %7604 }
 0x23e   :  { %v1296_v45 = vsub.f32 1.0, %v1295_v42  ;;  %v1274_v19 = vadd.f32 1.0, %v7605_v3  ;;  %v7607_v38 = vpop.eup %7606 }
 0x23f   :  { %7608 = vrcp.f32 %v1276_v56  ;;  %v1275_v9 = vadd.f32 1.0, %v7607_v38  ;;  %v1350_v27 = vand.u32 2147483648, %v1276_v56  ;;  %vm1344_vm8 = vweird.f32 %v1276_v56 }
 0x240   :  { %v1297_v49 = vmul.f32 %v7601_v41, %v1296_v45  ;;  %7610 = vrcp.f32 %v1274_v19  ;;  %v1348_v24 = vand.u32 2147483647, %v1276_v56  ;;  %v1320_v40 = vand.u32 2147483648, %v1274_v19 }
 0x241   :  { %7612 = vpow2.f32 %v5356_v35  ;;  %v1351_v37 = vor.u32 1.1754944e-38, %v1350_v27  ;;  %vm1314_vm13 = vweird.f32 %v1274_v19 }
 0x242   :  { %v1298_v50 = vadd.f32 %v7601_v41, %v1297_v49  ;;  %7614 = vrcp.f32 %v1275_v9  ;;  %vm1349_vm11 = vcmp.eq.f32.partialorder %v1348_v24, 8.507059e+37 }
 0x243   :  { %7616 = vpow2.f32 %v5361_v2 }
 0x244   :  { %v1302_v12 = vsel %vm1301_vm15, %v7601_v41, %v1298_v50  ;;  %v1318_v41 = vand.u32 2147483647, %v1274_v19  ;;  %v1321_v50 = vor.u32 1.1754944e-38, %v1320_v40 }
 0x245   :  { %v8433_v54 = vsel %vm1304_vm1, %v1306_v20, %v1302_v12  ;;  %v7609_v8 = vpop.eup %7608  ;;  %v1335_v12 = vand.u32 2147483648, %v1275_v9 }
 0x246   :  { %v1340_v60 = vmul.f32 %v7609_v8, %v1276_v56  ;;  %v7611_v58 = vpop.eup %7610  ;;  %vm1345_vm4 = vweird.f32 %v7609_v8  ;;  %vm1319_vm15 = vcmp.eq.f32.partialorder %v1318_v41, 8.507059e+37 }
 0x247   :  { %v7613_v10 = vpop.eup %7612  ;;  %v1310_v29 = vmul.f32 %v7611_v58, %v1274_v19  ;;  %vm1346_vm9 = vmor %vm1344_vm8, %vm1345_vm4  ;;  %vm1315_vm10 = vweird.f32 %v7611_v58  ;;  %vm1329_vm4 = vweird.f32 %v1275_v9  ;;  %v1333_v19 = vand.u32 2147483647, %v1275_v9 }
 0x248   :  { %v1341_v55 = vsub.f32 1.0, %v1340_v60  ;;  %v8438_v26 = vadd.f32 1.0, %v7613_v10  ;;  %v7615_v61 = vpop.eup %7614  ;;  %vm1316_vm14 = vmor %vm1314_vm13, %vm1315_vm10  ;;  %v1336_v35 = vor.u32 1.1754944e-38, %v1335_v12 }
 0x249   :  { %v1311_v63 = vsub.f32 1.0, %v1310_v29  ;;  %v1325_v59 = vmul.f32 %v7615_v61, %v1275_v9  ;;  %v7617_v25 = vpop.eup %7616  ;;  %vm1330_vm1 = vweird.f32 %v7615_v61 }
 0x24a   :  { %v1342_v52 = vmul.f32 %v7609_v8, %v1341_v55  ;;  %7618 = vrcp.f32 %v8438_v26  ;;  %v1277_v42 = vadd.f32 1.0, %v7617_v25  ;;  %vm1331_vm8 = vmor %vm1329_vm4, %vm1330_vm1  ;;  %v1290_v29 = vand.u32 2147483648, %v8438_v26 }
 0x24b   :  { %v1312_v17 = vmul.f32 %v7611_v58, %v1311_v63  ;;  %v1326_v31 = vsub.f32 1.0, %v1325_v59  ;;  %v1288_v9 = vand.u32 2147483647, %v8438_v26 }
 0x24c   :  { %v1343_v57 = vadd.f32 %v7609_v8, %v1342_v52  ;;  %7620 = vrcp.f32 %v1277_v42  ;;  %v1291_v63 = vor.u32 1.1754944e-38, %v1290_v29  ;;  %v1365_v24 = vand.u32 2147483648, %v1277_v42 }
 0x24d   :  { %v1313_v34 = vadd.f32 %v7611_v58, %v1312_v17  ;;  %v1327_v46 = vmul.f32 %v7615_v61, %v1326_v31  ;;  %vm1359_vm1 = vweird.f32 %v1277_v42  ;;  %v1363_v25 = vand.u32 2147483647, %v1277_v42 }
 0x24e   :  { %v1347_v23 = vsel %vm1346_vm9, %v7609_v8, %v1343_v57  ;;  %vm1334_vm9 = vcmp.eq.f32.partialorder %v1333_v19, 8.507059e+37  ;;  %v1366_v31 = vor.u32 1.1754944e-38, %v1365_v24 }
 0x24f   :  { %v8441_v44 = vsel %vm1349_vm11, %v1351_v37, %v1347_v23  ;;  %v1317_v49 = vsel %vm1316_vm14, %v7611_v58, %v1313_v34  ;;  %v1328_v3 = vadd.f32 %v7615_v61, %v1327_v46  ;;  %vm1284_vm11 = vweird.f32 %v8438_v26 }
 0x250   :  { %v7619_v36 = vpop.eup %7618  ;;  %v8446_v53 = vsel %vm1319_vm15, %v1321_v50, %v1317_v49  ;;  %vm1289_vm14 = vcmp.eq.f32.partialorder %v1288_v9, 8.507059e+37 }
 0x251   :  { %v1280_v51 = vmul.f32 %v7619_v36, %v8438_v26  ;;  %vm1285_vm10 = vweird.f32 %v7619_v36 }
 0x252   :  { %vm1286_vm13 = vmor %vm1284_vm11, %vm1285_vm10 }
 0x253   :  { %v1281_v20 = vsub.f32 1.0, %v1280_v51 }
 0x255   :  { %v1282_v38 = vmul.f32 %v7619_v36, %v1281_v20 }
 0x257   :  { %v1283_v55 = vadd.f32 %v7619_v36, %v1282_v38 }
 0x259   :  { %v1287_v52 = vsel %vm1286_vm13, %v7619_v36, %v1283_v55  ;;  %v1393_v55 = vmul.f32 %v8446_v53, %v8115_v15 }
 0x25a   :  { %v8457_v57 = vsel %vm1289_vm14, %v1291_v63, %v1287_v52  ;;  %vm1725_vm14 = vcmask 519168  }
 0x25b   :  { %1726 = vst.msk [vmem:[#allocation3] sm:$0xf] %vm1725_vm14, %v7867_v13 }
 0x25c   :  { %1727 = vst.msk [vmem:[#allocation3 + $0xd] sm:$0xf] %vm1725_vm14, %v7867_v13 }
 0x268   :  { %v1408_v22 = vpop.permute.xlu2 %1407 }
 0x269   :  { %v1427_v62 = vmul.f32 %v1408_v22, %v8433_v54  ;;  %v1332_v22 = vsel %vm1331_vm8, %v7615_v61, %v1328_v3  ;;  %vm1364_vm8 = vcmp.eq.f32.partialorder %v1363_v25, 8.507059e+37 }
 0x26a   :  { %v8450_v60 = vsel %vm1334_vm9, %v1336_v35, %v1332_v22  ;;  %v1395_v22 = vmul.f32 %v8441_v44, %v8137_v18 }
 0x26b   :  { %1442 = vrot.lane.b32.xlu2 %v1427_v62, %s7871_s29  ;;  %v7621_v62 = vpop.eup %7620  ;;  %v1394_v52 = vmul.f32 %v8450_v60, %v8126_v16 }
 0x26c   :  { %v1355_v10 = vmul.f32 %v7621_v62, %v1277_v42  ;;  %vm1360_vm15 = vweird.f32 %v7621_v62 }
 0x26d   :  { %vm1361_vm4 = vmor %vm1359_vm1, %vm1360_vm15  ;;  %vm1551_vm15 = vcmask 516096   ;;  %vm1701_vm1 = vcmask 1042432  }
 0x26e   :  { %v1356_v2 = vsub.f32 1.0, %v1355_v10 }
 0x270   :  { %v1357_v17 = vmul.f32 %v7621_v62, %v1356_v2 }
 0x272   :  { %v1358_v27 = vadd.f32 %v7621_v62, %v1357_v17 }
 0x274   :  { %v1362_v26 = vsel %vm1361_vm4, %v7621_v62, %v1358_v27  ;;  %vm1705_vm4 = vcmask 1045504  }
 0x275   :  { %v8462_v37 = vsel %vm1364_vm8, %v1366_v31, %v1362_v26  ;;  %v1391_v26 = vmul.f32 %v8457_v57, %v8079_v11 }
 0x276   :  { %v1396_v11 = vmul.f32 %v8462_v37, %v8153_v30  ;;  %v8518_v30 = vld [vmem:[%s11267_s5] sm:$0xff] }
 0x284   :  { %v1414_v45 = vpop.permute.xlu2 %1413 }
 0x285   :  { %v1430_v47 = vmul.f32 %v1414_v45, %v8441_v44 }
 0x287   :  { %1448 = vrot.lane.b32.xlu2 %v1430_v47, %s7871_s29 }
 0x288   :  { %v1410_v21 = vpop.permute.xlu0 %1409 }
 0x289   :  { %v1428_v56 = vmul.f32 %v1410_v21, %v8446_v53 }
 0x28b   :  { %1444 = vrot.lane.b32.xlu0 %v1428_v56, %s7871_s29 }
 0x290   :  { %v1412_v8 = vpop.permute.xlu1 %1411 }
 0x291   :  { %v1429_v58 = vmul.f32 %v1412_v8, %v8450_v60 }
 0x293   :  { %1446 = vrot.lane.b32.xlu1 %v1429_v58, %s7871_s29 }
 0x299   :  { %v1406_v61 = vpop.permute.xlu1 %1405 }
 0x29a   :  { %v1426_v59 = vmul.f32 %v1406_v61, %v8457_v57 }
 0x29c   :  { %1440 = vrot.lane.b32.xlu1 %v1426_v59, %s7871_s29 }
 0x2a2   :  { %v1163_v23 = vpop.f32.mrf.mxu0  ;;  %v1191_v34 = vpop.f32.mrf.mxu1 }
 0x2a3   :  { %v1164_v36 = vadd.f32 %v8384_v39, %v1163_v23  ;;  %v1392_v39 = vmul.f32 %v8433_v54, %v8100_v14 }
 0x2a4   :  { %v1416_v40 = vpop.permute.xlu0 %1415 }
 0x2a5   :  { %v1431_v41 = vmul.f32 %v1416_v40, %v8462_v37  ;;  %v1192_v45 = vadd.f32 %v1191_v34, %v1164_v36 }
 0x2a7   :  { %1450 = vrot.lane.b32.xlu0 %v1431_v41, %s7871_s29 }
 0x2a9   :  { %v1219_v47 = vpop.f32.mrf.mxu2  ;;  %v1247_v49 = vpop.f32.mrf.mxu3 }
 0x2aa   :  { %v1220_v46 = vadd.f32 %v1219_v47, %v1192_v45  ;;  %v1165_v42 = vpop.f32.mrf.mxu0  ;;  %v1193_v50 = vpop.f32.mrf.mxu1 }
 0x2ab   :  { %v8510_v42 = vld [vmem:[%s11267_s5 + $0x8] sm:$0x1] }
 0x2ac   :  { %v1248_v51 = vadd.f32 %v1247_v49, %v1220_v46 }
 0x2ae   :  { %7622 = vtanh.f32 %v1248_v51  ;;  %v5362_v35 = vmul.f32 -1.442695, %v1248_v51 }
 0x2b1   :  { %v1221_v21 = vpop.f32.mrf.mxu2  ;;  %v1249_v56 = vpop.f32.mrf.mxu3 }
 0x2b4   :  { %v7623_v3 = vpop.eup %7622 }
 0x2b5   :  { %1417 = vrot.lane.b32.xlu2 %v7623_v3, %s11259_s2 }
 0x2c5   :  { %v1443_v12 = vpop.permute.xlu2 %1442 }
 0x2c6   :  { %v8469_v20 = vadd.f32 %v1443_v12, %v1392_v39 }
 0x2c8   :  { %7624 = vtanh.f32 %v8469_v20 }
 0x2ce   :  { %v7625_v19 = vpop.eup %7624 }
 0x2cf   :  { %1484 = vrot.lane.b32.xlu0 %v7625_v19, %s11259_s2 }
 0x2e1   :  { %v1449_v62 = vpop.permute.xlu2 %1448 }
 0x2e2   :  { %v8475_v38 = vadd.f32 %v1449_v62, %v1395_v22 }
 0x2e4   :  { %7626 = vtanh.f32 %v8475_v38 }
 0x2e5   :  { %7628 = vpow2.f32 %v5362_v35 }
 0x2ea   :  { %v7627_v8 = vpop.eup %7626 }
 0x2eb   :  { %1490 = vrot.lane.b32.xlu0 %v7627_v8, %s11259_s2  ;;  %v7629_v14 = vpop.eup %7628 }
 0x2ec   :  { %v1278_v58 = vadd.f32 1.0, %v7629_v14 }
 0x2ee   :  { %7630 = vrcp.f32 %v1278_v58  ;;  %v1380_v27 = vand.u32 2147483648, %v1278_v58  ;;  %vm1374_vm10 = vweird.f32 %v1278_v58  ;;  %v1378_v24 = vand.u32 2147483647, %v1278_v58 }
 0x2f0   :  { %v1381_v16 = vor.u32 1.1754944e-38, %v1380_v27  ;;  %vm1379_vm13 = vcmp.eq.f32.partialorder %v1378_v24, 8.507059e+37 }
 0x2f4   :  { %v7631_v10 = vpop.eup %7630 }
 0x2f5   :  { %v1370_v29 = vmul.f32 %v7631_v10, %v1278_v58  ;;  %vm1375_vm9 = vweird.f32 %v7631_v10 }
 0x2f6   :  { %vm1376_vm11 = vmor %vm1374_vm10, %vm1375_vm9 }
 0x2f7   :  { %v1371_v2 = vsub.f32 1.0, %v1370_v29 }
 0x2f9   :  { %v1372_v63 = vmul.f32 %v7631_v10, %v1371_v2 }
 0x2fb   :  { %v1373_v15 = vadd.f32 %v7631_v10, %v1372_v63 }
 0x2fd   :  { %v1445_v9 = vpop.permute.xlu0 %1444  ;;  %v1377_v25 = vsel %vm1376_vm11, %v7631_v10, %v1373_v15 }
 0x2fe   :  { %v8481_v18 = vadd.f32 %v1445_v9, %v1393_v55  ;;  %v8494_v36 = vsel %vm1379_vm13, %v1381_v16, %v1377_v25 }
 0x300   :  { %7632 = vtanh.f32 %v8481_v18 }
 0x305   :  { %v1447_v61 = vpop.permute.xlu1 %1446 }
 0x306   :  { %v7633_v17 = vpop.eup %7632  ;;  %v8486_v59 = vadd.f32 %v1447_v61, %v1394_v52 }
 0x307   :  { %1486 = vrot.lane.b32.xlu1 %v7633_v17, %s11259_s2 }
 0x308   :  { %7634 = vtanh.f32 %v8486_v59 }
 0x30e   :  { %v7635_v23 = vpop.eup %7634  ;;  %v1441_v34 = vpop.permute.xlu1 %1440 }
 0x30f   :  { %v8492_v31 = vadd.f32 %v1441_v34, %v1391_v26  ;;  %v1418_v40 = vpop.permute.xlu2 %1417  ;;  %1488 = vrot.lane.b32.xlu2 %v7635_v23, %s11259_s2 }
 0x310   :  { %v1432_v41 = vmul.f32 %v1418_v40, %v8494_v36 }
 0x311   :  { %7636 = vtanh.f32 %v8492_v31 }
 0x312   :  { %1452 = vrot.lane.b32.xlu0 %v1432_v41, %s7871_s29 }
 0x317   :  { %v7637_v45 = vpop.eup %7636 }
 0x318   :  { %1482 = vrot.lane.b32.xlu2 %v7637_v45, %s11259_s2 }
 0x319   :  { %v1451_v47 = vpop.permute.xlu0 %1450 }
 0x31a   :  { %v8503_v49 = vadd.f32 %v1451_v47, %v1396_v11  ;;  %1775 = vperm.xlu0 %7500, %v8510_v42  }
 0x31c   :  { %7638 = vtanh.f32 %v8503_v49 }
 0x320   :  { %1751 = vperm.xlu2 %7499, %v8510_v42  }
 0x322   :  { %v7639_v46 = vpop.eup %7638  ;;  %7505 = vset.pattern.permute.xlu0 %v7861_v0 }
 0x323   :  { %1492 = vrot.lane.b32.xlu1 %v7639_v46, %s11259_s2 }
 0x328   :  { %7502 = vset.pattern.permute.xlu2 %v7864_v5 }
 0x329   :  { %1771 = vperm.xlu2 %7502, %v8518_v30  }
 0x32b   :  { %1747 = vperm.xlu1 %7501, %v8518_v30  }
 0x331   :  { %7504 = vset.pattern.permute.xlu2 %v7866_v7 }
 0x333   :  { %7503 = vset.pattern.permute.xlu1 %v7861_v0  ;;  %v8536_v0 = vld [vmem:[%s11268_s3] sm:$0xff] }
 0x334   :  { %1799 = vperm.xlu1 %7503, %v8510_v42   ;;  %1728 = vst.msk [vmem:[#allocation3 + $0x4] sm:$0xff] %vm755_vm2, %v8536_v0 }
 0x33b   :  { %v1745_v35 = vld [vmem:[#allocation3 + $0x9] sm:$0x1]  ;;  %v1769_v8 = vld [vmem:[#allocation3 + $0xb] sm:$0x1] }
 0x33c   :  { %7506 = vset.pattern.permute.xlu1 %v7866_v7  ;;  %v1397_v7 = vmul.f32 %v8494_v36, %v8169_v43 }
 0x341   :  { %v1485_v21 = vpop.permute.xlu0 %1484 }
 0x342   :  { %v1504_v43 = vmul.f32 %v1485_v21, %v8433_v54 }
 0x35d   :  { %v1491_v12 = vpop.permute.xlu0 %1490 }
 0x35e   :  { %v1507_v13 = vmul.f32 %v1491_v12, %v8441_v44 }
 0x369   :  { %v1489_v5 = vpop.permute.xlu2 %1488 }
 0x36a   :  { %v1506_v39 = vmul.f32 %v1489_v5, %v8450_v60 }
 0x372   :  { %v1483_v50 = vpop.permute.xlu2 %1482 }
 0x373   :  { %v1503_v51 = vmul.f32 %v1483_v50, %v8457_v57  ;;  %v8665_v50 = vld [vmem:[%s11268_s3 + $0x8] sm:$0x1] }
 0x374   :  { %1729 = vst.msk [vmem:[#allocation3 + $0xc] sm:$0x1] %vm1551_vm15, %v8665_v50 }
 0x375   :  { %1517 = vrot.lane.b32.xlu0 %v1503_v51, %s7871_s29 }
 0x379   :  { %v1487_v56 = vpop.permute.xlu1 %1486 }
 0x37a   :  { %v1505_v3 = vmul.f32 %v1487_v56, %v8446_v53  ;;  %v1752_v54 = vpop.permute.xlu2 %1751 }
 0x37c   :  { %1521 = vrot.lane.b32.xlu2 %v1505_v3, %s7871_s29 }
 0x37d   :  { %1523 = vrot.lane.b32.xlu0 %v1506_v39, %s7871_s29 }
 0x383   :  { %v8568_v44 = vpop.permute.xlu2 %1771 }
 0x384   :  { %v1453_v57 = vpop.permute.xlu0 %1452 }
 0x385   :  { %v8542_v53 = vadd.f32 %v1453_v57, %v1397_v7  ;;  %1795 = vperm.xlu0 %7505, %v8518_v30   ;;  %v1768_v7 = vld [vmem:[#allocation3 + $0x3] sm:$0xff] }
 0x386   :  { %v1744_v57 = vld [vmem:[#allocation3 + $0x1] sm:$0xff] }
 0x387   :  { %7640 = vtanh.f32 %v8542_v53 }
 0x38d   :  { %v7641_v60 = vpop.eup %7640  ;;  %7507 = vset.pattern.permute.xlu0 %v7870_v33 }
 0x38e   :  { %1494 = vrot.lane.b32.xlu1 %v7641_v60, %s11259_s2  ;;  %1739 = vperm.xlu0 %7507, %v8510_v42   ;;  %v1817_v60 = vld [vmem:[#allocation3 + $0xf] sm:$0x1] }
 0x395   :  { %v1493_v19 = vpop.permute.xlu1 %1492 }
 0x396   :  { %v1508_v22 = vmul.f32 %v1493_v19, %v8462_v37  ;;  %1519 = vrot.lane.b32.xlu1 %v1504_v43, %s7871_s29  ;;  %7567 = vset.pattern.permute.xlu0 %v7868_v28 }
 0x398   :  { %1527 = vrot.lane.b32.xlu2 %v1508_v22, %s7871_s29  ;;  %v5601_v22 = vld [vmem:[%s11230_s10 + $0x170] sm:$0xf] }
 0x39d   :  { %v8582_v55 = vpop.permute.xlu1 %1747 }
 0x39e   :  { %1525 = vrot.lane.b32.xlu1 %v1507_v13, %s7871_s29  ;;  %v6996_v13 = vld [vmem:[%s11230_s10 + $0x174] sm:$0xf0] }
 0x3a0   :  { %1823 = vperm.xlu2 %7504, %v8510_v42  }
 0x3a6   :  { %1819 = vperm.xlu1 %7506, %v8518_v30   ;;  %v8596_v52 = vpop.permute.xlu1 %1799 }
 0x3a8   :  { %7550 = vset.pattern.permute.xlu2 %v7862_v1 }
 0x3ae   :  { %7508 = vset.pattern.permute.xlu1 %v7862_v1  ;;  %v1776_v1 = vpop.permute.xlu0 %1775 }
 0x3af   :  { %1763 = vperm.xlu1 %7508, %v8510_v42   ;;  %v1779_v14 = vmul.f32 %v1776_v1, %v1769_v8  ;;  %v6994_v1 = vld [vmem:[%s11230_s10 + $0x164] sm:$0xf0]  ;;  %v1754_v8 = vmul.f32 %v8582_v55, %v1744_v57  ;;  %v6992_v55 = vld [vmem:[%s11230_s10 + $0x154] sm:$0xf0] }
 0x3b7   :  { %7509 = vset.pattern.permute.xlu1 %v7870_v33  ;;  %v1755_v33 = vmul.f32 %v1752_v54, %v1745_v35  ;;  %v5593_v54 = vld [vmem:[%s11230_s10 + $0x160] sm:$0xf]  ;;  %v1778_v35 = vmul.f32 %v8568_v44, %v1768_v7  ;;  %v5585_v44 = vld [vmem:[%s11230_s10 + $0x150] sm:$0xf] }
 0x3b8   :  { %1734 = vperm.xlu1 %7509, %v8518_v30  }
 0x3b9   :  { %v7551_v58 = vpack.i.bf16 %v1779_v14, %v1755_v33  ;;  %v5594_v14 = vor.u32 %v6994_v1, %v5593_v54  ;;  %v5449_v54 = vld [vmem:[%s11230_s10 + $0x40] sm:$0xf] }
 0x3c0   :  { %7568 = vset.pattern.permute.xlu1 %v7869_v32 }
 0x3d6   :  { %v1522_v37 = vpop.permute.xlu2 %1521 }
 0x3d7   :  { %v1540_v62 = vsel %vm184_vm0, %v1522_v37, %v8481_v18  ;;  %v1793_v37 = vld [vmem:[#allocation3 + $0xd] sm:$0x1] }
 0x3d8   :  { %1547 = vst.msk [vmem:[%s11239_s19 + $0x10] sm:$0xff] %vm755_vm2, %v1540_v62  ;;  %v5602_v62 = vor.u32 %v6996_v13, %v5601_v22  ;;  %v6976_v22 = vld [vmem:[%s11230_s10 + $0xd4] sm:$0xf0] }
 0x3da   :  { %2704 = vmatpush.bf16.msrb.mxu1 %v5602_v62  ;;  %v5513_v62 = vld [vmem:[%s11230_s10 + $0xc0] sm:$0xf] }
 0x3de   :  { %2705 = vmatpush.bf16.msrb.mxu1 %v5594_v14 }
 0x3df   :  { %v8634_v34 = vld [vmem:[%s11239_s19 + $0x10] ss:$2 sm:$0x7] }
 0x3e7   :  { %v1518_v10 = vpop.permute.xlu0 %1517 }
 0x3e8   :  { %v1538_v32 = vsel %vm184_vm0, %v1518_v10, %v8492_v31  ;;  %v7561_v10 = vpack.i.bf16 %v1778_v35, %v1754_v8  ;;  %v6974_v35 = vld [vmem:[%s11230_s10 + $0xc4] sm:$0xf0] }
 0x3e9   :  { %1545 = vst.msk [vmem:[%s11239_s19] sm:$0xff] %vm755_vm2, %v1538_v32 }
 0x3ef   :  { %v1524_v29 = vpop.permute.xlu0 %1523 }
 0x3f0   :  { %v1541_v9 = vsel %vm184_vm0, %v1524_v29, %v8486_v59  ;;  %v5363_v27 = vld [vmem:[%s11239_s19 + $0x1] ss:$2 sm:$0x7]  ;;  %v1816_v29 = vld [vmem:[#allocation3 + $0x7] sm:$0xff] }
 0x3f1   :  { %1548 = vst.msk [vmem:[%s11239_s19 + $0x18] sm:$0xff] %vm755_vm2, %v1541_v9 }
 0x3f2   :  { %v1528_v18 = vpop.permute.xlu2 %1527 }
 0x3f3   :  { %v1543_v2 = vsel %vm184_vm0, %v1528_v18, %v8503_v49  ;;  %v1792_v18 = vld [vmem:[#allocation3 + $0x5] sm:$0xff] }
 0x3f4   :  { %1550 = vst.msk [vmem:[%s11239_s19 + $0x28] sm:$0xff] %vm755_vm2, %v1543_v2 }
 0x3f7   :  { %v1796_v2 = vpop.permute.xlu0 %1795 }
 0x3f8   :  { %v5373_v41 = vld [vmem:[%s11239_s19 + $0x17] ss:$2 sm:$0x7] }
 0x3f9   :  { %v5371_v46 = vld [vmem:[%s11239_s19 + $0x15] ss:$2 sm:$0x7] }
 0x3fa   :  { %v1824_v43 = vpop.permute.xlu2 %1823 }
 0x3fb   :  { %v5381_v3 = vld [vmem:[%s11239_s19 + $0x2b] ss:$2 sm:$0x7]  ;;  %v5380_v12 = vld [vmem:[%s11239_s19 + $0x2a] ss:$2 sm:$0x7]  ;;  %v1827_v33 = vmul.f32 %v1824_v43, %v1817_v60 }
 0x3fc   :  { %v5457_v60 = vld [vmem:[%s11230_s10 + $0x50] sm:$0xf]  ;;  %v6960_v43 = vld [vmem:[%s11230_s10 + $0x54] sm:$0xf0] }
 0x400   :  { %v1495_v63 = vpop.permute.xlu1 %1494 }
 0x401   :  { %v1509_v61 = vmul.f32 %v1495_v63, %v8494_v36  ;;  %v5364_v36 = vld [vmem:[%s11239_s19 + $0x2] ss:$2 sm:$0x7] }
 0x403   :  { %1529 = vrot.lane.b32.xlu2 %v1509_v61, %s7871_s29  ;;  %v5577_v61 = vld [vmem:[%s11230_s10 + $0x140] sm:$0xf] }
 0x408   :  { %v1520_v17 = vpop.permute.xlu1 %1519 }
 0x409   :  { %v1539_v59 = vsel %vm184_vm0, %v1520_v17, %v8469_v20  ;;  %v6990_v17 = vld [vmem:[%s11230_s10 + $0x144] sm:$0xf0] }
 0x40a   :  { %1546 = vst.msk [vmem:[%s11239_s19 + $0x8] sm:$0xff] %vm755_vm2, %v1539_v59  ;;  %v5578_v59 = vor.u32 %v6990_v17, %v5577_v61  ;;  %v6954_v61 = vld [vmem:[%s11230_s10 + $0x24] sm:$0xf0] }
 0x410   :  { %v1526_v15 = vpop.permute.xlu1 %1525 }
 0x411   :  { %v1542_v24 = vsel %vm184_vm0, %v1526_v15, %v8475_v38  ;;  %v5367_v25 = vld [vmem:[%s11239_s19 + $0x9] ss:$2 sm:$0x7]  ;;  %v5369_v16 = vld [vmem:[%s11239_s19 + $0xf] ss:$2 sm:$0x7] }
 0x412   :  { %v5365_v20 = vld [vmem:[%s11239_s19 + $0x7] ss:$2 sm:$0x7]  ;;  %1549 = vst.msk [vmem:[%s11239_s19 + $0x20] sm:$0xff] %vm755_vm2, %v1542_v24  ;;  %v7510_v26 = vpack.i.bf16 %v5367_v25, %v5363_v27  ;;  %v7525_v11 = vpack.i.bf16 %v5373_v41, %v5369_v16  ;;  %v5569_v27 = vld [vmem:[%s11230_s10 + $0x130] sm:$0xf] }
 0x413   :  { %v7520_v23 = vpack.i.bf16 %v5369_v16, %v5365_v20  ;;  %v8629_v38 = vld [vmem:[%s11239_s19 + $0xe] ss:$2 sm:$0x7]  ;;  %v6988_v24 = vld [vmem:[%s11230_s10 + $0x134] sm:$0xf0] }
 0x414   :  { %7511 = vrot.lane.b32.xlu0 %v7510_v26, %s7871_s29  ;;  %v7515_v45 = vpack.i.bf16 %v8629_v38, %v5364_v36  ;;  %v5570_v25 = vor.u32 %v6988_v24, %v5569_v27  ;;  %v5561_v20 = vld [vmem:[%s11230_s10 + $0x120] sm:$0xf]  ;;  %v5553_v26 = vld [vmem:[%s11230_s10 + $0x110] sm:$0xf]  ;;  %v6984_v16 = vld [vmem:[%s11230_s10 + $0x114] sm:$0xf0] }
 0x415   :  { %7521 = vrot.lane.b32.xlu2 %v7520_v23, %s7872_s6  ;;  %v5545_v23 = vld [vmem:[%s11230_s10 + $0x100] sm:$0xf]  ;;  %v5554_v36 = vor.u32 %v6984_v16, %v5553_v26  ;;  %v5473_v41 = vld [vmem:[%s11230_s10 + $0x70] sm:$0xf]  ;;  %v6970_v27 = vld [vmem:[%s11230_s10 + $0xa4] sm:$0xf0] }
 0x416   :  { %v5665_v24 = vld [vmem:[%s11230_s10 + $0x1f0] sm:$0xf] }
 0x417   :  { %v5425_v16 = vld [vmem:[%s11230_s10 + $0x10] sm:$0xf] }
 0x418   :  { %v1820_v9 = vpop.permute.xlu1 %1819 }
 0x419   :  { %v8639_v31 = vld [vmem:[%s11239_s19 + $0x1c] ss:$2 sm:$0x7]  ;;  %v5375_v47 = vld [vmem:[%s11239_s19 + $0x1d] ss:$2 sm:$0x7]  ;;  %v1826_v63 = vmul.f32 %v1820_v9, %v1816_v29 }
 0x41a   :  { %v7530_v40 = vpack.i.bf16 %v8639_v31, %v8634_v34  ;;  %v5379_v49 = vld [vmem:[%s11239_s19 + $0x25] ss:$2 sm:$0x7]  ;;  %v7535_v5 = vpack.i.bf16 %v5375_v47, %v5371_v46  ;;  %v8678_v56 = vld [vmem:[%s11239_s19 + $0x1e] ss:$2 sm:$0x7] }
 0x41b   :  { %v7540_v51 = vpack.i.bf16 %v5379_v49, %v5375_v47  ;;  %v5377_v21 = vld [vmem:[%s11239_s19 + $0x23] ss:$2 sm:$0x7]  ;;  %v7545_v19 = vpack.i.bf16 %v5380_v12, %v8678_v56  ;;  %v5537_v47 = vld [vmem:[%s11230_s10 + $0xf0] sm:$0xf]  ;;  %v1688_v8 = vrot.slane %v8678_v56, 5 }
 0x41c   :  { %7531 = vrot.lane.b32.xlu1 %v7530_v40, %s11259_s2  ;;  %7516 = vrot.lane.b32.xlu0 %v7515_v45, %s11259_s2  ;;  %v7556_v39 = vpack.i.bf16 %v5381_v3, %v5377_v21  ;;  %v6982_v40 = vld [vmem:[%s11230_s10 + $0x104] sm:$0xf0]  ;;  %v6964_v45 = vld [vmem:[%s11230_s10 + $0x74] sm:$0xf0] }
 0x41d   :  { %7526 = vrot.lane.b32.xlu2 %v7525_v11, %s7871_s29  ;;  %v5474_v11 = vor.u32 %v6964_v45, %v5473_v41  ;;  %v6980_v49 = vld [vmem:[%s11230_s10 + $0xf4] sm:$0xf0]  ;;  %v5529_v21 = vld [vmem:[%s11230_s10 + $0xe0] sm:$0xf]  ;;  %v1704_v56 = vsel %vm1701_vm1, %v8634_v34, %v1688_v8  ;;  %v7010_v45 = vld [vmem:[%s11230_s10 + $0x1e4] sm:$0xf0] }
 0x41e   :  { %v5538_v46 = vor.u32 %v6980_v49, %v5537_v47  ;;  %v6972_v29 = vld [vmem:[%s11230_s10 + $0xb4] sm:$0xf0]  ;;  %v5433_v34 = vld [vmem:[%s11230_s10 + $0x20] sm:$0xf]  ;;  %v6950_v49 = vld [vmem:[%s11230_s10 + $0x4] sm:$0xf0] }
 0x41f   :  { %2676 = vmatpush.bf16.msrb.mxu3 %v5474_v11  ;;  %v5417_v47 = vld [vmem:[%s11230_s10] sm:$0xf] }
 0x420   :  { %2690 = vmatpush.bf16.msrb.mxu0 %v5538_v46  ;;  %v5481_v46 = vld [vmem:[%s11230_s10 + $0x80] sm:$0xf] }
 0x424   :  { %7536 = vrot.lane.b32.xlu1 %v7535_v5, %s7872_s6  ;;  %7552 = vrot.lane.b32.xlu0 %v7551_v58, %s11259_s2  ;;  %v1803_v58 = vmul.f32 %v8596_v52, %v1793_v37  ;;  %v5586_v52 = vor.u32 %v6992_v55, %v5585_v44  ;;  %v5465_v5 = vld [vmem:[%s11230_s10 + $0x60] sm:$0xf]  ;;  %v6958_v37 = vld [vmem:[%s11230_s10 + $0x44] sm:$0xf0] }
 0x425   :  { %7541 = vrot.lane.b32.xlu2 %v7540_v51, %s7871_s29  ;;  %v6962_v51 = vld [vmem:[%s11230_s10 + $0x64] sm:$0xf0]  ;;  %v5450_v1 = vor.u32 %v6958_v37, %v5449_v54  ;;  %v5505_v55 = vld [vmem:[%s11230_s10 + $0xb0] sm:$0xf] }
 0x426   :  { %v7570_v32 = vpack.i.bf16 %v1827_v33, %v1803_v58  ;;  %2706 = vmatpush.bf16.msrb.mxu1 %v5586_v52  ;;  %v5466_v3 = vor.u32 %v6962_v51, %v5465_v5  ;;  %v5514_v33 = vor.u32 %v6974_v35, %v5513_v62  ;;  %v5506_v52 = vor.u32 %v6972_v29, %v5505_v55  ;;  %v6966_v51 = vld [vmem:[%s11230_s10 + $0x84] sm:$0xf0]  ;;  %v5641_v62 = vld [vmem:[%s11230_s10 + $0x1c0] sm:$0xf]  ;;  %v5633_v55 = vld [vmem:[%s11230_s10 + $0x1b0] sm:$0xf] }
 0x427   :  { %v5418_v5 = vor.u32 %v6950_v49, %v5417_v47  ;;  %v5721_v35 = vld [vmem:[%s11230_s10 + $0x260] sm:$0xf]  ;;  %v7004_v29 = vld [vmem:[%s11230_s10 + $0x1b4] sm:$0xf0]  ;;  %v5761_v47 = vld [vmem:[%s11230_s10 + $0x2b0] sm:$0xf] }
 0x428   :  { %2677 = vmatpush.bf16.msrb.mxu3 %v5466_v3  ;;  %v7008_v3 = vld [vmem:[%s11230_s10 + $0x1d4] sm:$0xf0] }
 0x429   :  { %v7036_v49 = vld [vmem:[%s11230_s10 + $0x2b4] sm:$0xf0] }
 0x42a   :  { %2707 = vmatpush.bf16.msrb.mxu1 %v5578_v59  ;;  %v5434_v59 = vor.u32 %v6954_v61, %v5433_v34 }
 0x42c   :  { %1831 = vperm.xlu0 %7567, %v8518_v30   ;;  %7557 = vrot.lane.b32.xlu1 %v7556_v39, %s7872_s6  ;;  %v6978_v39 = vld [vmem:[%s11230_s10 + $0xe4] sm:$0xf0] }
 0x42d   :  { %7546 = vrot.lane.b32.xlu2 %v7545_v19, %s11259_s2  ;;  %v5530_v12 = vor.u32 %v6978_v39, %v5529_v21  ;;  %v5458_v19 = vor.u32 %v6960_v43, %v5457_v60  ;;  %v5649_v21 = vld [vmem:[%s11230_s10 + $0x1d0] sm:$0xf]  ;;  %v7028_v60 = vld [vmem:[%s11230_s10 + $0x274] sm:$0xf0] }
 0x42e   :  { %2708 = vmatpush.bf16.msrb.mxu1 %v5570_v25 }
 0x42f   :  { %2691 = vmatpush.bf16.msrb.mxu0 %v5530_v12  ;;  %2678 = vmatpush.bf16.msrb.mxu3 %v5458_v19  ;;  %v5482_v12 = vor.u32 %v6966_v51, %v5481_v46  ;;  %v5762_v51 = vor.u32 %v7036_v49, %v5761_v47  ;;  %v7052_v47 = vld [vmem:[%s11230_s10 + $0x334] sm:$0xf0] }
 0x430   :  { %v5372_v49 = vld [vmem:[%s11239_s19 + $0x16] ss:$2 sm:$0x7] }
 0x433   :  { %2679 = vmatpush.bf16.msrb.mxu3 %v5450_v1  ;;  %v7006_v1 = vld [vmem:[%s11230_s10 + $0x1c4] sm:$0xf0] }
 0x434   :  { %7562 = vrot.lane.b32.xlu1 %v7561_v10, %s11259_s2  ;;  %7571 = vrot.lane.b32.xlu0 %v7570_v32, %s11259_s2  ;;  %v5441_v10 = vld [vmem:[%s11230_s10 + $0x30] sm:$0xf]  ;;  %v6956_v32 = vld [vmem:[%s11230_s10 + $0x34] sm:$0xf0]  ;;  %v5642_v8 = vor.u32 %v7006_v1, %v5641_v62 }
 0x435   :  { %1759 = vperm.xlu2 %7550, %v8518_v30   ;;  %v5442_v44 = vor.u32 %v6956_v32, %v5441_v10  ;;  %v8920_v10 = vpop.permute.xlu1 %1763  ;;  %v5889_v62 = vld [vmem:[%s11230_s10 + $0x3b0] sm:$0xf]  ;;  %v7068_v1 = vld [vmem:[%s11230_s10 + $0x3b4] sm:$0xf0] }
 0x437   :  { %2680 = vmatpush.bf16.msrb.mxu3 %v5442_v44  ;;  %v8922_v44 = vpop.permute.xlu0 %1739 }
 0x43b   :  { %2681 = vmatpush.bf16.msrb.mxu3 %v5434_v59  ;;  %v7002_v59 = vld [vmem:[%s11230_s10 + $0x1a4] sm:$0xf0] }
 0x43c   :  { %1787 = vperm.xlu1 %7568, %v8510_v42  }
 0x43d   :  { %7566 = vset.pattern.permute.xlu2 %v7868_v28  ;;  %v1802_v28 = vmul.f32 %v1796_v2, %v1792_v18  ;;  %v1720_v2 = vld [vmem:[#allocation5 + $0x28] sm:$0x1] }
 0x43e   :  { %1835 = vperm.xlu2 %7566, %v8510_v42  }
 0x43f   :  { %v7575_v15 = vpack.i.bf16 %v1826_v63, %v1802_v28 }
 0x444   :  { %1783 = vperm.xlu1 %7568, %v8518_v30  }
 0x446   :  { %7569 = vset.pattern.permute.xlu2 %v7865_v6  ;;  %v6986_v6 = vld [vmem:[%s11230_s10 + $0x124] sm:$0xf0] }
 0x447   :  { %1811 = vperm.xlu2 %7569, %v8510_v42   ;;  %v5562_v42 = vor.u32 %v6986_v6, %v5561_v20  ;;  %v7012_v6 = vld [vmem:[%s11230_s10 + $0x1f4] sm:$0xf0] }
 0x449   :  { %2709 = vmatpush.bf16.msrb.mxu1 %v5562_v42  ;;  %v5666_v42 = vor.u32 %v7012_v6, %v5665_v24  ;;  %v7022_v24 = vld [vmem:[%s11230_s10 + $0x244] sm:$0xf0] }
 0x44b   :  { %2718 = vmatpush.bf16.msrb.mxu2 %v5666_v42 }
 0x44c   :  { %7576 = vrot.lane.b32.xlu1 %v7575_v15, %s11259_s2  ;;  %v5497_v15 = vld [vmem:[%s11230_s10 + $0xa0] sm:$0xf] }
 0x44d   :  { %2710 = vmatpush.bf16.msrb.mxu1 %v5554_v36  ;;  %v5498_v20 = vor.u32 %v6970_v27, %v5497_v15  ;;  %v5489_v36 = vld [vmem:[%s11230_s10 + $0x90] sm:$0xf]  ;;  %v5705_v15 = vld [vmem:[%s11230_s10 + $0x240] sm:$0xf] }
 0x44e   :  { %v5706_v6 = vor.u32 %v7022_v24, %v5705_v15  ;;  %v1757_v15 = vld [vmem:[#allocation3 + $0xa] sm:$0x1] }
 0x44f   :  { %1807 = vperm.xlu2 %7569, %v8518_v30   ;;  %v5546_v30 = vor.u32 %v6982_v40, %v5545_v23  ;;  %v5426_v23 = vor.u32 %v6952_v4, %v5425_v16  ;;  %v6968_v40 = vld [vmem:[%s11230_s10 + $0x94] sm:$0xf0]  ;;  %v5857_v16 = vld [vmem:[%s11230_s10 + $0x370] sm:$0xf] }
 0x450   :  { %v5490_v41 = vor.u32 %v6968_v40, %v5489_v36  ;;  %v7060_v4 = vld [vmem:[%s11230_s10 + $0x374] sm:$0xf0]  ;;  %v8968_v36 = vpop.permute.xlu1 %1734  ;;  %v5617_v40 = vld [vmem:[%s11230_s10 + $0x190] sm:$0xf] }
 0x451   :  { %2711 = vmatpush.bf16.msrb.mxu1 %v5546_v30  ;;  %v5657_v30 = vld [vmem:[%s11230_s10 + $0x1e0] sm:$0xf]  ;;  %2682 = vmatpush.bf16.msrb.mxu3 %v5426_v23  ;;  %v5858_v23 = vor.u32 %v7060_v4, %v5857_v16  ;;  %v7030_v4 = vld [vmem:[%s11230_s10 + $0x284] sm:$0xf0] }
 0x452   :  { %v5658_v11 = vor.u32 %v7010_v45, %v5657_v30  ;;  %v7000_v30 = vld [vmem:[%s11230_s10 + $0x194] sm:$0xf0]  ;;  %v5737_v16 = vld [vmem:[%s11230_s10 + $0x280] sm:$0xf] }
 0x453   :  { %v5618_v45 = vor.u32 %v7000_v30, %v5617_v40  ;;  %v1731_v40 = vld [vmem:[#allocation3 + $0x8] sm:$0x1] }
 0x454   :  { %2719 = vmatpush.bf16.msrb.mxu2 %v5658_v11  ;;  %v7020_v11 = vld [vmem:[%s11230_s10 + $0x234] sm:$0xf0] }
 0x455   :  { %2683 = vmatpush.bf16.msrb.mxu3 %v5418_v5  ;;  %2760 = vmatpush.bf16.msra.mxu1 %v5858_v23  ;;  %v5873_v23 = vld [vmem:[%s11230_s10 + $0x390] sm:$0xf] }
 0x45d   :  { %v1530_v7 = vpop.permute.xlu2 %1529 }
 0x45e   :  { %v1544_v57 = vsel %vm184_vm0, %v1530_v7, %v8542_v53  ;;  %v5521_v53 = vld [vmem:[%s11230_s10 + $0xd0] sm:$0xf]  ;;  %v5650_v7 = vor.u32 %v7008_v3, %v5649_v21  ;;  %v5849_v21 = vld [vmem:[%s11230_s10 + $0x360] sm:$0xf]  ;;  %v7058_v3 = vld [vmem:[%s11230_s10 + $0x364] sm:$0xf0] }
 0x45f   :  { %1552 = vst.msk [vmem:[%s11239_s19 + $0x30] sm:$0x1] %vm1551_vm15, %v1544_v57  ;;  %v5522_v13 = vor.u32 %v6976_v22, %v5521_v53  ;;  %v5729_v57 = vld [vmem:[%s11230_s10 + $0x270] sm:$0xf]  ;;  %v7044_v22 = vld [vmem:[%s11230_s10 + $0x2f4] sm:$0xf0] }
 0x460   :  { %v5730_v19 = vor.u32 %v7028_v60, %v5729_v57  ;;  %v5793_v53 = vld [vmem:[%s11230_s10 + $0x2f0] sm:$0xf]  ;;  %2720 = vmatpush.bf16.msrb.mxu2 %v5650_v7  ;;  %v5609_v7 = vld [vmem:[%s11230_s10 + $0x180] sm:$0xf]  ;;  %v6998_v57 = vld [vmem:[%s11230_s10 + $0x184] sm:$0xf0] }
 0x461   :  { %2692 = vmatpush.bf16.msrb.mxu0 %v5522_v13  ;;  %v5794_v54 = vor.u32 %v7044_v22, %v5793_v53  ;;  %v5610_v60 = vor.u32 %v6998_v57, %v5609_v7  ;;  %v5753_v53 = vld [vmem:[%s11230_s10 + $0x2a0] sm:$0xf]  ;;  %v1743_v7 = vmul.f32 %v8922_v44, %v1731_v40 }
 0x462   :  { %2732 = vmatpush.bf16.msra.mxu3 %v5730_v19  ;;  %v7018_v19 = vld [vmem:[%s11230_s10 + $0x224] sm:$0xf0]  ;;  %v5865_v57 = vld [vmem:[%s11230_s10 + $0x380] sm:$0xf] }
 0x463   :  { %v5817_v44 = vld [vmem:[%s11230_s10 + $0x320] sm:$0xf] }
 0x464   :  { %2721 = vmatpush.bf16.msrb.mxu2 %v5642_v8  ;;  %v5890_v8 = vor.u32 %v7068_v1, %v5889_v62 }
 0x465   :  { %2693 = vmatpush.bf16.msrb.mxu0 %v5514_v33  ;;  %v7026_v33 = vld [vmem:[%s11230_s10 + $0x264] sm:$0xf0] }
 0x466   :  { %v5382_v14 = vld [vmem:[%s11239_s19 + $0x2c] ss:$2 sm:$0x7]  ;;  %v5722_v32 = vor.u32 %v7026_v33, %v5721_v35 }
 0x467   :  { %v1697_v58 = vrot.slane %v5382_v14, 2  ;;  %v5785_v14 = vld [vmem:[%s11230_s10 + $0x2e0] sm:$0xf]  ;;  %v5841_v33 = vld [vmem:[%s11230_s10 + $0x350] sm:$0xf] }
 0x468   :  { %2733 = vmatpush.bf16.msra.mxu3 %v5722_v32 }
 0x469   :  { %v1710_v9 = vsel %vm184_vm0, %v1697_v58, 0.0  ;;  %v1708_v18 = vsel %vm1705_vm4, %v1704_v56, %v1697_v58  ;;  %2694 = vmatpush.bf16.msrb.mxu0 %v5506_v52  ;;  %v7042_v58 = vld [vmem:[%s11230_s10 + $0x2e4] sm:$0xf0] }
 0x46a   :  { %v1714_v63 = vpack.c.bf16 %v1710_v9, %v1710_v9  ;;  %v1709_v28 = vsel %vm184_vm0, %v1708_v18, 0.0  ;;  %v5786_v56 = vor.u32 %v7042_v58, %v5785_v14  ;;  %v5634_v9 = vor.u32 %v7004_v29, %v5633_v55  ;;  %v5713_v18 = vld [vmem:[%s11230_s10 + $0x250] sm:$0xf]  ;;  %v7056_v14 = vld [vmem:[%s11230_s10 + $0x354] sm:$0xf0] }
 0x46b   :  { %v1712_v17 = vpack.c.bf16 %v1709_v28, %v1709_v28  ;;  %v7040_v28 = vld [vmem:[%s11230_s10 + $0x2d4] sm:$0xf0]  ;;  %v5681_v58 = vld [vmem:[%s11230_s10 + $0x210] sm:$0xf]  ;;  %v5842_v32 = vor.u32 %v7056_v14, %v5841_v33 }
 0x46c   :  { %v1721_v25 = vsel %vm8373_vm7, %v1714_v63, %v1720_v2  ;;  %v7024_v2 = vld [vmem:[%s11230_s10 + $0x254] sm:$0xf0]  ;;  %v5777_v63 = vld [vmem:[%s11230_s10 + $0x2d0] sm:$0xf]  ;;  %2722 = vmatpush.bf16.msrb.mxu2 %v5634_v9  ;;  %vm9134_vm7 = vmand %vm1551_vm15, %vm172_vm6 }
 0x46d   :  { %1716 = vst [vmem:[#allocation5 + $0x8] sm:$0xf] %v1712_v17  ;;  %2695 = vmatpush.bf16.msrb.mxu0 %v5498_v20  ;;  %v5714_v52 = vor.u32 %v7024_v2, %v5713_v18  ;;  %v5778_v61 = vor.u32 %v7040_v28, %v5777_v63  ;;  %v5625_v17 = vld [vmem:[%s11230_s10 + $0x1a0] sm:$0xf]  ;;  %v7038_v20 = vld [vmem:[%s11230_s10 + $0x2c4] sm:$0xf0] }
 0x46e   :  { %1722 = vst [vmem:[#allocation5 + $0x28] sm:$0x1] %v1721_v25  ;;  %v5626_v27 = vor.u32 %v7002_v59, %v5625_v17  ;;  %v5769_v25 = vld [vmem:[%s11230_s10 + $0x2c0] sm:$0xf]  ;;  %v5745_v55 = vld [vmem:[%s11230_s10 + $0x290] sm:$0xf] }
 0x46f   :  { %v8847_v26 = vpop.permute.xlu2 %7521  ;;  %2734 = vmatpush.bf16.msra.mxu3 %v5714_v52  ;;  %v5770_v42 = vor.u32 %v7038_v20, %v5769_v25  ;;  %v7032_v29 = vld [vmem:[%s11230_s10 + $0x294] sm:$0xf0]  ;;  %v5881_v63 = vld [vmem:[%s11230_s10 + $0x3a0] sm:$0xf]  ;;  %v7066_v28 = vld [vmem:[%s11230_s10 + $0x3a4] sm:$0xf0] }
 0x470   :  { %2723 = vmatpush.bf16.msrb.mxu2 %v5626_v27  ;;  %v5746_v52 = vor.u32 %v7032_v29, %v5745_v55  ;;  %v7054_v59 = vld [vmem:[%s11230_s10 + $0x344] sm:$0xf0]  ;;  %v5882_v27 = vor.u32 %v7066_v28, %v5881_v63  ;;  %v5673_v25 = vld [vmem:[%s11230_s10 + $0x200] sm:$0xf]  ;;  %v1829_v33 = vld [vmem:[#allocation3 + $0x10] sm:$0x1] }
 0x471   :  { %2696 = vmatpush.bf16.msrb.mxu0 %v5490_v41  ;;  %v5697_v41 = vld [vmem:[%s11230_s10 + $0x230] sm:$0xf]  ;;  %v7014_v20 = vld [vmem:[%s11230_s10 + $0x204] sm:$0xf0] }
 0x472   :  { %v5698_v5 = vor.u32 %v7020_v11, %v5697_v41  ;;  %v5674_v30 = vor.u32 %v7014_v20, %v5673_v25  ;;  %v5738_v41 = vor.u32 %v7030_v4, %v5737_v16  ;;  %v5825_v11 = vld [vmem:[%s11230_s10 + $0x330] sm:$0xf]  ;;  %v1555_v28 = vld [vmem:[%s11239_s19] ss:$2 sm:$0x7] }
 0x473   :  { %2735 = vmatpush.bf16.msra.mxu3 %v5706_v6  ;;  %v5378_v4 = vld [vmem:[%s11239_s19 + $0x24] ss:$2 sm:$0x7] }
 0x474   :  { %v5393_v39 = vld [vmem:[#allocation5 + $0x8] sm:$0xf]  ;;  %2724 = vmatpush.bf16.msrb.mxu2 %v5618_v45 }
 0x475   :  { %v6946_v43 = vld [vmem:[#allocation5 + $0x24] sm:$0x10]  ;;  %2697 = vmatpush.bf16.msrb.mxu0 %v5482_v12  ;;  %v5850_v12 = vor.u32 %v7058_v3, %v5849_v21  ;;  %v7523_v21 = vunpack.i.l.bf16 %v8847_v26 }
 0x476   :  { %v8897_v13 = vor.u32 %v6946_v43, %v5393_v39  ;;  %v5689_v43 = vld [vmem:[%s11230_s10 + $0x220] sm:$0xf] }
 0x477   :  { %v8899_v37 = vpop.permute.xlu2 %7526  ;;  %2736 = vmatpush.bf16.msra.mxu3 %v5698_v5  ;;  %2761 = vmatpush.bf16.msra.mxu1 %v5850_v12  ;;  %v5690_v22 = vor.u32 %v7018_v19, %v5689_v43  ;;  %v1767_v5 = vmul.f32 %v8920_v10, %v1757_v15  ;;  %v7048_v15 = vld [vmem:[%s11230_s10 + $0x314] sm:$0xf0] }
 0x478   :  { %2712 = vmatmul.bf16.vlgmr.msrb.gmra.mxu1 %v8897_v13  ;;  %2725 = vmatpush.bf16.msrb.mxu2 %v5610_v60  ;;  %v7529_v6 = vunpack.i.h.bf16 %v8899_v37  ;;  %v7062_v60 = vld [vmem:[%s11230_s10 + $0x384] sm:$0xf0] }
 0x479   :  { %2746 = vmatpush.bf16.msra.mxu0 %v5794_v54  ;;  %v7034_v54 = vld [vmem:[%s11230_s10 + $0x2a4] sm:$0xf0] }
 0x47a   :  { %v5754_v35 = vor.u32 %v7034_v54, %v5753_v53  ;;  %v1640_v3 = vsel %vm184_vm0, %v5372_v49, %v7529_v6  ;;  %v7050_v54 = vld [vmem:[%s11230_s10 + $0x324] sm:$0xf0] }
 0x47b   :  { %2737 = vmatpush.bf16.msra.mxu3 %v5690_v22  ;;  %2762 = vmatpush.bf16.msra.mxu1 %v5842_v32 }
 0x47c   :  { %2778 = vmatpush.bf16.msra.mxu2 %v5890_v8 }
 0x47d   :  { %2747 = vmatpush.bf16.msra.mxu0 %v5786_v56  ;;  %v7016_v56 = vld [vmem:[%s11230_s10 + $0x214] sm:$0xf0] }
 0x47e   :  { %v5682_v2 = vor.u32 %v7016_v56, %v5681_v58  ;;  %v5818_v56 = vor.u32 %v7050_v54, %v5817_v44  ;;  %v7011_v44 = vld [vmem:[%s11230_s10 + $0x1f4] sm:$0xf]  ;;  %v5667_v54 = vld [vmem:[%s11230_s10 + $0x1f8] sm:$0xf0] }
 0x47f   :  { %v8942_v34 = vpop.permute.xlu2 %7541 }
 0x480   :  { %2738 = vmatpush.bf16.msra.mxu3 %v5682_v2  ;;  %2779 = vmatpush.bf16.msra.mxu2 %v5882_v27  ;;  %v7544_v10 = vunpack.i.h.bf16 %v8942_v34  ;;  %v7543_v14 = vunpack.i.l.bf16 %v8942_v34  ;;  %v5366_v27 = vld [vmem:[%s11239_s19 + $0x8] ss:$2 sm:$0x7] }
 0x481   :  { %2748 = vmatpush.bf16.msra.mxu0 %v5778_v61  ;;  %v5833_v61 = vld [vmem:[%s11230_s10 + $0x340] sm:$0xf] }
 0x482   :  { %v5834_v24 = vor.u32 %v7054_v59, %v5833_v61 }
 0x484   :  { %2763 = vmatpush.bf16.msra.mxu1 %v5834_v24  ;;  %2739 = vmatpush.bf16.msra.mxu3 %v5674_v30 }
 0x485   :  { %2749 = vmatpush.bf16.msra.mxu0 %v5770_v42  ;;  %v7528_v42 = vunpack.i.l.bf16 %v8899_v37  ;;  %v7064_v37 = vld [vmem:[%s11230_s10 + $0x394] sm:$0xf0] }
 0x486   :  { %v8988_v46 = vpop.permute.xlu0 %7511  ;;  %v5874_v45 = vor.u32 %v7064_v37, %v5873_v23  ;;  %v1828_v37 = vld [vmem:[#allocation3 + $0x8] sm:$0xff] }
 0x487   :  { %v8996_v39 = vpop.permute.xlu2 %7546  ;;  %v1637_v12 = vsel %vm184_vm0, %v8629_v38, %v7528_v42  ;;  %v5866_v38 = vor.u32 %v7062_v60, %v5865_v57  ;;  %v7514_v58 = vunpack.i.h.bf16 %v8988_v46  ;;  %v7513_v32 = vunpack.i.l.bf16 %v8988_v46  ;;  %v1897_v42 = vld [vmem:[#allocation5 + $0x3c] sm:$0x1]  ;;  %v5801_v57 = vld [vmem:[%s11230_s10 + $0x300] sm:$0xf] }
 0x488   :  { %2780 = vmatpush.bf16.msra.mxu2 %v5874_v45  ;;  %v7549_v24 = vunpack.i.h.bf16 %v8996_v39  ;;  %v7548_v40 = vunpack.i.l.bf16 %v8996_v39  ;;  %v1681_v45 = vsel %vm184_vm0, %v5378_v4, %v7544_v10  ;;  %v1805_v4 = vld [vmem:[#allocation3 + $0xe] sm:$0x1] }
 0x489   :  { %2750 = vmatpush.bf16.msra.mxu0 %v5762_v51  ;;  %v5826_v51 = vor.u32 %v7052_v47, %v5825_v11  ;;  %v1599_v23 = vsel %vm184_vm0, %v5366_v27, %v7514_v58  ;;  %v1678_v11 = vsel %vm184_vm0, %v8639_v31, %v7543_v14  ;;  %v1596_v47 = vsel %vm184_vm0, %v1555_v28, %v7513_v32  ;;  %v7046_v31 = vld [vmem:[%s11230_s10 + $0x304] sm:$0xf0] }
 0x48a   :  { %v1756_v14 = vld [vmem:[#allocation3 + $0x2] sm:$0xff] }
 0x48b   :  { %2764 = vmatpush.bf16.msra.mxu1 %v5826_v51 }
 0x48c   :  { %2781 = vmatpush.bf16.msra.mxu2 %v5866_v38  ;;  %v1682_v38 = vsel %vm755_vm2, %v1681_v45, %v7549_v24  ;;  %v7005_v45 = vld [vmem:[%s11230_s10 + $0x1c4] sm:$0xf] }
 0x48d   :  { %2751 = vmatpush.bf16.msra.mxu0 %v5754_v35 }
 0x48e   :  { %v9040_v9 = vpop.permute.xlu1 %7531  ;;  %v9042_v18 = vpop.permute.xlu0 %7516 }
 0x48f   :  { %v9053_v17 = vpop.permute.xlu2 %1759  ;;  %v7534_v43 = vunpack.i.h.bf16 %v9040_v9  ;;  %v7533_v19 = vunpack.i.l.bf16 %v9040_v9  ;;  %v7519_v55 = vunpack.i.h.bf16 %v9042_v18  ;;  %v7518_v29 = vunpack.i.l.bf16 %v9042_v18  ;;  %v1889_v9 = vld [vmem:[#allocation5 + $0x2c] sm:$0x11]  ;;  %v5809_v18 = vld [vmem:[%s11230_s10 + $0x310] sm:$0xf]  ;;  %2765 = vmatpush.bf16.msra.mxu1 %v5818_v56 }
 0x490   :  { %v5810_v16 = vor.u32 %v7048_v15, %v5809_v18  ;;  %v5670_v56 = vor.u32 %v7011_v44, %v5667_v54  ;;  %v1766_v28 = vmul.f32 %v9053_v17, %v1756_v14  ;;  %v7007_v17 = vld [vmem:[%s11230_s10 + $0x1d4] sm:$0xf] }
 0x491   :  { %2752 = vmatpush.bf16.msra.mxu0 %v5746_v52  ;;  %v1638_v34 = vsel %vm755_vm2, %v1637_v12, %v7533_v19  ;;  %v1641_v61 = vsel %vm755_vm2, %v1640_v3, %v7534_v43  ;;  %v1600_v49 = vsel %vm755_vm2, %v1599_v23, %v7519_v55  ;;  %v5802_v19 = vor.u32 %v7046_v31, %v5801_v57  ;;  %v1892_v31 = vld [vmem:[#allocation5 + $0x34] sm:$0x11]  ;;  %v6979_v54 = vld [vmem:[%s11230_s10 + $0xf4] sm:$0xf] }
 0x492   :  { %v7003_v14 = vld [vmem:[%s11230_s10 + $0x1b4] sm:$0xf] }
 0x493   :  { %2766 = vmatpush.bf16.msra.mxu1 %v5810_v16 }
 0x495   :  { %2753 = vmatpush.bf16.msra.mxu0 %v5738_v41 }
 0x496   :  { %v7537_v53 = vpop.permute.xlu1 %7536  ;;  %v7553_v22 = vpop.permute.xlu0 %7552 }
 0x497   :  { %v7539_v62 = vunpack.i.h.bf16 %v7537_v53  ;;  %v7538_v1 = vunpack.i.l.bf16 %v7537_v53  ;;  %v7555_v35 = vunpack.i.h.bf16 %v7553_v22  ;;  %v7554_v8 = vunpack.i.l.bf16 %v7553_v22  ;;  %2767 = vmatpush.bf16.msra.mxu1 %v5802_v19 }
 0x498   :  { %v1836_v63 = vpop.permute.xlu2 %1835  ;;  %v7524_v53 = vunpack.i.h.bf16 %v8847_v26  ;;  %v1679_v22 = vsel %vm755_vm2, %v1678_v11, %v7548_v40  ;;  %v1717_v26 = vld [vmem:[#allocation5 + $0x20] sm:$0x11]  ;;  %v5603_v11 = vld [vmem:[%s11230_s10 + $0x178] sm:$0xf0] }
 0x499   :  { %v1875_v2 = vsel %vm755_vm2, %v1767_v5, %v7555_v35  ;;  %v1873_v52 = vsel %vm755_vm2, %v1743_v7, %v7554_v8  ;;  %v1839_v59 = vmul.f32 %v1836_v63, %v1829_v33  ;;  %v1639_v25 = vsel %vm763_vm3, %v1638_v34, %v7538_v1  ;;  %v7009_v63 = vld [vmem:[%s11230_s10 + $0x1e4] sm:$0xf]  ;;  %v1781_v40 = vld [vmem:[#allocation3 + $0xc] sm:$0x1] }
 0x49a   :  { %v1883_v46 = vpack.c.bf16 %v1875_v2, %v1873_v52  ;;  %v1642_v20 = vsel %vm763_vm3, %v1641_v61, %v7539_v62  ;;  %v1597_v5 = vsel %vm755_vm2, %v1596_v47, %v7518_v29  ;;  %v1686_v51 = vrot.slane %v1639_v25, 5  ;;  %v5659_v61 = vld [vmem:[%s11230_s10 + $0x1e8] sm:$0xf0]  ;;  %v5651_v25 = vld [vmem:[%s11230_s10 + $0x1d8] sm:$0xf0] }
 0x49b   :  { %v1885_v41 = vpack.c.bf16 %v1839_v59, %v1839_v59  ;;  %v1687_v3 = vrot.slane %v1642_v20, 5  ;;  %v1598_v62 = vsel %vm763_vm3, %v1597_v5, %v7523_v21  ;;  %v1601_v33 = vsel %vm763_vm3, %v1600_v49, %v7524_v53  ;;  %v1730_v21 = vld [vmem:[#allocation3] sm:$0xff]  ;;  %2830 = vmatpush.bf16.msrb.mxu1 %v5670_v56  ;;  %v6959_v56 = vld [vmem:[%s11230_s10 + $0x54] sm:$0xf] }
 0x49c   :  { %v1890_v30 = vsel %vm8409_vm12, %v1883_v46, %v1889_v9  ;;  %v1702_v55 = vsel %vm1701_vm1, %v1598_v62, %v1686_v51  ;;  %v5662_v18 = vor.u32 %v7009_v63, %v5659_v61  ;;  %v1742_v15 = vmul.f32 %v8968_v36, %v1730_v21  ;;  %v5643_v47 = vld [vmem:[%s11230_s10 + $0x1c8] sm:$0xf0]  ;;  %v5539_v62 = vld [vmem:[%s11230_s10 + $0xf8] sm:$0xf0] }
 0x49d   :  { %1891 = vst [vmem:[#allocation5 + $0x2c] sm:$0x11] %v1890_v30  ;;  %v1898_v7 = vsel %vm9134_vm7, %v1885_v41, %v1897_v42  ;;  %v1703_v29 = vsel %vm1701_vm1, %v1601_v33, %v1687_v3  ;;  %v5654_v42 = vor.u32 %v7007_v17, %v5651_v25  ;;  %v6963_v30 = vld [vmem:[%s11230_s10 + $0x74] sm:$0xf]  ;;  %v5646_v51 = vor.u32 %v7005_v45, %v5643_v47  ;;  %v5595_v33 = vld [vmem:[%s11230_s10 + $0x168] sm:$0xf0] }
 0x49e   :  { %v1832_v39 = vpop.permute.xlu0 %1831  ;;  %v7558_v12 = vpop.permute.xlu1 %7557  ;;  %1899 = vst [vmem:[#allocation5 + $0x3c] sm:$0x1] %v1898_v7  ;;  %v6995_v41 = vld [vmem:[%s11230_s10 + $0x174] sm:$0xf]  ;;  %v6961_v7 = vld [vmem:[%s11230_s10 + $0x64] sm:$0xf] }
 0x49f   :  { %v1838_v60 = vmul.f32 %v1832_v39, %v1828_v37  ;;  %v7560_v10 = vunpack.i.h.bf16 %v7558_v12  ;;  %v7559_v43 = vunpack.i.l.bf16 %v7558_v12  ;;  %2831 = vmatpush.bf16.msrb.mxu1 %v5662_v18  ;;  %v5475_v37 = vld [vmem:[%s11230_s10 + $0x78] sm:$0xf0]  ;;  %v5606_v53 = vor.u32 %v6995_v41, %v5603_v11  ;;  %v5531_v61 = vld [vmem:[%s11230_s10 + $0xe8] sm:$0xf0]  ;;  %v6957_v25 = vld [vmem:[%s11230_s10 + $0x44] sm:$0xf] }
 0x4a0   :  { %v5478_v19 = vor.u32 %v6963_v30, %v5475_v37  ;;  %v5627_v18 = vld [vmem:[%s11230_s10 + $0x1a8] sm:$0xf0]  ;;  %v6955_v45 = vld [vmem:[%s11230_s10 + $0x34] sm:$0xf] }
 0x4a1   :  { %v1882_v1 = vpack.c.bf16 %v1838_v60, %v1838_v60  ;;  %v1680_v35 = vsel %vm763_vm3, %v1679_v22, %v7559_v43  ;;  %v1683_v8 = vsel %vm763_vm3, %v1682_v38, %v7560_v10  ;;  %v1812_v23 = vpop.permute.xlu2 %1811  ;;  %v5467_v22 = vld [vmem:[%s11230_s10 + $0x68] sm:$0xf0] }
 0x4a2   :  { %v1695_v58 = vrot.slane %v1680_v35, 2  ;;  %v1696_v32 = vrot.slane %v1683_v8, 2  ;;  %v1815_v5 = vmul.f32 %v1812_v23, %v1805_v4  ;;  %v5619_v4 = vld [vmem:[%s11230_s10 + $0x198] sm:$0xf0]  ;;  %v6989_v23 = vld [vmem:[%s11230_s10 + $0x144] sm:$0xf] }
 0x4a3   :  { %1888 = vst.msk [vmem:[#allocation5 + $0x1c] sm:$0xf] %vm1725_vm14, %v1882_v1  ;;  %2832 = vmatpush.bf16.msrb.mxu1 %v5654_v42  ;;  %v6993_v1 = vld [vmem:[%s11230_s10 + $0x164] sm:$0xf]  ;;  %v1804_v37 = vld [vmem:[#allocation3 + $0x6] sm:$0xff] }
 0x4a4   :  { %v1706_v9 = vsel %vm1705_vm4, %v1702_v55, %v1695_v58  ;;  %v1707_v2 = vsel %vm1705_vm4, %v1703_v29, %v1696_v32  ;;  %v1713_v52 = vpack.c.bf16 %v1696_v32, %v1695_v58  ;;  %v5635_v58 = vld [vmem:[%s11230_s10 + $0x1b8] sm:$0xf0] }
 0x4a5   :  { %v1711_v34 = vpack.c.bf16 %v1707_v2, %v1706_v9  ;;  %v5459_v55 = vld [vmem:[%s11230_s10 + $0x58] sm:$0xf0]  ;;  %v5638_v29 = vor.u32 %v7003_v14, %v5635_v58  ;;  %v5542_v2 = vor.u32 %v6979_v54, %v5539_v62  ;;  %v5411_v14 = vld [vmem:[#allocation5 + $0x38] sm:$0x10] }
 0x4a6   :  { %v1718_v46 = vsel %vm8409_vm12, %v1713_v52, %v1717_v26  ;;  %v7563_v59 = vpop.permute.xlu1 %7562  ;;  %v7572_v36 = vpop.permute.xlu0 %7571  ;;  %v5470_v26 = vor.u32 %v6961_v7, %v5467_v22  ;;  %v5395_v9 = vld [vmem:[#allocation5 + $0x28] sm:$0x10]  ;;  %v6977_v52 = vld [vmem:[%s11230_s10 + $0xe4] sm:$0xf]  ;;  %v5515_v7 = vld [vmem:[%s11230_s10 + $0xc8] sm:$0xf0] }
 0x4a7   :  { %1715 = vst [vmem:[#allocation5] sm:$0xff] %v1711_v34  ;;  %v7565_v27 = vunpack.i.h.bf16 %v7563_v59  ;;  %v7564_v24 = vunpack.i.l.bf16 %v7563_v59  ;;  %v7574_v49 = vunpack.i.h.bf16 %v7572_v36  ;;  %v7573_v57 = vunpack.i.l.bf16 %v7572_v36  ;;  %2833 = vmatpush.bf16.msrb.mxu1 %v5646_v51  ;;  %v7001_v59 = vld [vmem:[%s11230_s10 + $0x1a4] sm:$0xf]  ;;  %v5523_v36 = vld [vmem:[%s11230_s10 + $0xd8] sm:$0xf0] }
 0x4a8   :  { %1719 = vst [vmem:[#allocation5 + $0x20] sm:$0x11] %v1718_v46  ;;  %v5598_v34 = vor.u32 %v6993_v1, %v5595_v33  ;;  %v6991_v46 = vld [vmem:[%s11230_s10 + $0x154] sm:$0xf]  ;;  %v5534_v17 = vor.u32 %v6977_v52, %v5531_v61  ;;  %v5611_v51 = vld [vmem:[%s11230_s10 + $0x188] sm:$0xf0] }
 0x4a9   :  { %v1872_v20 = vsel %vm755_vm2, %v1742_v15, %v7564_v24  ;;  %v1874_v6 = vsel %vm755_vm2, %v1766_v28, %v7565_v27  ;;  %v1879_v35 = vsel %vm755_vm2, %v1815_v5, %v7574_v49  ;;  %v5630_v27 = vor.u32 %v7001_v59, %v5627_v18  ;;  %v1808_v41 = vpop.permute.xlu2 %1807  ;;  %v5443_v49 = vld [vmem:[%s11230_s10 + $0x38] sm:$0xf0]  ;;  %v6997_v5 = vld [vmem:[%s11230_s10 + $0x184] sm:$0xf] }
 0x4aa   :  { %v1880_v16 = vpack.c.bf16 %v1874_v6, %v1872_v20  ;;  %v5462_v24 = vor.u32 %v6959_v56, %v5459_v55  ;;  %v5451_v20 = vld [vmem:[%s11230_s10 + $0x48] sm:$0xf0]  ;;  %v6999_v6 = vld [vmem:[%s11230_s10 + $0x194] sm:$0xf]  ;;  %v5590_v42 = vor.u32 %v6991_v46, %v5587_v48  ;;  %v5446_v22 = vor.u32 %v6955_v45, %v5443_v49  ;;  %v5427_v59 = vld [vmem:[%s11230_s10 + $0x18] sm:$0xf0] }
 0x4ab   :  { %2834 = vmatpush.bf16.msrb.mxu1 %v5638_v29  ;;  %v5622_v30 = vor.u32 %v6999_v6, %v5619_v4  ;;  %v5454_v11 = vor.u32 %v6957_v25, %v5451_v20  ;;  %v6944_v33 = vld [vmem:[#allocation5 + $0x1c] sm:$0xf]  ;;  %v6971_v55 = vld [vmem:[%s11230_s10 + $0xb4] sm:$0xf]  ;;  %v5507_v29 = vld [vmem:[%s11230_s10 + $0xb8] sm:$0xf0] }
 0x4ac   :  { %1886 = vst [vmem:[#allocation5 + $0xc] sm:$0xff] %v1880_v16  ;;  %v6975_v16 = vld [vmem:[%s11230_s10 + $0xd4] sm:$0xf]  ;;  %v5435_v56 = vld [vmem:[%s11230_s10 + $0x28] sm:$0xf0]  ;;  %v5510_v61 = vor.u32 %v6971_v55, %v5507_v29 }
 0x4ad   :  { %v5526_v47 = vor.u32 %v6975_v16, %v5523_v36  ;;  %v6951_v46 = vld [vmem:[%s11230_s10 + $0x14] sm:$0xf]  ;;  %v6969_v18 = vld [vmem:[%s11230_s10 + $0xa4] sm:$0xf]  ;;  %v5419_v6 = vld [vmem:[%s11230_s10 + $0x8] sm:$0xf0] }
 0x4ae   :  { %v1788_v3 = vpop.permute.xlu1 %1787  ;;  %v5385_v39 = vld [vmem:[#allocation5] sm:$0xf]  ;;  %v6941_v12 = vld [vmem:[#allocation5 + $0x4] sm:$0xf]  ;;  %v5430_v25 = vor.u32 %v6951_v46, %v5427_v59  ;;  %v5491_v16 = vld [vmem:[%s11230_s10 + $0x98] sm:$0xf0] }
 0x4af   :  { %v1791_v60 = vmul.f32 %v1788_v3, %v1781_v40  ;;  %v6945_v10 = vld [vmem:[#allocation5 + $0x1c] sm:$0x10]  ;;  %v5387_v43 = vld [vmem:[#allocation5 + $0x20] sm:$0x10]  ;;  %2835 = vmatpush.bf16.msrb.mxu1 %v5630_v27  ;;  %v5579_v40 = vld [vmem:[%s11230_s10 + $0x148] sm:$0xf0] }
 0x4b0   :  { %v9221_v38 = vor.u32 %v6945_v10, %v5385_v39  ;;  %v9223_v44 = vor.u32 %v6941_v12, %v5387_v43  ;;  %v1780_v3 = vld [vmem:[#allocation3 + $0x4] sm:$0xff]  ;;  %v5582_v39 = vor.u32 %v6989_v23, %v5579_v40  ;;  %v6973_v12 = vld [vmem:[%s11230_s10 + $0xc4] sm:$0xf]  ;;  %v6987_v10 = vld [vmem:[%s11230_s10 + $0x134] sm:$0xf] }
 0x4b1   :  { %v1877_v8 = vsel %vm755_vm2, %v1791_v60, %v7573_v57  ;;  %v5614_v57 = vor.u32 %v6997_v5, %v5611_v51  ;;  %v5571_v43 = vld [vmem:[%s11230_s10 + $0x138] sm:$0xf0]  ;;  %v6983_v27 = vld [vmem:[%s11230_s10 + $0x114] sm:$0xf]  ;;  %v6981_v4 = vld [vmem:[%s11230_s10 + $0x104] sm:$0xf] }
 0x4b2   :  { %v1884_v32 = vpack.c.bf16 %v1879_v35, %v1877_v8  ;;  %2684 = vmatmul.bf16.vlgmr.msrb.gmra.mxu3 %v9221_v38  ;;  %2698 = vmatmul.bf16.vlgmr.msrb.gmra.mxu0 %v9223_v44  ;;  %v5518_v35 = vor.u32 %v6973_v12, %v5515_v7  ;;  %v6953_v8 = vld [vmem:[%s11230_s10 + $0x24] sm:$0xf]  ;;  %v5547_v23 = vld [vmem:[%s11230_s10 + $0x108] sm:$0xf0]  ;;  %v7027_v40 = vld [vmem:[%s11230_s10 + $0x274] sm:$0xf] }
 0x4b3   :  { %2788 = vmatpush.bf16.msrb.mxu3 %v5478_v19  ;;  %2816 = vmatpush.bf16.msrb.mxu0 %v5606_v53  ;;  %v6942_v21 = vld [vmem:[#allocation5 + $0xc] sm:$0xf]  ;;  %v5401_v60 = vld [vmem:[#allocation5 + $0x10] sm:$0xf]  ;;  %v7023_v55 = vld [vmem:[%s11230_s10 + $0x254] sm:$0xf] }
 0x4b4   :  { %v1893_v63 = vsel %vm8409_vm12, %v1884_v32, %v1892_v31  ;;  %v9258_v28 = vor.u32 %v6942_v21, %v5395_v9  ;;  %2836 = vmatpush.bf16.msrb.mxu1 %v5622_v30  ;;  %v1814_v31 = vmul.f32 %v1808_v41, %v1804_v37  ;;  %v6947_v53 = vld [vmem:[#allocation5 + $0x2c] sm:$0x10]  ;;  %v5574_v32 = vor.u32 %v6987_v10, %v5571_v43  ;;  %v6985_v9 = vld [vmem:[%s11230_s10 + $0x124] sm:$0xf]  ;;  %v5731_v30 = vld [vmem:[%s11230_s10 + $0x278] sm:$0xf0] }
 0x4b5   :  { %1894 = vst [vmem:[#allocation5 + $0x34] sm:$0x11] %v1893_v63  ;;  %v9327_v58 = vor.u32 %v6947_v53, %v5401_v60  ;;  %v9347_v63 = vor.u32 %v6944_v33, %v5411_v14  ;;  %v7059_v37 = vld [vmem:[%s11230_s10 + $0x374] sm:$0xf]  ;;  %v5859_v41 = vld [vmem:[%s11230_s10 + $0x378] sm:$0xf0]  ;;  %v5734_v60 = vor.u32 %v7027_v40, %v5731_v30 }
 0x4b6   :  { %v1784_v15 = vpop.permute.xlu1 %1783  ;;  %2726 = vmatmul.bf16.vlgmr.msrb.gmra.mxu2 %v9258_v28  ;;  %v5891_v49 = vld [vmem:[%s11230_s10 + $0x3b8] sm:$0xf0]  ;;  %v5483_v10 = vld [vmem:[%s11230_s10 + $0x88] sm:$0xf0]  ;;  %v7025_v43 = vld [vmem:[%s11230_s10 + $0x264] sm:$0xf]  ;;  %v5862_v53 = vor.u32 %v7059_v37, %v5859_v41 }
 0x4b7   :  { %2789 = vmatpush.bf16.msrb.mxu3 %v5470_v26  ;;  %2802 = vmatpush.bf16.msrb.mxu2 %v5542_v2  ;;  %v1790_v54 = vmul.f32 %v1784_v15, %v1780_v3  ;;  %v5563_v2 = vld [vmem:[%s11230_s10 + $0x128] sm:$0xf0]  ;;  %v5715_v29 = vld [vmem:[%s11230_s10 + $0x258] sm:$0xf0]  ;;  %v7037_v40 = vld [vmem:[%s11230_s10 + $0x2c4] sm:$0xf] }
 0x4b8   :  { %2817 = vmatpush.bf16.msrb.mxu0 %v5598_v34  ;;  %2837 = vmatpush.bf16.msrb.mxu1 %v5614_v57  ;;  %v5438_v34 = vor.u32 %v6953_v8, %v5435_v56  ;;  %v5566_v48 = vor.u32 %v6985_v9, %v5563_v2  ;;  %v5499_v15 = vld [vmem:[%s11230_s10 + $0xa8] sm:$0xf0]  ;;  %v7065_v8 = vld [vmem:[%s11230_s10 + $0x3a4] sm:$0xf]  ;;  %v7055_v2 = vld [vmem:[%s11230_s10 + $0x354] sm:$0xf]  ;;  %v5718_v59 = vor.u32 %v7023_v55, %v5715_v29 }
 0x4b9   :  { %v5502_v20 = vor.u32 %v6969_v18, %v5499_v15  ;;  %v5883_v33 = vld [vmem:[%s11230_s10 + $0x3a8] sm:$0xf0]  ;;  %v5875_v46 = vld [vmem:[%s11230_s10 + $0x398] sm:$0xf0]  ;;  %v7051_v41 = vld [vmem:[%s11230_s10 + $0x334] sm:$0xf] }
 0x4ba   :  { %v5787_v9 = vld [vmem:[%s11230_s10 + $0x2e8] sm:$0xf0] }
 0x4bb   :  { %2790 = vmatpush.bf16.msrb.mxu3 %v5462_v24  ;;  %2803 = vmatpush.bf16.msrb.mxu2 %v5534_v17  ;;  %v5555_v24 = vld [vmem:[%s11230_s10 + $0x118] sm:$0xf0]  ;;  %v6949_v17 = vld [vmem:[%s11230_s10 + $0x4] sm:$0xf]  ;;  %v5707_v18 = vld [vmem:[%s11230_s10 + $0x248] sm:$0xf0] }
 0x4bc   :  { %2818 = vmatpush.bf16.msrb.mxu0 %v5590_v42  ;;  %v6967_v42 = vld [vmem:[%s11230_s10 + $0x94] sm:$0xf]  ;;  %v5558_v36 = vor.u32 %v6983_v27, %v5555_v24  ;;  %v5403_v45 = vld [vmem:[#allocation5 + $0x30] sm:$0x10]  ;;  %v5422_v5 = vor.u32 %v6949_v17, %v5419_v6  ;;  %v5779_v24 = vld [vmem:[%s11230_s10 + $0x2d8] sm:$0xf0] }
 0x4bd   :  { %v5494_v12 = vor.u32 %v6967_v42, %v5491_v16  ;;  %v7039_v27 = vld [vmem:[%s11230_s10 + $0x2d4] sm:$0xf]  ;;  %v7053_v17 = vld [vmem:[%s11230_s10 + $0x344] sm:$0xf]  ;;  %v5867_v42 = vld [vmem:[%s11230_s10 + $0x388] sm:$0xf0] }
 0x4be   :  { %v7577_v19 = vpop.permute.xlu1 %7576  ;;  %v7061_v6 = vld [vmem:[%s11230_s10 + $0x384] sm:$0xf]  ;;  %v5771_v30 = vld [vmem:[%s11230_s10 + $0x2c8] sm:$0xf0] }
 0x4bf   :  { %2791 = vmatpush.bf16.msrb.mxu3 %v5454_v11  ;;  %v7579_v62 = vunpack.i.h.bf16 %v7577_v19  ;;  %v7578_v1 = vunpack.i.l.bf16 %v7577_v19  ;;  %2804 = vmatpush.bf16.msrb.mxu2 %v5526_v47  ;;  %v6965_v11 = vld [vmem:[%s11230_s10 + $0x84] sm:$0xf]  ;;  %v7067_v47 = vld [vmem:[%s11230_s10 + $0x3b4] sm:$0xf]  ;;  %v5723_v19 = vld [vmem:[%s11230_s10 + $0x268] sm:$0xf0]  ;;  %v5870_v37 = vor.u32 %v7061_v6, %v5867_v42 }
 0x4c0   :  { %2819 = vmatpush.bf16.msrb.mxu0 %v5582_v39  ;;  %v6948_v39 = vld [vmem:[#allocation5 + $0x34] sm:$0x10]  ;;  %v5486_v14 = vor.u32 %v6965_v11, %v5483_v10  ;;  %v5803_v55 = vld [vmem:[%s11230_s10 + $0x308] sm:$0xf0] }
 0x4c1   :  { %v1876_v26 = vsel %vm755_vm2, %v1790_v54, %v7578_v1  ;;  %v1878_v21 = vsel %vm755_vm2, %v1814_v31, %v7579_v62  ;;  %v5550_v31 = vor.u32 %v6981_v4, %v5547_v23  ;;  %v5795_v54 = vld [vmem:[%s11230_s10 + $0x2f8] sm:$0xf0]  ;;  %v7057_v62 = vld [vmem:[%s11230_s10 + $0x364] sm:$0xf]  ;;  %v5894_v1 = vor.u32 %v7067_v47, %v5891_v49 }
 0x4c2   :  { %v1881_v52 = vpack.c.bf16 %v1878_v21, %v1876_v26  ;;  %2740 = vmatmul.bf16.vlgmr.msra.gmra.mxu3 %v9327_v58  ;;  %v7041_v21 = vld [vmem:[%s11230_s10 + $0x2e4] sm:$0xf]  ;;  %v5699_v23 = vld [vmem:[%s11230_s10 + $0x238] sm:$0xf0]  ;;  %v5774_v47 = vor.u32 %v7037_v40, %v5771_v30 }
 0x4c3   :  { %2792 = vmatpush.bf16.msrb.mxu3 %v5446_v22  ;;  %2805 = vmatpush.bf16.msrb.mxu2 %v5518_v35  ;;  %v7043_v22 = vld [vmem:[%s11230_s10 + $0x2f4] sm:$0xf]  ;;  %v5851_v35 = vld [vmem:[%s11230_s10 + $0x368] sm:$0xf0]  ;;  %v7017_v49 = vld [vmem:[%s11230_s10 + $0x224] sm:$0xf] }
 0x4c4   :  { %1887 = vst [vmem:[#allocation5 + $0x14] sm:$0xff] %v1881_v52  ;;  %2820 = vmatpush.bf16.msrb.mxu0 %v5574_v32  ;;  %v5726_v32 = vor.u32 %v7025_v43, %v5723_v19  ;;  %v5798_v56 = vor.u32 %v7043_v22, %v5795_v54  ;;  %v5854_v26 = vor.u32 %v7057_v62, %v5851_v35  ;;  %v7015_v43 = vld [vmem:[%s11230_s10 + $0x214] sm:$0xf]  ;;  %v7033_v19 = vld [vmem:[%s11230_s10 + $0x2a4] sm:$0xf] }
 0x4c5   :  { %v5886_v52 = vor.u32 %v7065_v8, %v5883_v33  ;;  %v7047_v22 = vld [vmem:[%s11230_s10 + $0x314] sm:$0xf]  ;;  %v5811_v54 = vld [vmem:[%s11230_s10 + $0x318] sm:$0xf0]  ;;  %v7013_v35 = vld [vmem:[%s11230_s10 + $0x204] sm:$0xf] }
 0x4c6   :  { %5895 = vmatmul.msk.bf16.vlgmr.msra.gmra.mxu2 %vm755_vm2, %v9347_v63  ;;  %v5814_v8 = vor.u32 %v7047_v22, %v5811_v54  ;;  %v5675_v33 = vld [vmem:[%s11230_s10 + $0x208] sm:$0xf0] }
 0x4c7   :  { %2793 = vmatpush.bf16.msrb.mxu3 %v5438_v34  ;;  %2806 = vmatpush.bf16.msrb.mxu2 %v5510_v61  ;;  %v5843_v34 = vld [vmem:[%s11230_s10 + $0x358] sm:$0xf0]  ;;  %v7063_v61 = vld [vmem:[%s11230_s10 + $0x394] sm:$0xf]  ;;  %v5678_v29 = vor.u32 %v7013_v35, %v5675_v33 }
 0x4c8   :  { %2821 = vmatpush.bf16.msrb.mxu0 %v5566_v48  ;;  %v5790_v48 = vor.u32 %v7041_v21, %v5787_v9  ;;  %v5846_v15 = vor.u32 %v7055_v2, %v5843_v34  ;;  %v7029_v9 = vld [vmem:[%s11230_s10 + $0x284] sm:$0xf]  ;;  %v5739_v2 = vld [vmem:[%s11230_s10 + $0x288] sm:$0xf0] }
 0x4c9   :  { %v2028_v34 = vld [vmem:[#allocation11] sm:$0x3] }
 0x4cb   :  { %2794 = vmatpush.bf16.msrb.mxu3 %v5430_v25  ;;  %2807 = vmatpush.bf16.msrb.mxu2 %v5502_v20  ;;  %v6943_v51 = vld [vmem:[#allocation5 + $0x14] sm:$0xf]  ;;  %v5409_v3 = vld [vmem:[#allocation5 + $0x18] sm:$0xf]  ;;  %v5878_v25 = vor.u32 %v7063_v61, %v5875_v46  ;;  %v5835_v20 = vld [vmem:[%s11230_s10 + $0x348] sm:$0xf0] }
 0x4cc   :  { %2822 = vmatpush.bf16.msrb.mxu0 %v5558_v36  ;;  %v9408_v7 = vor.u32 %v6943_v51, %v5403_v45  ;;  %v9410_v57 = vor.u32 %v6948_v39, %v5409_v3  ;;  %v5782_v36 = vor.u32 %v7039_v27, %v5779_v24  ;;  %v5838_v4 = vor.u32 %v7053_v17, %v5835_v20  ;;  %v5827_v45 = vld [vmem:[%s11230_s10 + $0x338] sm:$0xf0]  ;;  %v5691_v51 = vld [vmem:[%s11230_s10 + $0x228] sm:$0xf0]  ;;  %v7035_v3 = vld [vmem:[%s11230_s10 + $0x2b4] sm:$0xf] }
 0x4cd   :  { %v5763_v39 = vld [vmem:[%s11230_s10 + $0x2b8] sm:$0xf0]  ;;  %v2030_v46 = vperm.slane %v2028_v34, 0 }
 0x4ce   :  { %2754 = vmatmul.bf16.vlgmr.msra.gmra.mxu0 %v9408_v7  ;;  %2768 = vmatmul.bf16.vlgmr.msra.gmra.mxu1 %v9410_v57  ;;  %v5766_v10 = vor.u32 %v7035_v3, %v5763_v39 }
 0x4cf   :  { %2795 = vmatpush.bf16.msrb.mxu3 %v5422_v5  ;;  %2808 = vmatpush.bf16.msrb.mxu2 %v5494_v12  ;;  %v5830_v5 = vor.u32 %v7051_v41, %v5827_v45  ;;  %v7049_v12 = vld [vmem:[%s11230_s10 + $0x324] sm:$0xf] }
 0x4d0   :  { %2823 = vmatpush.bf16.msrb.mxu0 %v5550_v31  ;;  %2890 = vmatpush.bf16.msra.mxu1 %v5894_v1  ;;  %v5819_v31 = vld [vmem:[%s11230_s10 + $0x328] sm:$0xf0] }
 0x4d2   :  { %2796 = vmatmul.bf16.vlgmr.msrb.gmra.mxu3 %v9221_v38  ;;  %v7021_v38 = vld [vmem:[%s11230_s10 + $0x244] sm:$0xf] }
 0x4d3   :  { %2844 = vmatpush.bf16.msra.mxu3 %v5734_v60  ;;  %2809 = vmatpush.bf16.msrb.mxu2 %v5486_v14  ;;  %v5710_v16 = vor.u32 %v7021_v38, %v5707_v18  ;;  %v5694_v60 = vor.u32 %v7017_v49, %v5691_v51  ;;  %v7031_v14 = vld [vmem:[%s11230_s10 + $0x294] sm:$0xf] }
 0x4d4   :  { %2872 = vmatpush.bf16.msra.mxu0 %v5862_v53  ;;  %2891 = vmatpush.bf16.msra.mxu1 %v5886_v52  ;;  %v5755_v53 = vld [vmem:[%s11230_s10 + $0x2a8] sm:$0xf0]  ;;  %v5742_v52 = vor.u32 %v7029_v9, %v5739_v2 }
 0x4d5   :  { %v5758_v1 = vor.u32 %v7033_v19, %v5755_v53 }
 0x4d6   :  { %2810 = vmatmul.bf16.vlgmr.msrb.gmra.mxu2 %v9223_v44  ;;  %v7019_v44 = vld [vmem:[%s11230_s10 + $0x234] sm:$0xf] }
 0x4d7   :  { %2845 = vmatpush.bf16.msra.mxu3 %v5726_v32  ;;  %2858 = vmatpush.bf16.msra.mxu2 %v5798_v56  ;;  %v5702_v11 = vor.u32 %v7019_v44, %v5699_v23  ;;  %v5747_v32 = vld [vmem:[%s11230_s10 + $0x298] sm:$0xf0]  ;;  %v7045_v56 = vld [vmem:[%s11230_s10 + $0x304] sm:$0xf] }
 0x4d8   :  { %2873 = vmatpush.bf16.msra.mxu0 %v5854_v26  ;;  %2892 = vmatpush.bf16.msra.mxu1 %v5878_v25  ;;  %v5750_v26 = vor.u32 %v7031_v14, %v5747_v32  ;;  %v5806_v21 = vor.u32 %v7045_v56, %v5803_v55 }
 0x4db   :  { %2846 = vmatpush.bf16.msra.mxu3 %v5718_v59  ;;  %2859 = vmatpush.bf16.msra.mxu2 %v5790_v48 }
 0x4dc   :  { %2874 = vmatpush.bf16.msra.mxu0 %v5846_v15  ;;  %2893 = vmatpush.bf16.msra.mxu1 %v5870_v37 }
 0x4de   :  { %2824 = vmatmul.bf16.vlgmr.msrb.gmra.mxu0 %v8897_v13  ;;  %2838 = vmatmul.bf16.vlgmr.msrb.gmra.mxu1 %v9258_v28  ;;  %v5822_v13 = vor.u32 %v7049_v12, %v5819_v31  ;;  %v5683_v28 = vld [vmem:[%s11230_s10 + $0x218] sm:$0xf0] }
 0x4df   :  { %2847 = vmatpush.bf16.msra.mxu3 %v5710_v16  ;;  %2860 = vmatpush.bf16.msra.mxu2 %v5782_v36  ;;  %v5686_v62 = vor.u32 %v7015_v43, %v5683_v28  ;;  %v2031_v28 = vperm.slane %v2028_v34, 1 }
 0x4e0   :  { %2875 = vmatpush.bf16.msra.mxu0 %v5838_v4 }
 0x4e3   :  { %2848 = vmatpush.bf16.msra.mxu3 %v5702_v11  ;;  %2861 = vmatpush.bf16.msra.mxu2 %v5774_v47 }
 0x4e4   :  { %2876 = vmatpush.bf16.msra.mxu0 %v5830_v5 }
 0x4e7   :  { %2849 = vmatpush.bf16.msra.mxu3 %v5694_v60  ;;  %2862 = vmatpush.bf16.msra.mxu2 %v5766_v10 }
 0x4e8   :  { %2877 = vmatpush.bf16.msra.mxu0 %v5822_v13 }
 0x4eb   :  { %2850 = vmatpush.bf16.msra.mxu3 %v5686_v62  ;;  %2863 = vmatpush.bf16.msra.mxu2 %v5758_v1 }
 0x4ec   :  { %2878 = vmatpush.bf16.msra.mxu0 %v5814_v8 }
 0x4ee   :  { %5896 = vmatmul.msk.bf16.vlgmr.msra.gmra.mxu1 %vm755_vm2, %v9347_v63 }
 0x4ef   :  { %2851 = vmatpush.bf16.msra.mxu3 %v5678_v29  ;;  %2864 = vmatpush.bf16.msra.mxu2 %v5750_v26 }
 0x4f0   :  { %2879 = vmatpush.bf16.msra.mxu0 %v5806_v21 }
 0x4f2   :  { %2852 = vmatmul.bf16.vlgmr.msra.gmra.mxu3 %v9327_v58 }
 0x4f3   :  { %2880 = vmatmul.bf16.vlgmr.msra.gmra.mxu0 %v9410_v57  ;;  %2865 = vmatpush.bf16.msra.mxu2 %v5742_v52 }
 0x4f5   :  { %v2713_v59 = vpop.f32.mrf.mxu1 }
 0x4f6   :  { %2866 = vmatmul.bf16.vlgmr.msra.gmra.mxu2 %v9408_v7 }
 0x4fd   :  { %v2715_v24 = vpop.f32.mrf.mxu1 }
 0x52f   :  { %v2699_v48 = vpop.f32.mrf.mxu0 }
 0x535   :  { %v2685_v61 = vpop.f32.mrf.mxu3 }
 0x536   :  { %v2686_v18 = vadd.f32 %v2685_v61, %v2030_v46 }
 0x537   :  { %v2701_v17 = vpop.f32.mrf.mxu0 }
 0x538   :  { %v2700_v27 = vadd.f32 %v2699_v48, %v2686_v18 }
 0x539   :  { %v2727_v38 = vpop.f32.mrf.mxu2 }
 0x53a   :  { %v2714_v25 = vadd.f32 %v2713_v59, %v2700_v27 }
 0x53c   :  { %v2728_v6 = vadd.f32 %v2727_v38, %v2714_v25 }
 0x53d   :  { %v2687_v15 = vpop.f32.mrf.mxu3 }
 0x53e   :  { %v2688_v63 = vadd.f32 %v2687_v15, %v2030_v46 }
 0x540   :  { %v2702_v57 = vadd.f32 %v2701_v17, %v2688_v63 }
 0x541   :  { %v2729_v20 = vpop.f32.mrf.mxu2 }
 0x542   :  { %v2716_v36 = vadd.f32 %v2715_v24, %v2702_v57 }
 0x544   :  { %v2730_v30 = vadd.f32 %v2729_v20, %v2716_v36 }
 0x545   :  { %v2741_v58 = vpop.f32.mrf.mxu3 }
 0x546   :  { %v2742_v42 = vadd.f32 %v2741_v58, %v2728_v6 }
 0x549   :  { %v2783_v23 = vpop.f32.mrf.mxu2 }
 0x54b   :  { %v2755_v16 = vpop.f32.mrf.mxu0  ;;  %v2769_v7 = vpop.f32.mrf.mxu1 }
 0x54c   :  { %v2756_v44 = vadd.f32 %v2755_v16, %v2742_v42 }
 0x54d   :  { %v2743_v40 = vpop.f32.mrf.mxu3 }
 0x54e   :  { %v2770_v4 = vadd.f32 %v2769_v7, %v2756_v44  ;;  %v2744_v41 = vadd.f32 %v2743_v40, %v2730_v30 }
 0x550   :  { %v2784_v37 = vadd.f32 %v2783_v23, %v2770_v4 }
 0x551   :  { %v2785_v51 = vpop.f32.mrf.mxu2 }
 0x552   :  { %v5897_v49 = vmul.f32 -1.442695, %v2784_v37 }
 0x553   :  { %v2757_v45 = vpop.f32.mrf.mxu0  ;;  %v2771_v47 = vpop.f32.mrf.mxu1 }
 0x554   :  { %v2758_v11 = vadd.f32 %v2757_v45, %v2744_v41  ;;  %7642 = vpow2.f32 %v5897_v49 }
 0x555   :  { %v2797_v31 = vpop.f32.mrf.mxu3 }
 0x556   :  { %v2772_v5 = vadd.f32 %v2771_v47, %v2758_v11  ;;  %v2798_v53 = vadd.f32 %v2797_v31, %v2031_v28 }
 0x558   :  { %v2786_v3 = vadd.f32 %v2785_v51, %v2772_v5 }
 0x559   :  { %v2811_v43 = vpop.f32.mrf.mxu2 }
 0x55a   :  { %v5898_v39 = vmul.f32 -1.442695, %v2786_v3  ;;  %v7643_v12 = vpop.eup %7642  ;;  %v2812_v62 = vadd.f32 %v2811_v43, %v2798_v53 }
 0x55b   :  { %v2825_v60 = vpop.f32.mrf.mxu0  ;;  %v2906_v10 = vadd.f32 1.0, %v7643_v12  ;;  %v2839_v13 = vpop.f32.mrf.mxu1 }
 0x55c   :  { %7644 = vpow2.f32 %v5898_v39  ;;  %v2826_v14 = vadd.f32 %v2825_v60, %v2812_v62 }
 0x55d   :  { %7646 = vrcp.f32 %v2906_v10  ;;  %v2799_v22 = vpop.f32.mrf.mxu3  ;;  %v2919_v20 = vand.u32 2147483648, %v2906_v10  ;;  %vm2913_vm3 = vweird.f32 %v2906_v10  ;;  %v2917_v6 = vand.u32 2147483647, %v2906_v10 }
 0x55e   :  { %v2800_v56 = vadd.f32 %v2799_v22, %v2031_v28  ;;  %v2840_v29 = vadd.f32 %v2839_v13, %v2826_v14  ;;  %v3008_v14 = vld [vmem:[%s11271_s17] sm:$0x3] }
 0x55f   :  { %v2920_v44 = vor.u32 1.1754944e-38, %v2919_v20  ;;  %vm2918_vm12 = vcmp.eq.f32.partialorder %v2917_v6, 8.507059e+37  ;;  %v6015_v20 = vld [vmem:[%s11232_s12 + $0xe0] sm:$0xf] }
 0x561   :  { %v2813_v8 = vpop.f32.mrf.mxu2 }
 0x562   :  { %v7645_v19 = vpop.eup %7644  ;;  %v2814_v26 = vadd.f32 %v2813_v8, %v2800_v56 }
 0x563   :  { %v2907_v54 = vadd.f32 1.0, %v7645_v19  ;;  %v2827_v1 = vpop.f32.mrf.mxu0  ;;  %v7647_v35 = vpop.eup %7646 }
 0x564   :  { %v2841_v33 = vpop.f32.mrf.mxu1  ;;  %v2909_v32 = vmul.f32 %v7647_v35, %v2906_v10  ;;  %v2828_v61 = vadd.f32 %v2827_v1, %v2814_v26  ;;  %vm2914_vm0 = vweird.f32 %v7647_v35 }
 0x565   :  { %7648 = vrcp.f32 %v2907_v54  ;;  %vm2915_vm6 = vmor %vm2913_vm3, %vm2914_vm0  ;;  %v2934_v45 = vand.u32 2147483648, %v2907_v54  ;;  %vm2928_vm9 = vweird.f32 %v2907_v54  ;;  %v2932_v11 = vand.u32 2147483647, %v2907_v54 }
 0x566   :  { %v2910_v21 = vsub.f32 1.0, %v2909_v32  ;;  %v2842_v27 = vadd.f32 %v2841_v33, %v2828_v61  ;;  %v7159_v61 = vld [vmem:[%s11232_s12 + $0x2cc] sm:$0xf0] }
 0x567   :  { %v2935_v49 = vor.u32 1.1754944e-38, %v2934_v45  ;;  %vm2933_vm11 = vcmp.eq.f32.partialorder %v2932_v11, 8.507059e+37 }
 0x568   :  { %v2911_v48 = vmul.f32 %v7647_v35, %v2910_v21 }
 0x56a   :  { %v2912_v17 = vadd.f32 %v7647_v35, %v2911_v48 }
 0x56b   :  { %v7649_v9 = vpop.eup %7648 }
 0x56c   :  { %v2895_v59 = vpop.f32.mrf.mxu1  ;;  %v2924_v38 = vmul.f32 %v7649_v9, %v2907_v54  ;;  %v2916_v16 = vsel %vm2915_vm6, %v7647_v35, %v2912_v17  ;;  %vm2929_vm8 = vweird.f32 %v7649_v9  ;;  %v6383_v17 = vld [vmem:[%s11232_s12 + $0x3c0] sm:$0xf] }
 0x56d   :  { %v2921_v30 = vsel %vm2918_vm12, %v2920_v44, %v2916_v16  ;;  %vm2930_vm10 = vmor %vm2928_vm9, %vm2929_vm8  ;;  %v7187_v44 = vld [vmem:[%s11232_s12 + $0x3ac] sm:$0xf0] }
 0x56e   :  { %v2925_v25 = vsub.f32 1.0, %v2924_v38  ;;  %v2978_v19 = vmul.f32 %v2921_v30, %v8536_v0  ;;  %v6239_v38 = vld [vmem:[%s11232_s12 + $0x2a0] sm:$0xf] }
 0x570   :  { %v2881_v52 = vpop.f32.mrf.mxu0  ;;  %v2926_v7 = vmul.f32 %v7649_v9, %v2925_v25  ;;  %v7191_v25 = vld [vmem:[%s11232_s12 + $0x3cc] sm:$0xf0] }
 0x571   :  { %v6384_v16 = vor.u32 %v7191_v25, %v6383_v17  ;;  %v5935_v17 = vld [vmem:[%s11232_s12 + $0x40] sm:$0xf]  ;;  %v7079_v25 = vld [vmem:[%s11232_s12 + $0x4c] sm:$0xf0] }
 0x572   :  { %v2927_v41 = vadd.f32 %v7649_v9, %v2926_v7 }
 0x574   :  { %v2897_v4 = vpop.f32.mrf.mxu1  ;;  %v2931_v47 = vsel %vm2930_vm10, %v7649_v9, %v2927_v41  ;;  %v5983_v41 = vld [vmem:[%s11232_s12 + $0xa0] sm:$0xf] }
 0x575   :  { %v2853_v55 = vpop.f32.mrf.mxu3  ;;  %v9577_v51 = vsel %vm2933_vm11, %v2935_v49, %v2931_v47  ;;  %v7091_v47 = vld [vmem:[%s11232_s12 + $0xac] sm:$0xf0]  ;;  %v6143_v49 = vld [vmem:[%s11232_s12 + $0x1e0] sm:$0xf] }
 0x576   :  { %v2854_v2 = vadd.f32 %v2853_v55, %v2840_v29  ;;  %v3034_v29 = vperm.slane %v3008_v14, 0  ;;  %v6111_v14 = vld [vmem:[%s11232_s12 + $0x1a0] sm:$0xf] }
 0x578   :  { %v2883_v42 = vpop.f32.mrf.mxu0 }
 0x579   :  { %v2867_v34 = vpop.f32.mrf.mxu2 }
 0x57a   :  { %v2868_v46 = vadd.f32 %v2867_v34, %v2854_v2  ;;  %v6271_v2 = vld [vmem:[%s11232_s12 + $0x2e0] sm:$0xf] }
 0x57b   :  { %v6255_v34 = vld [vmem:[%s11232_s12 + $0x2c0] sm:$0xf] }
 0x57c   :  { %v2882_v18 = vadd.f32 %v2881_v52, %v2868_v46  ;;  %v7163_v52 = vld [vmem:[%s11232_s12 + $0x2ec] sm:$0xf0]  ;;  %v6256_v48 = vor.u32 %v7159_v61, %v6255_v34  ;;  %v6175_v61 = vld [vmem:[%s11232_s12 + $0x220] sm:$0xf] }
 0x57d   :  { %v2855_v15 = vpop.f32.mrf.mxu3 }
 0x57e   :  { %v2896_v24 = vadd.f32 %v2895_v59, %v2882_v18  ;;  %v2856_v63 = vadd.f32 %v2855_v15, %v2842_v27  ;;  %v6272_v59 = vor.u32 %v7163_v52, %v6271_v2  ;;  %v7155_v18 = vld [vmem:[%s11232_s12 + $0x2ac] sm:$0xf0]  ;;  %v6399_v15 = vld [vmem:[%s11232_s12 + $0x3e0] sm:$0xf] }
 0x57f   :  { %v7195_v27 = vld [vmem:[%s11232_s12 + $0x3ec] sm:$0xf0]  ;;  %v6240_v6 = vor.u32 %v7155_v18, %v6239_v38  ;;  %v6319_v38 = vld [vmem:[%s11232_s12 + $0x340] sm:$0xf] }
 0x580   :  { %7650 = vtanh.f32 %v2896_v24  ;;  %v5899_v39 = vmul.f32 -1.442695, %v2896_v24  ;;  %4140 = vmatpush.bf16.msrb.mxu2 %v6272_v59  ;;  %v6400_v24 = vor.u32 %v7195_v27, %v6399_v15  ;;  %v7175_v18 = vld [vmem:[%s11232_s12 + $0x34c] sm:$0xf0] }
 0x581   :  { %v2869_v58 = vpop.f32.mrf.mxu2 }
 0x582   :  { %v2870_v57 = vadd.f32 %v2869_v58, %v2856_v63  ;;  %v7099_v58 = vld [vmem:[%s11232_s12 + $0xec] sm:$0xf0]  ;;  %4153 = vmatpush.bf16.msrb.mxu0 %v6400_v24 }
 0x583   :  { %v6016_v7 = vor.u32 %v7099_v58, %v6015_v20 }
 0x584   :  { %v2884_v36 = vadd.f32 %v2883_v42, %v2870_v57  ;;  %4141 = vmatpush.bf16.msrb.mxu2 %v6256_v48  ;;  %v6223_v57 = vld [vmem:[%s11232_s12 + $0x280] sm:$0xf]  ;;  %v7151_v42 = vld [vmem:[%s11232_s12 + $0x28c] sm:$0xf0] }
 0x585   :  { %4114 = vmatpush.bf16.msrb.mxu3 %v6016_v7  ;;  %v6224_v45 = vor.u32 %v7151_v42, %v6223_v57  ;;  %v7139_v48 = vld [vmem:[%s11232_s12 + $0x22c] sm:$0xf0]  ;;  %v6320_v42 = vor.u32 %v7175_v18, %v6319_v38  ;;  %v7125_v18 = vld [vmem:[%s11232_s12 + $0x1c4] sm:$0xf] }
 0x586   :  { %v7651_v23 = vpop.eup %7650  ;;  %v2898_v40 = vadd.f32 %v2897_v4, %v2884_v36  ;;  %v6367_v36 = vld [vmem:[%s11232_s12 + $0x3a0] sm:$0xf]  ;;  %4154 = vmatpush.bf16.msrb.mxu0 %v6384_v16  ;;  %v6176_v57 = vor.u32 %v7139_v48, %v6175_v61  ;;  %v7115_v7 = vld [vmem:[%s11232_s12 + $0x16c] sm:$0xf0] }
 0x587   :  { %v2980_v37 = vmul.f32 %v7651_v23, %v2921_v30  ;;  %v5999_v4 = vld [vmem:[%s11232_s12 + $0xc0] sm:$0xf]  ;;  %v6368_v11 = vor.u32 %v7187_v44, %v6367_v36  ;;  %v7097_v44 = vld [vmem:[%s11232_s12 + $0xe4] sm:$0xf]  ;;  %v7111_v38 = vld [vmem:[%s11232_s12 + $0x14c] sm:$0xf0] }
 0x588   :  { %7652 = vtanh.f32 %v2898_v40  ;;  %v5900_v13 = vmul.f32 -1.442695, %v2898_v40  ;;  %v7095_v40 = vld [vmem:[%s11232_s12 + $0xcc] sm:$0xf0]  ;;  %v6207_v30 = vld [vmem:[%s11232_s12 + $0x260] sm:$0xf]  ;;  %4142 = vmatpush.bf16.msrb.mxu2 %v6240_v6 }
 0x589   :  { %2984 = vrot.lane.b32.xlu2 %v2980_v37, %s11259_s2  ;;  %7654 = vpow2.f32 %v5899_v39  ;;  %v6000_v37 = vor.u32 %v7095_v40, %v5999_v4  ;;  %v6351_v39 = vld [vmem:[%s11232_s12 + $0x380] sm:$0xf] }
 0x58a   :  { %4155 = vmatpush.bf16.msrb.mxu0 %v6368_v11  ;;  %v6079_v16 = vld [vmem:[%s11232_s12 + $0x160] sm:$0xf] }
 0x58b   :  { %4115 = vmatpush.bf16.msrb.mxu3 %v6000_v37  ;;  %v6159_v36 = vld [vmem:[%s11232_s12 + $0x200] sm:$0xf]  ;;  %v5936_v37 = vor.u32 %v7079_v25, %v5935_v17  ;;  %v6080_v11 = vor.u32 %v7115_v7, %v6079_v16  ;;  %v7227_v25 = vld [vmem:[%s11232_s12 + $0x4ec] sm:$0xf0]  ;;  %v7121_v7 = vld [vmem:[%s11232_s12 + $0x1a4] sm:$0xf] }
 0x58c   :  { %4143 = vmatpush.bf16.msrb.mxu2 %v6224_v45  ;;  %v6303_v40 = vld [vmem:[%s11232_s12 + $0x320] sm:$0xf]  ;;  %v7075_v45 = vld [vmem:[%s11232_s12 + $0x2c] sm:$0xf0] }
 0x58d   :  { %v6527_v17 = vld [vmem:[%s11232_s12 + $0x4e0] sm:$0xf]  ;;  %v7107_v16 = vld [vmem:[%s11232_s12 + $0x12c] sm:$0xf0] }
 0x58e   :  { %v7653_v5 = vpop.eup %7652  ;;  %v6528_v58 = vor.u32 %v7227_v25, %v6527_v17  ;;  %v7225_v17 = vld [vmem:[%s11232_s12 + $0x4e4] sm:$0xf]  ;;  %v6529_v25 = vld [vmem:[%s11232_s12 + $0x4f0] sm:$0xf0] }
 0x58f   :  { %v2981_v3 = vmul.f32 %v7653_v5, %v9577_v51  ;;  %v7655_v12 = vpop.eup %7654  ;;  %v7131_v5 = vld [vmem:[%s11232_s12 + $0x1ec] sm:$0xf0] }
 0x590   :  { %v2946_v31 = vadd.f32 1.0, %v7655_v12  ;;  %v7183_v12 = vld [vmem:[%s11232_s12 + $0x38c] sm:$0xf0] }
 0x591   :  { %2986 = vrot.lane.b32.xlu0 %v2981_v3, %s11259_s2  ;;  %v7147_v3 = vld [vmem:[%s11232_s12 + $0x26c] sm:$0xf0] }
 0x592   :  { %7656 = vrcp.f32 %v2946_v31  ;;  %v2959_v62 = vand.u32 2147483648, %v2946_v31  ;;  %vm2953_vm14 = vweird.f32 %v2946_v31  ;;  %v2957_v1 = vand.u32 2147483647, %v2946_v31 }
 0x593   :  { %7658 = vpow2.f32 %v5900_v13  ;;  %v7087_v13 = vld [vmem:[%s11232_s12 + $0x8c] sm:$0xf0] }
 0x594   :  { %v2960_v33 = vor.u32 1.1754944e-38, %v2959_v62  ;;  %vm2958_vm1 = vcmp.eq.f32.partialorder %v2957_v1, 8.507059e+37  ;;  %v7143_v62 = vld [vmem:[%s11232_s12 + $0x24c] sm:$0xf0]  ;;  %v6352_v1 = vor.u32 %v7183_v12, %v6351_v39  ;;  %v7093_v39 = vld [vmem:[%s11232_s12 + $0xc4] sm:$0xf] }
 0x596   :  { %4156 = vmatpush.bf16.msrb.mxu0 %v6352_v1  ;;  %v5985_v1 = vld [vmem:[%s11232_s12 + $0xb0] sm:$0xf0] }
 0x598   :  { %v7657_v60 = vpop.eup %7656 }
 0x599   :  { %v2949_v10 = vmul.f32 %v7657_v60, %v2946_v31  ;;  %vm2954_vm13 = vweird.f32 %v7657_v60  ;;  %v7659_v35 = vpop.eup %7658  ;;  %v6144_v31 = vor.u32 %v7131_v5, %v6143_v49 }
 0x59a   :  { %vm2955_vm15 = vmor %vm2953_vm14, %vm2954_vm13  ;;  %v9588_v32 = vadd.f32 1.0, %v7659_v35 }
 0x59b   :  { %v2950_v43 = vsub.f32 1.0, %v2949_v10  ;;  %v5984_v10 = vor.u32 %v7091_v47, %v5983_v41  ;;  %4127 = vmatpush.bf16.msrb.mxu1 %v6144_v31 }
 0x59c   :  { %vm2968_vm7 = vweird.f32 %v9588_v32  ;;  %v2974_v24 = vand.u32 2147483648, %v9588_v32  ;;  %v2972_v6 = vand.u32 2147483647, %v9588_v32 }
 0x59d   :  { %v2951_v28 = vmul.f32 %v7657_v60, %v2950_v43  ;;  %v5967_v43 = vld [vmem:[%s11232_s12 + $0x80] sm:$0xf]  ;;  %4116 = vmatpush.bf16.msrb.mxu3 %v5984_v10 }
 0x59e   :  { %v2975_v41 = vor.u32 1.1754944e-38, %v2974_v24  ;;  %vm2973_vm3 = vcmp.eq.f32.partialorder %v2972_v6, 8.507059e+37  ;;  %v6287_v10 = vld [vmem:[%s11232_s12 + $0x300] sm:$0xf]  ;;  %v5905_v6 = vld [vmem:[%s11232_s12 + $0x10] sm:$0xf0] }
 0x59f   :  { %v2952_v54 = vadd.f32 %v7657_v60, %v2951_v28  ;;  %v6127_v28 = vld [vmem:[%s11232_s12 + $0x1c0] sm:$0xf] }
 0x5a1   :  { %v2956_v8 = vsel %vm2955_vm15, %v7657_v60, %v2952_v54  ;;  %v6191_v54 = vld [vmem:[%s11232_s12 + $0x240] sm:$0xf] }
 0x5a2   :  { %v2961_v56 = vsel %vm2958_vm1, %v2960_v33, %v2956_v8  ;;  %v6335_v8 = vld [vmem:[%s11232_s12 + $0x360] sm:$0xf]  ;;  %v7179_v33 = vld [vmem:[%s11232_s12 + $0x36c] sm:$0xf0]  ;;  %v6192_v34 = vor.u32 %v7143_v62, %v6191_v54  ;;  %v7089_v62 = vld [vmem:[%s11232_s12 + $0xa4] sm:$0xf] }
 0x5e3   :  { %v2985_v53 = vpop.permute.xlu2 %2984 }
 0x5e4   :  { %v9582_v22 = vadd.f32 %v2985_v53, %v2978_v19  ;;  %v7127_v19 = vld [vmem:[%s11232_s12 + $0x1cc] sm:$0xf0]  ;;  %v6208_v53 = vor.u32 %v7147_v3, %v6207_v30 }
 0x5e5   :  { %v6128_v35 = vor.u32 %v7127_v19, %v6127_v28  ;;  %v7171_v30 = vld [vmem:[%s11232_s12 + $0x32c] sm:$0xf0]  ;;  %v7129_v28 = vld [vmem:[%s11232_s12 + $0x1e4] sm:$0xf]  ;;  %v6145_v19 = vld [vmem:[%s11232_s12 + $0x1f0] sm:$0xf0] }
 0x5e6   :  { %7660 = vtanh.f32 %v9582_v22  ;;  %4144 = vmatpush.bf16.msrb.mxu2 %v6208_v53  ;;  %v6304_v12 = vor.u32 %v7171_v30, %v6303_v40  ;;  %v6031_v30 = vld [vmem:[%s11232_s12 + $0x100] sm:$0xf] }
 0x5e7   :  { %7662 = vrcp.f32 %v9588_v32  ;;  %4128 = vmatpush.bf16.msrb.mxu1 %v6128_v35  ;;  %v6148_v35 = vor.u32 %v7129_v28, %v6145_v19  ;;  %v6575_v28 = vld [vmem:[%s11232_s12 + $0x540] sm:$0xf]  ;;  %v7239_v19 = vld [vmem:[%s11232_s12 + $0x54c] sm:$0xf0] }
 0x5ea   :  { %4145 = vmatpush.bf16.msrb.mxu2 %v6192_v34  ;;  %v5921_v34 = vld [vmem:[%s11232_s12 + $0x30] sm:$0xf0] }
 0x5ec   :  { %v7661_v0 = vpop.eup %7660 }
 0x5ed   :  { %v9590_v55 = vmul.f32 %v7661_v0, %v2961_v56  ;;  %v9629_v63 = vpop.eup %7662  ;;  %v5968_v56 = vor.u32 %v7087_v13, %v5967_v43  ;;  %v7167_v43 = vld [vmem:[%s11232_s12 + $0x30c] sm:$0xf0] }
 0x5ee   :  { %v2964_v23 = vmul.f32 %v9629_v63, %v9588_v32  ;;  %vm2969_vm4 = vweird.f32 %v9629_v63  ;;  %v7135_v32 = vld [vmem:[%s11232_s12 + $0x20c] sm:$0xf0]  ;;  %4146 = vmatpush.bf16.msrb.mxu2 %v6176_v57  ;;  %v6288_v54 = vor.u32 %v7167_v43, %v6287_v10  ;;  %v6479_v10 = vld [vmem:[%s11232_s12 + $0x480] sm:$0xf] }
 0x5ef   :  { %v3023_v26 = vrot.slane %v9590_v55, 6  ;;  %v3011_v21 = vrot.slane %v9590_v55, 2  ;;  %v3017_v9 = vrot.slane %v9590_v55, 4  ;;  %4117 = vmatpush.bf16.msrb.mxu3 %v5968_v56  ;;  %vm9753_vm0 = vmor %vm2968_vm7, %vm2969_vm4  ;;  %v6160_v47 = vor.u32 %v7135_v32, %v6159_v36  ;;  %v7081_v56 = vld [vmem:[%s11232_s12 + $0x64] sm:$0xf] }
 0x5f0   :  { %v2965_v60 = vsub.f32 1.0, %v2964_v23  ;;  %v6017_v23 = vld [vmem:[%s11232_s12 + $0xf0] sm:$0xf0] }
 0x5f1   :  { %3024 = vrot.lane.b32.xlu0 %v3023_v26, %s11259_s2  ;;  %3012 = vrot.lane.b32.xlu1 %v3011_v21, %s11259_s2  ;;  %v7580_v46 = vpack.i.bf16 %v3034_v29, %v3017_v9  ;;  %v7123_v29 = vld [vmem:[%s11232_s12 + $0x1ac] sm:$0xf0]  ;;  %v2979_v26 = vmul.f32 %v9577_v51, %v8665_v50  ;;  %v5951_v21 = vld [vmem:[%s11232_s12 + $0x60] sm:$0xf]  ;;  %v6020_v3 = vor.u32 %v7097_v44, %v6017_v23 }
 0x5f2   :  { %v2966_v0 = vmul.f32 %v9629_v63, %v2965_v60  ;;  %v7083_v9 = vld [vmem:[%s11232_s12 + $0x6c] sm:$0xf0]  ;;  %v6112_v2 = vor.u32 %v7123_v29, %v6111_v14  ;;  %v6095_v50 = vld [vmem:[%s11232_s12 + $0x180] sm:$0xf]  ;;  %v6001_v60 = vld [vmem:[%s11232_s12 + $0xd0] sm:$0xf0]  ;;  %4147 = vmatpush.bf16.msrb.mxu2 %v6160_v47 }
 0x5f3   :  { %7581 = vrot.lane.b32.xlu2 %v7580_v46, %s11259_s2  ;;  %v6336_v46 = vor.u32 %v7179_v33, %v6335_v8  ;;  %v7119_v51 = vld [vmem:[%s11232_s12 + $0x18c] sm:$0xf0]  ;;  %v5952_v27 = vor.u32 %v7083_v9, %v5951_v21  ;;  %v6004_v53 = vor.u32 %v7093_v39, %v6001_v60  ;;  %v5988_v8 = vor.u32 %v7089_v62, %v5985_v1  ;;  %v7085_v33 = vld [vmem:[%s11232_s12 + $0x84] sm:$0xf]  ;;  %v5969_v14 = vld [vmem:[%s11232_s12 + $0x90] sm:$0xf0] }
 0x5f4   :  { %v2967_v15 = vadd.f32 %v9629_v63, %v2966_v0  ;;  %4129 = vmatpush.bf16.msrb.mxu1 %v6112_v2  ;;  %v6096_v20 = vor.u32 %v7119_v51, %v6095_v50  ;;  %v5972_v0 = vor.u32 %v7085_v33, %v5969_v14  ;;  %v5953_v29 = vld [vmem:[%s11232_s12 + $0x70] sm:$0xf0]  ;;  %v7077_v21 = vld [vmem:[%s11232_s12 + $0x44] sm:$0xf]  ;;  %v7071_v50 = vld [vmem:[%s11232_s12 + $0xc] sm:$0xf0] }
 0x5f5   :  { %4157 = vmatpush.bf16.msrb.mxu0 %v6336_v46  ;;  %4118 = vmatpush.bf16.msrb.mxu3 %v5952_v27  ;;  %v5937_v9 = vld [vmem:[%s11232_s12 + $0x50] sm:$0xf0]  ;;  %v5903_v46 = vld [vmem:[%s11232_s12] sm:$0xf]  ;;  %v7219_v47 = vld [vmem:[%s11232_s12 + $0x4ac] sm:$0xf0] }
 0x5f6   :  { %v2971_v4 = vsel %vm9753_vm0, %v9629_v63, %v2967_v15  ;;  %v5919_v63 = vld [vmem:[%s11232_s12 + $0x20] sm:$0xf]  ;;  %4192 = vmatpush.bf16.msra.mxu2 %v6020_v3  ;;  %v5940_v2 = vor.u32 %v7077_v21, %v5937_v9  ;;  %v5904_v48 = vor.u32 %v7071_v50, %v5903_v46  ;;  %v6129_v15 = vld [vmem:[%s11232_s12 + $0x1d0] sm:$0xf0]  ;;  %v7243_v39 = vld [vmem:[%s11232_s12 + $0x56c] sm:$0xf0] }
 0x5f7   :  { %v2976_v5 = vsel %vm2973_vm3, %v2975_v41, %v2971_v4  ;;  %v5920_v13 = vor.u32 %v7075_v45, %v5919_v63  ;;  %v6063_v51 = vld [vmem:[%s11232_s12 + $0x140] sm:$0xf]  ;;  %v6132_v24 = vor.u32 %v7125_v18, %v6129_v15  ;;  %v6113_v32 = vld [vmem:[%s11232_s12 + $0x1b0] sm:$0xf0]  ;;  %v7223_v4 = vld [vmem:[%s11232_s12 + $0x4cc] sm:$0xf0] }
 0x5f8   :  { %4130 = vmatpush.bf16.msrb.mxu1 %v6096_v20  ;;  %v6064_v27 = vor.u32 %v7111_v38, %v6063_v51  ;;  %v7069_v20 = vld [vmem:[%s11232_s12 + $0x4] sm:$0xf]  ;;  %v6511_v44 = vld [vmem:[%s11232_s12 + $0x4c0] sm:$0xf]  ;;  %v6116_v23 = vor.u32 %v7121_v7, %v6113_v32  ;;  %v6097_v45 = vld [vmem:[%s11232_s12 + $0x190] sm:$0xf0]  ;;  %v6532_v7 = vor.u32 %v7225_v17, %v6529_v25 }
 0x5f9   :  { %2998 = vrot.lane.b32.xlu1 %v9590_v55, %s11259_s2  ;;  %4158 = vmatpush.bf16.msrb.mxu0 %v6320_v42  ;;  %v5908_v57 = vor.u32 %v7069_v20, %v5905_v6  ;;  %v6047_v42 = vld [vmem:[%s11232_s12 + $0x120] sm:$0xf]  ;;  %v6512_v40 = vor.u32 %v7223_v4, %v6511_v44  ;;  %v7117_v41 = vld [vmem:[%s11232_s12 + $0x184] sm:$0xf]  ;;  %v6081_v60 = vld [vmem:[%s11232_s12 + $0x170] sm:$0xf0] }
 0x5fa   :  { %4119 = vmatpush.bf16.msrb.mxu3 %v5936_v37  ;;  %4193 = vmatpush.bf16.msra.mxu2 %v6004_v53  ;;  %v6048_v36 = vor.u32 %v7107_v16, %v6047_v42  ;;  %v7103_v37 = vld [vmem:[%s11232_s12 + $0x10c] sm:$0xf0]  ;;  %v6591_v3 = vld [vmem:[%s11232_s12 + $0x560] sm:$0xf]  ;;  %v7109_v62 = vld [vmem:[%s11232_s12 + $0x144] sm:$0xf] }
 0x5fb   :  { %v6032_v63 = vor.u32 %v7103_v37, %v6031_v30  ;;  %v6065_v1 = vld [vmem:[%s11232_s12 + $0x150] sm:$0xf0]  ;;  %v7211_v33 = vld [vmem:[%s11232_s12 + $0x46c] sm:$0xf0]  ;;  %v6559_v14 = vld [vmem:[%s11232_s12 + $0x520] sm:$0xf] }
 0x5fc   :  { %4131 = vmatpush.bf16.msrb.mxu1 %v6080_v11  ;;  %v6495_v11 = vld [vmem:[%s11232_s12 + $0x4a0] sm:$0xf]  ;;  %v6049_v21 = vld [vmem:[%s11232_s12 + $0x130] sm:$0xf0]  ;;  %v7101_v51 = vld [vmem:[%s11232_s12 + $0x104] sm:$0xf] }
 0x5fd   :  { %4159 = vmatpush.bf16.msrb.mxu0 %v6304_v12  ;;  %v6592_v12 = vor.u32 %v7243_v39, %v6591_v3  ;;  %v6447_v9 = vld [vmem:[%s11232_s12 + $0x440] sm:$0xf]  ;;  %v7203_v15 = vld [vmem:[%s11232_s12 + $0x42c] sm:$0xf0]  ;;  %v7221_v32 = vld [vmem:[%s11232_s12 + $0x4c4] sm:$0xf] }
 0x5fe   :  { %4120 = vmatpush.bf16.msrb.mxu3 %v5920_v13  ;;  %4194 = vmatpush.bf16.msra.mxu2 %v5988_v8  ;;  %v7215_v13 = vld [vmem:[%s11232_s12 + $0x48c] sm:$0xf0]  ;;  %v6068_v8 = vor.u32 %v7109_v62, %v6065_v1  ;;  %v6431_v18 = vld [vmem:[%s11232_s12 + $0x420] sm:$0xf]  ;;  %v6513_v44 = vld [vmem:[%s11232_s12 + $0x4d0] sm:$0xf0] }
 0x5ff   :  { %v6480_v53 = vor.u32 %v7215_v13, %v6479_v10  ;;  %v6415_v20 = vld [vmem:[%s11232_s12 + $0x400] sm:$0xf]  ;;  %v6516_v4 = vor.u32 %v7221_v32, %v6513_v44  ;;  %v7213_v37 = vld [vmem:[%s11232_s12 + $0x484] sm:$0xf]  ;;  %v6449_v39 = vld [vmem:[%s11232_s12 + $0x450] sm:$0xf0] }
 0x600   :  { %4132 = vmatpush.bf16.msrb.mxu1 %v6064_v27  ;;  %v6432_v27 = vor.u32 %v7203_v15, %v6431_v18  ;;  %v7205_v3 = vld [vmem:[%s11232_s12 + $0x444] sm:$0xf]  ;;  %v6593_v10 = vld [vmem:[%s11232_s12 + $0x570] sm:$0xf0]  ;;  %v7196_v17 = vld [vmem:[%s11232_s12 + $0x3f4] sm:$0xf0] }
 0x601   :  { %4160 = vmatpush.bf16.msrb.mxu0 %v6288_v54  ;;  %v6576_v54 = vor.u32 %v7239_v19, %v6575_v28  ;;  %v7157_v62 = vld [vmem:[%s11232_s12 + $0x2c4] sm:$0xf]  ;;  %v6561_v18 = vld [vmem:[%s11232_s12 + $0x530] sm:$0xf0] }
 0x602   :  { %4195 = vmatpush.bf16.msra.mxu2 %v5972_v0  ;;  %4121 = vmatpush.bf16.msrb.mxu3 %v5904_v48  ;;  %v7235_v0 = vld [vmem:[%s11232_s12 + $0x52c] sm:$0xf0]  ;;  %v6033_v48 = vld [vmem:[%s11232_s12 + $0x110] sm:$0xf0] }
 0x603   :  { %v2987_v52 = vpop.permute.xlu0 %2986  ;;  %v6036_v38 = vor.u32 %v7101_v51, %v6033_v48  ;;  %v6417_v48 = vld [vmem:[%s11232_s12 + $0x410] sm:$0xf0] }
 0x604   :  { %v9731_v59 = vadd.f32 %v2987_v52, %v2979_v26  ;;  %v5956_v26 = vor.u32 %v7081_v56, %v5953_v29  ;;  %v7073_v52 = vld [vmem:[%s11232_s12 + $0x24] sm:$0xf]  ;;  %4133 = vmatpush.bf16.msrb.mxu1 %v6048_v36  ;;  %v6560_v29 = vor.u32 %v7235_v0, %v6559_v14  ;;  %v6433_v0 = vld [vmem:[%s11232_s12 + $0x430] sm:$0xf0] }
 0x605   :  { %4205 = vmatpush.bf16.msra.mxu0 %v6148_v35  ;;  %v5924_v61 = vor.u32 %v7073_v52, %v5921_v34  ;;  %v6463_v35 = vld [vmem:[%s11232_s12 + $0x460] sm:$0xf]  ;;  %v7207_v52 = vld [vmem:[%s11232_s12 + $0x44c] sm:$0xf0]  ;;  %v7201_v14 = vld [vmem:[%s11232_s12 + $0x424] sm:$0xf] }
 0x606   :  { %7664 = vtanh.f32 %v9731_v59  ;;  %4196 = vmatpush.bf16.msra.mxu2 %v5956_v26  ;;  %4166 = vmatpush.bf16.msra.mxu3 %v6528_v58  ;;  %v6464_v56 = vor.u32 %v7211_v33, %v6463_v35  ;;  %v7105_v26 = vld [vmem:[%s11232_s12 + $0x124] sm:$0xf]  ;;  %v6543_v34 = vld [vmem:[%s11232_s12 + $0x500] sm:$0xf]  ;;  %v6448_v46 = vor.u32 %v7207_v52, %v6447_v9  ;;  %v3021_v58 = vrot.slane %v9590_v55, 5 }
 0x607   :  { %v6257_v33 = vld [vmem:[%s11232_s12 + $0x2d0] sm:$0xf0]  ;;  %v3009_v9 = vrot.slane %v9590_v55, 1 }
 0x608   :  { %4134 = vmatpush.bf16.msrb.mxu1 %v6032_v63  ;;  %v6241_v52 = vld [vmem:[%s11232_s12 + $0x2b0] sm:$0xf0] }
 0x609   :  { %4206 = vmatpush.bf16.msra.mxu0 %v6132_v24  ;;  %v6385_v32 = vld [vmem:[%s11232_s12 + $0x3d0] sm:$0xf0] }
 0x60a   :  { %4197 = vmatpush.bf16.msra.mxu2 %v5940_v2  ;;  %4167 = vmatpush.bf16.msra.mxu3 %v6512_v40  ;;  %v6052_v2 = vor.u32 %v7105_v26, %v6049_v21  ;;  %v6497_v40 = vld [vmem:[%s11232_s12 + $0x4b0] sm:$0xf0]  ;;  %v6260_v26 = vor.u32 %v7157_v62, %v6257_v33  ;;  %v6436_v21 = vor.u32 %v7201_v14, %v6433_v0  ;;  %v7160_v33 = vld [vmem:[%s11232_s12 + $0x2d4] sm:$0xf0]  ;;  %v6359_v14 = vld [vmem:[%s11232_s12 + $0x388] sm:$0xf] }
 0x60b   :  { %v7184_v0 = vld [vmem:[%s11232_s12 + $0x394] sm:$0xf0] }
 0x60c   :  { %v7665_v49 = vpop.eup %7664  ;;  %4183 = vmatpush.bf16.msra.mxu1 %v6592_v12  ;;  %v3027_v12 = vrot.slane %v9590_v55, 7 }
 0x60d   :  { %v2995_v31 = vmul.f32 %v7665_v49, %v2976_v5  ;;  %4207 = vmatpush.bf16.msra.mxu0 %v6116_v23  ;;  %v6100_v49 = vor.u32 %v7117_v41, %v6097_v45  ;;  %v6496_v5 = vor.u32 %v7219_v47, %v6495_v11  ;;  %v7217_v23 = vld [vmem:[%s11232_s12 + $0x4a4] sm:$0xf]  ;;  %v6481_v41 = vld [vmem:[%s11232_s12 + $0x490] sm:$0xf0] }
 0x60e   :  { %4198 = vmatpush.bf16.msra.mxu2 %v5924_v61  ;;  %v7231_v61 = vld [vmem:[%s11232_s12 + $0x50c] sm:$0xf0]  ;;  %v6500_v30 = vor.u32 %v7217_v23, %v6497_v40  ;;  %v6484_v63 = vor.u32 %v7213_v37, %v6481_v41  ;;  %v7209_v45 = vld [vmem:[%s11232_s12 + $0x464] sm:$0xf]  ;;  %v6465_v11 = vld [vmem:[%s11232_s12 + $0x470] sm:$0xf0] }
 0x60f   :  { %3000 = vrot.lane.b32.xlu2 %v2995_v31, %s11259_s2  ;;  %v7113_v31 = vld [vmem:[%s11232_s12 + $0x164] sm:$0xf]  ;;  %4168 = vmatpush.bf16.msra.mxu3 %v6496_v5  ;;  %v6544_v50 = vor.u32 %v7231_v61, %v6543_v34  ;;  %v6468_v47 = vor.u32 %v7209_v45, %v6465_v11  ;;  %v6273_v5 = vld [vmem:[%s11232_s12 + $0x2f0] sm:$0xf0]  ;;  %v6391_v40 = vld [vmem:[%s11232_s12 + $0x3c8] sm:$0xf] }
 0x610   :  { %v6084_v43 = vor.u32 %v7113_v31, %v6081_v60  ;;  %4184 = vmatpush.bf16.msra.mxu1 %v6576_v54  ;;  %v3015_v31 = vrot.slane %v9590_v55, 3  ;;  %v7241_v60 = vld [vmem:[%s11232_s12 + $0x564] sm:$0xf]  ;;  %v6452_v54 = vor.u32 %v7205_v3, %v6449_v39  ;;  %v6401_v55 = vld [vmem:[%s11232_s12 + $0x3f0] sm:$0xf0] }
 0x611   :  { %4208 = vmatpush.bf16.msra.mxu0 %v6100_v49  ;;  %v7161_v49 = vld [vmem:[%s11232_s12 + $0x2e4] sm:$0xf]  ;;  %v6545_v23 = vld [vmem:[%s11232_s12 + $0x510] sm:$0xf0]  ;;  %v7164_v39 = vld [vmem:[%s11232_s12 + $0x2f4] sm:$0xf0] }
 0x612   :  { %4199 = vmatpush.bf16.msra.mxu2 %v5908_v57  ;;  %v7199_v57 = vld [vmem:[%s11232_s12 + $0x40c] sm:$0xf0] }
 0x613   :  { %4169 = vmatpush.bf16.msra.mxu3 %v6480_v53  ;;  %v6416_v42 = vor.u32 %v7199_v57, %v6415_v20  ;;  %v6276_v53 = vor.u32 %v7161_v49, %v6273_v5  ;;  %v7185_v49 = vld [vmem:[%s11232_s12 + $0x3a4] sm:$0xf]  ;;  %v6369_v5 = vld [vmem:[%s11232_s12 + $0x3b0] sm:$0xf0] }
 0x614   :  { %4185 = vmatpush.bf16.msra.mxu1 %v6560_v29  ;;  %v6577_v29 = vld [vmem:[%s11232_s12 + $0x550] sm:$0xf0] }
 0x615   :  { %4209 = vmatpush.bf16.msra.mxu0 %v6084_v43 }
 0x617   :  { %4170 = vmatpush.bf16.msra.mxu3 %v6464_v56  ;;  %v7237_v56 = vld [vmem:[%s11232_s12 + $0x544] sm:$0xf] }
 0x618   :  { %4186 = vmatpush.bf16.msra.mxu1 %v6544_v50  ;;  %v6580_v61 = vor.u32 %v7237_v56, %v6577_v29  ;;  %v7197_v50 = vld [vmem:[%s11232_s12 + $0x404] sm:$0xf] }
 0x619   :  { %4210 = vmatpush.bf16.msra.mxu0 %v6068_v8  ;;  %v6596_v8 = vor.u32 %v7241_v60, %v6593_v10  ;;  %v6372_v10 = vor.u32 %v7185_v49, %v6369_v5  ;;  %v7172_v49 = vld [vmem:[%s11232_s12 + $0x334] sm:$0xf0] }
 0x61b   :  { %4171 = vmatpush.bf16.msra.mxu3 %v6448_v46  ;;  %v7193_v46 = vld [vmem:[%s11232_s12 + $0x3e4] sm:$0xf] }
 0x61d   :  { %4211 = vmatpush.bf16.msra.mxu0 %v6052_v2  ;;  %v7153_v2 = vld [vmem:[%s11232_s12 + $0x2a4] sm:$0xf] }
 0x61f   :  { %4172 = vmatpush.bf16.msra.mxu3 %v6432_v27  ;;  %v6244_v27 = vor.u32 %v7153_v2, %v6241_v52  ;;  %v7177_v2 = vld [vmem:[%s11232_s12 + $0x364] sm:$0xf]  ;;  %v6337_v52 = vld [vmem:[%s11232_s12 + $0x370] sm:$0xf0] }
 0x621   :  { %4212 = vmatpush.bf16.msra.mxu0 %v6036_v38  ;;  %v7233_v38 = vld [vmem:[%s11232_s12 + $0x524] sm:$0xf] }
 0x623   :  { %4173 = vmatpush.bf16.msra.mxu3 %v6416_v42  ;;  %v6420_v42 = vor.u32 %v7197_v50, %v6417_v48  ;;  %v7156_v50 = vld [vmem:[%s11232_s12 + $0x2b4] sm:$0xf0] }
 0x624   :  { %v7180_v48 = vld [vmem:[%s11232_s12 + $0x374] sm:$0xf0] }
 0x64d   :  { %v9978_v24 = vpop.permute.xlu2 %7581 }
 0x64e   :  { %v7583_v6 = vunpack.i.l.bf16 %v9978_v24  ;;  %v7584_v45 = vunpack.i.h.bf16 %v9978_v24  ;;  %v6279_v24 = vld [vmem:[%s11232_s12 + $0x2e8] sm:$0xf] }
 0x650   :  { %v3031_v16 = vsel %vm755_vm2, %v7583_v6, %v3021_v58  ;;  %v6404_v58 = vor.u32 %v7193_v46, %v6401_v55  ;;  %v7149_v6 = vld [vmem:[%s11232_s12 + $0x284] sm:$0xf]  ;;  %v6360_v46 = vor.u32 %v7184_v0, %v6359_v14  ;;  %v6247_v55 = vld [vmem:[%s11232_s12 + $0x2a8] sm:$0xf]  ;;  %v6153_v14 = vld [vmem:[%s11232_s12 + $0x1f8] sm:$0xf0] }
 0x651   :  { %v9995_v36 = vpack.c.bf16 %v3031_v16, %v3031_v16  ;;  %v6564_v16 = vor.u32 %v7233_v38, %v6561_v18  ;;  %v6340_v38 = vor.u32 %v7177_v2, %v6337_v52  ;;  %v7133_v18 = vld [vmem:[%s11232_s12 + $0x204] sm:$0xf]  ;;  %v5975_v2 = vld [vmem:[%s11232_s12 + $0x88] sm:$0xf] }
 0x653   :  { %4148 = vmatmul.bf16.vlgmr.msrb.gmra.mxu2 %v9995_v36 }
 0x654   :  { %4244 = vmatpush.bf16.msrb.mxu2 %v6532_v7  ;;  %v7189_v7 = vld [vmem:[%s11232_s12 + $0x3c4] sm:$0xf] }
 0x655   :  { %v6388_v41 = vor.u32 %v7189_v7, %v6385_v32  ;;  %v7176_v7 = vld [vmem:[%s11232_s12 + $0x354] sm:$0xf0] }
 0x658   :  { %4245 = vmatpush.bf16.msrb.mxu2 %v6516_v4  ;;  %v7229_v4 = vld [vmem:[%s11232_s12 + $0x504] sm:$0xf] }
 0x659   :  { %v6548_v11 = vor.u32 %v7229_v4, %v6545_v23 }
 0x65c   :  { %4246 = vmatpush.bf16.msrb.mxu2 %v6500_v30  ;;  %v7192_v30 = vld [vmem:[%s11232_s12 + $0x3d4] sm:$0xf0] }
 0x65d   :  { %v6392_v3 = vor.u32 %v7192_v30, %v6391_v40  ;;  %v7169_v40 = vld [vmem:[%s11232_s12 + $0x324] sm:$0xf]  ;;  %v6305_v30 = vld [vmem:[%s11232_s12 + $0x330] sm:$0xf0] }
 0x65e   :  { %v6308_v5 = vor.u32 %v7169_v40, %v6305_v30 }
 0x660   :  { %4247 = vmatpush.bf16.msrb.mxu2 %v6484_v63  ;;  %v7145_v63 = vld [vmem:[%s11232_s12 + $0x264] sm:$0xf] }
 0x663   :  { %v3025_v43 = vpop.permute.xlu0 %3024  ;;  %v3013_v13 = vpop.permute.xlu1 %3012 }
 0x664   :  { %v3032_v28 = vsel %vm755_vm2, %v3025_v43, %v3027_v12  ;;  %4248 = vmatpush.bf16.msrb.mxu2 %v6468_v47  ;;  %v3030_v19 = vsel %vm755_vm2, %v3013_v13, %v3015_v31  ;;  %v6209_v47 = vld [vmem:[%s11232_s12 + $0x270] sm:$0xf0]  ;;  %v6375_v12 = vld [vmem:[%s11232_s12 + $0x3a8] sm:$0xf]  ;;  %v7188_v31 = vld [vmem:[%s11232_s12 + $0x3b4] sm:$0xf0]  ;;  %v10169_v13 = vpack.c.bf16 %v7584_v45, %v7584_v45 }
 0x665   :  { %v10047_v1 = vpack.c.bf16 %v3032_v28, %v3032_v28  ;;  %v10049_v35 = vpack.c.bf16 %v3030_v19, %v3030_v19  ;;  %v6212_v60 = vor.u32 %v7145_v63, %v6209_v47  ;;  %v7141_v43 = vld [vmem:[%s11232_s12 + $0x244] sm:$0xf]  ;;  %v6280_v28 = vor.u32 %v7164_v39, %v6279_v24  ;;  %v6193_v19 = vld [vmem:[%s11232_s12 + $0x250] sm:$0xf0]  ;;  %v7148_v63 = vld [vmem:[%s11232_s12 + $0x274] sm:$0xf0] }
 0x666   :  { %v6376_v62 = vor.u32 %v7188_v31, %v6375_v12  ;;  %v6196_v56 = vor.u32 %v7141_v43, %v6193_v19  ;;  %v6311_v47 = vld [vmem:[%s11232_s12 + $0x328] sm:$0xf]  ;;  %v6289_v12 = vld [vmem:[%s11232_s12 + $0x310] sm:$0xf0] }
 0x667   :  { %4135 = vmatmul.bf16.vlgmr.msrb.gmra.mxu1 %v10049_v35  ;;  %4161 = vmatmul.bf16.vlgmr.msrb.gmra.mxu0 %v10047_v1  ;;  %v6199_v31 = vld [vmem:[%s11232_s12 + $0x248] sm:$0xf] }
 0x668   :  { %4218 = vmatpush.bf16.msrb.mxu1 %v6276_v53  ;;  %4249 = vmatpush.bf16.msrb.mxu2 %v6452_v54  ;;  %v7181_v53 = vld [vmem:[%s11232_s12 + $0x384] sm:$0xf]  ;;  %v6353_v54 = vld [vmem:[%s11232_s12 + $0x390] sm:$0xf0]  ;;  %v5991_v43 = vld [vmem:[%s11232_s12 + $0xa8] sm:$0xf] }
 0x669   :  { %v10075_v34 = vpop.permute.xlu2 %3000  ;;  %4261 = vmatpush.bf16.msrb.mxu0 %v6596_v8  ;;  %v6263_v8 = vld [vmem:[%s11232_s12 + $0x2c8] sm:$0xf]  ;;  %v6356_v29 = vor.u32 %v7181_v53, %v6353_v54  ;;  %v7132_v53 = vld [vmem:[%s11232_s12 + $0x1f4] sm:$0xf0] }
 0x66a   :  { %v3005_v51 = vsel %vm755_vm2, %v10075_v34, %v9731_v59  ;;  %v6407_v59 = vld [vmem:[%s11232_s12 + $0x3e8] sm:$0xf] }
 0x66b   :  { %3007 = vst [vmem:[%s11240_s20 + $0x8] sm:$0x1] %v3005_v51  ;;  %v2999_v15 = vpop.permute.xlu1 %2998  ;;  %v6408_v44 = vor.u32 %v7196_v17, %v6407_v59  ;;  %v6343_v51 = vld [vmem:[%s11232_s12 + $0x368] sm:$0xf]  ;;  %v6248_v59 = vor.u32 %v7156_v50, %v6247_v55  ;;  %v7173_v17 = vld [vmem:[%s11232_s12 + $0x344] sm:$0xf] }
 0x66c   :  { %4219 = vmatpush.bf16.msrb.mxu1 %v6260_v26  ;;  %4250 = vmatpush.bf16.msrb.mxu2 %v6436_v21  ;;  %v3004_v25 = vsel %vm755_vm2, %v2999_v15, %v9582_v22  ;;  %v3029_v20 = vsel %vm755_vm2, %v2999_v15, %v3009_v9  ;;  %v6225_v22 = vld [vmem:[%s11232_s12 + $0x290] sm:$0xf0]  ;;  %v7137_v26 = vld [vmem:[%s11232_s12 + $0x224] sm:$0xf]  ;;  %v6264_v21 = vor.u32 %v7160_v33, %v6263_v8  ;;  %v6151_v19 = vld [vmem:[%s11232_s12 + $0x1e8] sm:$0xf] }
 0x66d   :  { %3006 = vst [vmem:[%s11240_s20] sm:$0xff] %v3004_v25  ;;  %v10116_v57 = vpack.c.bf16 %v3029_v20, %v3029_v20  ;;  %4262 = vmatpush.bf16.msrb.mxu0 %v6580_v61  ;;  %v6228_v37 = vor.u32 %v7149_v6, %v6225_v22  ;;  %v6177_v9 = vld [vmem:[%s11232_s12 + $0x230] sm:$0xf0]  ;;  %v3038_v61 = vsel %vm755_vm2, %v10075_v34, %v7584_v45  ;;  %v6231_v20 = vld [vmem:[%s11232_s12 + $0x288] sm:$0xf]  ;;  %v7152_v6 = vld [vmem:[%s11232_s12 + $0x294] sm:$0xf0] }
 0x66e   :  { %v6180_v34 = vor.u32 %v7137_v26, %v6177_v9  ;;  %v6161_v15 = vld [vmem:[%s11232_s12 + $0x210] sm:$0xf0]  ;;  %v6327_v22 = vld [vmem:[%s11232_s12 + $0x348] sm:$0xf]  ;;  %v6232_v4 = vor.u32 %v7152_v6, %v6231_v20  ;;  %v7130_v33 = vld [vmem:[%s11232_s12 + $0x1ec] sm:$0xf] }
 0x66f   :  { %4122 = vmatmul.bf16.vlgmr.msrb.gmra.mxu3 %v10116_v57  ;;  %4200 = vmatmul.bf16.vlgmr.msra.gmra.mxu2 %v10116_v57  ;;  %v6321_v25 = vld [vmem:[%s11232_s12 + $0x350] sm:$0xf0]  ;;  %v6164_v32 = vor.u32 %v7133_v18, %v6161_v15  ;;  %v6007_v45 = vld [vmem:[%s11232_s12 + $0xc8] sm:$0xf]  ;;  %v7140_v9 = vld [vmem:[%s11232_s12 + $0x234] sm:$0xf0]  ;;  %v6156_v52 = vor.u32 %v7130_v33, %v6153_v14 }
 0x670   :  { %4220 = vmatpush.bf16.msrb.mxu1 %v6244_v27  ;;  %4231 = vmatpush.bf16.msrb.mxu3 %v6404_v58  ;;  %v10227_v27 = vpack.c.bf16 %v3038_v61, %v3038_v61  ;;  %v6344_v58 = vor.u32 %v7180_v48, %v6343_v51  ;;  %v6295_v54 = vld [vmem:[%s11232_s12 + $0x308] sm:$0xf]  ;;  %v7088_v61 = vld [vmem:[%s11232_s12 + $0x94] sm:$0xf0]  ;;  %v7126_v50 = vld [vmem:[%s11232_s12 + $0x1cc] sm:$0xf] }
 0x671   :  { %4251 = vmatpush.bf16.msrb.mxu2 %v6420_v42  ;;  %4263 = vmatpush.bf16.msrb.mxu0 %v6564_v16  ;;  %v6023_v42 = vld [vmem:[%s11232_s12 + $0xe8] sm:$0xf]  ;;  %v7100_v16 = vld [vmem:[%s11232_s12 + $0xf4] sm:$0xf0]  ;;  %v6137_v51 = vld [vmem:[%s11232_s12 + $0x1d8] sm:$0xf0] }
 0x672   :  { %v6024_v23 = vor.u32 %v7100_v16, %v6023_v42  ;;  %v7128_v55 = vld [vmem:[%s11232_s12 + $0x1d4] sm:$0xf0]  ;;  %v6119_v20 = vld [vmem:[%s11232_s12 + $0x1a8] sm:$0xf]  ;;  %v7098_v6 = vld [vmem:[%s11232_s12 + $0xec] sm:$0xf] }
 0x673   :  { %v7136_v15 = vld [vmem:[%s11232_s12 + $0x214] sm:$0xf0]  ;;  %v6025_v42 = vld [vmem:[%s11232_s12 + $0xf8] sm:$0xf0]  ;;  %v7122_v16 = vld [vmem:[%s11232_s12 + $0x1ac] sm:$0xf] }
 0x674   :  { %4221 = vmatpush.bf16.msrb.mxu1 %v6228_v37  ;;  %4232 = vmatpush.bf16.msrb.mxu3 %v6388_v41  ;;  %v6215_v37 = vld [vmem:[%s11232_s12 + $0x268] sm:$0xf]  ;;  %v6328_v41 = vor.u32 %v7176_v7, %v6327_v22  ;;  %v6121_v22 = vld [vmem:[%s11232_s12 + $0x1b8] sm:$0xf0]  ;;  %v6028_v40 = vor.u32 %v7098_v6, %v6025_v42 }
 0x675   :  { %4309 = vmatpush.bf16.msra.mxu2 %v6408_v44  ;;  %4264 = vmatpush.bf16.msrb.mxu0 %v6548_v11  ;;  %v6324_v44 = vor.u32 %v7173_v17, %v6321_v25  ;;  %v7096_v11 = vld [vmem:[%s11232_s12 + $0xd4] sm:$0xf0]  ;;  %v6216_v24 = vor.u32 %v7148_v63, %v6215_v37  ;;  %v6140_v25 = vor.u32 %v7126_v50, %v6137_v51  ;;  %v6103_v37 = vld [vmem:[%s11232_s12 + $0x188] sm:$0xf]  ;;  %v7094_v63 = vld [vmem:[%s11232_s12 + $0xcc] sm:$0xf] }
 0x676   :  { %v6008_v39 = vor.u32 %v7096_v11, %v6007_v45  ;;  %v7084_v17 = vld [vmem:[%s11232_s12 + $0x74] sm:$0xf0]  ;;  %v6124_v30 = vor.u32 %v7122_v16, %v6121_v22  ;;  %v6009_v45 = vld [vmem:[%s11232_s12 + $0xd8] sm:$0xf0]  ;;  %v7118_v11 = vld [vmem:[%s11232_s12 + $0x18c] sm:$0xf] }
 0x677   :  { %6605 = vmatmul.msk.bf16.vlgmr.msra.gmra.mxu1 %vm755_vm2, %v10169_v13  ;;  %4213 = vmatmul.bf16.vlgmr.msra.gmra.mxu0 %v10049_v35  ;;  %v6055_v51 = vld [vmem:[%s11232_s12 + $0x128] sm:$0xf]  ;;  %v7104_v16 = vld [vmem:[%s11232_s12 + $0x114] sm:$0xf0]  ;;  %v7078_v22 = vld [vmem:[%s11232_s12 + $0x4c] sm:$0xf] }
 0x678   :  { %4222 = vmatpush.bf16.msrb.mxu1 %v6212_v60  ;;  %4233 = vmatpush.bf16.msrb.mxu3 %v6372_v10  ;;  %v7144_v60 = vld [vmem:[%s11232_s12 + $0x254] sm:$0xf0]  ;;  %v6312_v10 = vor.u32 %v7172_v49, %v6311_v47  ;;  %v6105_v47 = vld [vmem:[%s11232_s12 + $0x198] sm:$0xf0] }
 0x679   :  { %4310 = vmatpush.bf16.msra.mxu2 %v6392_v3  ;;  %4296 = vmatpush.bf16.msra.mxu0 %v6280_v28  ;;  %v7165_v3 = vld [vmem:[%s11232_s12 + $0x304] sm:$0xf]  ;;  %v7092_v28 = vld [vmem:[%s11232_s12 + $0xb4] sm:$0xf0]  ;;  %v6200_v0 = vor.u32 %v7144_v60, %v6199_v31  ;;  %v6087_v31 = vld [vmem:[%s11232_s12 + $0x168] sm:$0xf] }
 0x67a   :  { %v6292_v8 = vor.u32 %v7165_v3, %v6289_v12  ;;  %v5927_v3 = vld [vmem:[%s11232_s12 + $0x28] sm:$0xf]  ;;  %v6108_v12 = vor.u32 %v7118_v11, %v6105_v47  ;;  %v7116_v60 = vld [vmem:[%s11232_s12 + $0x174] sm:$0xf0] }
 0x67c   :  { %4223 = vmatpush.bf16.msrb.mxu1 %v6196_v56  ;;  %4234 = vmatpush.bf16.msrb.mxu3 %v6356_v29  ;;  %v5992_v56 = vor.u32 %v7092_v28, %v5991_v43  ;;  %v6152_v29 = vor.u32 %v7132_v53, %v6151_v19  ;;  %v5993_v43 = vld [vmem:[%s11232_s12 + $0xb8] sm:$0xf0]  ;;  %v7114_v28 = vld [vmem:[%s11232_s12 + $0x16c] sm:$0xf] }
 0x67d   :  { %4311 = vmatpush.bf16.msra.mxu2 %v6376_v62  ;;  %4297 = vmatpush.bf16.msra.mxu0 %v6264_v21  ;;  %v7168_v62 = vld [vmem:[%s11232_s12 + $0x314] sm:$0xf0]  ;;  %v6183_v21 = vld [vmem:[%s11232_s12 + $0x228] sm:$0xf]  ;;  %v6089_v19 = vld [vmem:[%s11232_s12 + $0x178] sm:$0xf0] }
 0x67e   :  { %v6296_v26 = vor.u32 %v7168_v62, %v6295_v54  ;;  %v6184_v48 = vor.u32 %v7140_v9, %v6183_v21  ;;  %v6088_v54 = vor.u32 %v7116_v60, %v6087_v31  ;;  %v5911_v62 = vld [vmem:[%s11232_s12 + $0x8] sm:$0xf]  ;;  %v6092_v14 = vor.u32 %v7114_v28, %v6089_v19  ;;  %v7228_v9 = vld [vmem:[%s11232_s12 + $0x4f4] sm:$0xf0]  ;;  %v7158_v31 = vld [vmem:[%s11232_s12 + $0x2cc] sm:$0xf] }
 0x67f   :  { %4174 = vmatmul.bf16.vlgmr.msra.gmra.mxu3 %v10227_v27  ;;  %4252 = vmatmul.bf16.vlgmr.msrb.gmra.mxu2 %v10227_v27  ;;  %v6535_v21 = vld [vmem:[%s11232_s12 + $0x4e8] sm:$0xf]  ;;  %v6265_v60 = vld [vmem:[%s11232_s12 + $0x2d8] sm:$0xf0] }
 0x680   :  { %4224 = vmatpush.bf16.msrb.mxu1 %v6180_v34  ;;  %4235 = vmatpush.bf16.msrb.mxu3 %v6340_v38  ;;  %v6167_v34 = vld [vmem:[%s11232_s12 + $0x208] sm:$0xf]  ;;  %v5976_v38 = vor.u32 %v7088_v61, %v5975_v2  ;;  %v7110_v2 = vld [vmem:[%s11232_s12 + $0x14c] sm:$0xf]  ;;  %v6536_v50 = vor.u32 %v7228_v9, %v6535_v21  ;;  %v6585_v28 = vld [vmem:[%s11232_s12 + $0x558] sm:$0xf0] }
 0x681   :  { %4312 = vmatpush.bf16.msra.mxu2 %v6360_v46  ;;  %4298 = vmatpush.bf16.msra.mxu0 %v6248_v59  ;;  %v6135_v46 = vld [vmem:[%s11232_s12 + $0x1c8] sm:$0xf]  ;;  %v6168_v7 = vor.u32 %v7136_v15, %v6167_v34  ;;  %v7082_v34 = vld [vmem:[%s11232_s12 + $0x6c] sm:$0xf]  ;;  %v6537_v21 = vld [vmem:[%s11232_s12 + $0x4f8] sm:$0xf0] }
 0x682   :  { %v6136_v18 = vor.u32 %v7128_v55, %v6135_v46  ;;  %v5959_v59 = vld [vmem:[%s11232_s12 + $0x68] sm:$0xf]  ;;  %v7234_v9 = vld [vmem:[%s11232_s12 + $0x52c] sm:$0xf] }
 0x683   :  { %v6519_v15 = vld [vmem:[%s11232_s12 + $0x4c8] sm:$0xf] }
 0x684   :  { %4225 = vmatpush.bf16.msrb.mxu1 %v6164_v32  ;;  %4236 = vmatpush.bf16.msrb.mxu3 %v6324_v44  ;;  %v5960_v32 = vor.u32 %v7084_v17, %v5959_v59  ;;  %v7224_v59 = vld [vmem:[%s11232_s12 + $0x4d4] sm:$0xf0]  ;;  %v7106_v17 = vld [vmem:[%s11232_s12 + $0x12c] sm:$0xf] }
 0x685   :  { %4313 = vmatpush.bf16.msra.mxu2 %v6344_v58  ;;  %4299 = vmatpush.bf16.msra.mxu0 %v6232_v4  ;;  %v7124_v58 = vld [vmem:[%s11232_s12 + $0x1b4] sm:$0xf0]  ;;  %v5943_v4 = vld [vmem:[%s11232_s12 + $0x48] sm:$0xf]  ;;  %v6520_v42 = vor.u32 %v7224_v59, %v6519_v15  ;;  %v7230_v15 = vld [vmem:[%s11232_s12 + $0x50c] sm:$0xf] }
 0x686   :  { %v6120_v44 = vor.u32 %v7124_v58, %v6119_v20  ;;  %v6039_v58 = vld [vmem:[%s11232_s12 + $0x108] sm:$0xf]  ;;  %v6553_v59 = vld [vmem:[%s11232_s12 + $0x518] sm:$0xf0] }
 0x687   :  { %4226 = vmatmul.bf16.vlgmr.msrb.gmra.mxu1 %v9995_v36  ;;  %6606 = vmatmul.msk.bf16.vlgmr.msrb.gmra.mxu0 %vm755_vm2, %v10169_v13 }
 0x688   :  { %4270 = vmatpush.bf16.msra.mxu1 %v6024_v23  ;;  %4237 = vmatpush.bf16.msrb.mxu3 %v6308_v5  ;;  %v7080_v23 = vld [vmem:[%s11232_s12 + $0x54] sm:$0xf0] }
 0x689   :  { %4314 = vmatpush.bf16.msra.mxu2 %v6328_v41  ;;  %4300 = vmatpush.bf16.msra.mxu0 %v6216_v24  ;;  %v7120_v41 = vld [vmem:[%s11232_s12 + $0x194] sm:$0xf0]  ;;  %v5944_v49 = vor.u32 %v7080_v23, %v5943_v4  ;;  %v7102_v23 = vld [vmem:[%s11232_s12 + $0x10c] sm:$0xf] }
 0x68a   :  { %v6104_v5 = vor.u32 %v7120_v41, %v6103_v37  ;;  %v7076_v24 = vld [vmem:[%s11232_s12 + $0x34] sm:$0xf0]  ;;  %v6281_v37 = vld [vmem:[%s11232_s12 + $0x2f8] sm:$0xf0]  ;;  %v6040_v41 = vor.u32 %v7104_v16, %v6039_v58 }
 0x68b   :  { %v5928_v53 = vor.u32 %v7076_v24, %v5927_v3  ;;  %v7220_v4 = vld [vmem:[%s11232_s12 + $0x4b4] sm:$0xf0]  ;;  %v7074_v3 = vld [vmem:[%s11232_s12 + $0x2c] sm:$0xf]  ;;  %v5929_v24 = vld [vmem:[%s11232_s12 + $0x38] sm:$0xf0] }
 0x68c   :  { %4271 = vmatpush.bf16.msra.mxu1 %v6008_v39  ;;  %4238 = vmatpush.bf16.msrb.mxu3 %v6292_v8  ;;  %v6012_v39 = vor.u32 %v7094_v63, %v6009_v45  ;;  %v7072_v8 = vld [vmem:[%s11232_s12 + $0x14] sm:$0xf0]  ;;  %v7242_v63 = vld [vmem:[%s11232_s12 + $0x56c] sm:$0xf]  ;;  %v6601_v45 = vld [vmem:[%s11232_s12 + $0x578] sm:$0xf0]  ;;  %v5932_v19 = vor.u32 %v7074_v3, %v5929_v24 }
 0x68d   :  { %4315 = vmatpush.bf16.msra.mxu2 %v6312_v10  ;;  %4301 = vmatpush.bf16.msra.mxu0 %v6200_v0  ;;  %v7090_v10 = vld [vmem:[%s11232_s12 + $0xac] sm:$0xf]  ;;  %v6071_v0 = vld [vmem:[%s11232_s12 + $0x148] sm:$0xf]  ;;  %v5912_v61 = vor.u32 %v7072_v8, %v5911_v62  ;;  %v6268_v62 = vor.u32 %v7158_v31, %v6265_v60  ;;  %v5913_v8 = vld [vmem:[%s11232_s12 + $0x18] sm:$0xf0] }
 0x68e   :  { %v5996_v33 = vor.u32 %v7090_v10, %v5993_v43  ;;  %v6604_v10 = vor.u32 %v7242_v63, %v6601_v45  ;;  %v7238_v43 = vld [vmem:[%s11232_s12 + $0x54c] sm:$0xf]  ;;  %v6217_v16 = vld [vmem:[%s11232_s12 + $0x278] sm:$0xf0]  ;;  %v6599_v45 = vld [vmem:[%s11232_s12 + $0x568] sm:$0xf] }
 0x68f   :  { %4239 = vmatmul.bf16.vlgmr.msrb.gmra.mxu3 %v10047_v1  ;;  %v6489_v63 = vld [vmem:[%s11232_s12 + $0x498] sm:$0xf0]  ;;  %v7138_v24 = vld [vmem:[%s11232_s12 + $0x22c] sm:$0xf]  ;;  %v6583_v60 = vld [vmem:[%s11232_s12 + $0x548] sm:$0xf] }
 0x690   :  { %4272 = vmatpush.bf16.msra.mxu1 %v5992_v56  ;;  %4283 = vmatpush.bf16.msra.mxu3 %v6152_v29  ;;  %v7112_v56 = vld [vmem:[%s11232_s12 + $0x154] sm:$0xf0]  ;;  %v7086_v29 = vld [vmem:[%s11232_s12 + $0x8c] sm:$0xf]  ;;  %v6473_v31 = vld [vmem:[%s11232_s12 + $0x478] sm:$0xf0] }
 0x691   :  { %4316 = vmatpush.bf16.msra.mxu2 %v6296_v26  ;;  %4302 = vmatpush.bf16.msra.mxu0 %v6184_v48  ;;  %v5977_v26 = vld [vmem:[%s11232_s12 + $0x98] sm:$0xf0]  ;;  %v6072_v46 = vor.u32 %v7112_v56, %v6071_v0  ;;  %v7108_v48 = vld [vmem:[%s11232_s12 + $0x134] sm:$0xf0]  ;;  %v7154_v0 = vld [vmem:[%s11232_s12 + $0x2ac] sm:$0xf] }
 0x692   :  { %v5980_v55 = vor.u32 %v7086_v29, %v5977_v26  ;;  %v6056_v20 = vor.u32 %v7108_v48, %v6055_v51  ;;  %v6249_v56 = vld [vmem:[%s11232_s12 + $0x2b8] sm:$0xf0]  ;;  %v7226_v29 = vld [vmem:[%s11232_s12 + $0x4ec] sm:$0xf]  ;;  %v6588_v26 = vor.u32 %v7238_v43, %v6585_v28 }
 0x693   :  { %v6540_v51 = vor.u32 %v7226_v29, %v6537_v21  ;;  %v7150_v48 = vld [vmem:[%s11232_s12 + $0x28c] sm:$0xf]  ;;  %v6441_v21 = vld [vmem:[%s11232_s12 + $0x438] sm:$0xf0] }
 0x694   :  { %4317 = vmatmul.bf16.vlgmr.msra.gmra.mxu2 %v10047_v1  ;;  %4273 = vmatpush.bf16.msra.mxu1 %v5976_v38 }
 0x695   :  { %4361 = vmatpush.bf16.msrb.mxu2 %v6156_v52  ;;  %4284 = vmatpush.bf16.msra.mxu3 %v6136_v18  ;;  %v6073_v52 = vld [vmem:[%s11232_s12 + $0x158] sm:$0xf0] }
 0x696   :  { %4303 = vmatpush.bf16.msra.mxu0 %v6168_v7  ;;  %v6076_v38 = vor.u32 %v7110_v2, %v6073_v52  ;;  %v5961_v18 = vld [vmem:[%s11232_s12 + $0x78] sm:$0xf0] }
 0x697   :  { %v5964_v6 = vor.u32 %v7082_v34, %v5961_v18  ;;  %v5945_v7 = vld [vmem:[%s11232_s12 + $0x58] sm:$0xf0]  ;;  %v7222_v34 = vld [vmem:[%s11232_s12 + $0x4cc] sm:$0xf] }
 0x698   :  { %4274 = vmatpush.bf16.msra.mxu1 %v5960_v32  ;;  %v5948_v11 = vor.u32 %v7078_v22, %v5945_v7  ;;  %v6569_v2 = vld [vmem:[%s11232_s12 + $0x538] sm:$0xf0]  ;;  %v6556_v22 = vor.u32 %v7230_v15, %v6553_v59  ;;  %v7218_v7 = vld [vmem:[%s11232_s12 + $0x4ac] sm:$0xf] }
 0x699   :  { %4362 = vmatpush.bf16.msrb.mxu2 %v6140_v25  ;;  %4285 = vmatpush.bf16.msra.mxu3 %v6120_v44  ;;  %v6057_v25 = vld [vmem:[%s11232_s12 + $0x138] sm:$0xf0]  ;;  %v6503_v44 = vld [vmem:[%s11232_s12 + $0x4a8] sm:$0xf]  ;;  %v7186_v15 = vld [vmem:[%s11232_s12 + $0x3ac] sm:$0xf] }
 0x69a   :  { %4348 = vmatpush.bf16.msrb.mxu0 %v6028_v40  ;;  %v6060_v32 = vor.u32 %v7106_v17, %v6057_v25  ;;  %v6041_v40 = vld [vmem:[%s11232_s12 + $0x118] sm:$0xf0]  ;;  %v6504_v47 = vor.u32 %v7220_v4, %v6503_v44 }
 0x69b   :  { %4304 = vmatmul.bf16.vlgmr.msra.gmra.mxu0 %v9995_v36  ;;  %v6521_v18 = vld [vmem:[%s11232_s12 + $0x4d8] sm:$0xf0] }
 0x69c   :  { %4275 = vmatpush.bf16.msra.mxu1 %v5944_v49  ;;  %v6044_v49 = vor.u32 %v7102_v23, %v6041_v40  ;;  %v6524_v58 = vor.u32 %v7222_v34, %v6521_v18  ;;  %v6423_v23 = vld [vmem:[%s11232_s12 + $0x408] sm:$0xf]  ;;  %v6393_v34 = vld [vmem:[%s11232_s12 + $0x3d8] sm:$0xf0] }
 0x69d   :  { %4363 = vmatpush.bf16.msrb.mxu2 %v6124_v30  ;;  %4286 = vmatpush.bf16.msra.mxu3 %v6104_v5  ;;  %v7162_v30 = vld [vmem:[%s11232_s12 + $0x2ec] sm:$0xf] }
 0x69e   :  { %4349 = vmatpush.bf16.msrb.mxu0 %v6012_v39  ;;  %v6284_v5 = vor.u32 %v7162_v30, %v6281_v37  ;;  %v6487_v39 = vld [vmem:[%s11232_s12 + $0x488] sm:$0xf]  ;;  %v7142_v30 = vld [vmem:[%s11232_s12 + $0x24c] sm:$0xf]  ;;  %v6201_v37 = vld [vmem:[%s11232_s12 + $0x258] sm:$0xf0] }
 0x6a0   :  { %4276 = vmatpush.bf16.msra.mxu1 %v5928_v53  ;;  %v7070_v53 = vld [vmem:[%s11232_s12 + $0xc] sm:$0xf] }
 0x6a1   :  { %4364 = vmatpush.bf16.msrb.mxu2 %v6108_v12  ;;  %4287 = vmatpush.bf16.msra.mxu3 %v6088_v54  ;;  %v7216_v12 = vld [vmem:[%s11232_s12 + $0x494] sm:$0xf0]  ;;  %v5916_v52 = vor.u32 %v7070_v53, %v5913_v8  ;;  %v7134_v53 = vld [vmem:[%s11232_s12 + $0x20c] sm:$0xf]  ;;  %v6457_v8 = vld [vmem:[%s11232_s12 + $0x458] sm:$0xf0] }
 0x6a2   :  { %4350 = vmatpush.bf16.msrb.mxu0 %v5996_v33  ;;  %v6488_v54 = vor.u32 %v7216_v12, %v6487_v39  ;;  %v6471_v33 = vld [vmem:[%s11232_s12 + $0x468] sm:$0xf]  ;;  %v6185_v39 = vld [vmem:[%s11232_s12 + $0x238] sm:$0xf0]  ;;  %v7210_v12 = vld [vmem:[%s11232_s12 + $0x46c] sm:$0xf] }
 0x6a3   :  { %v6188_v43 = vor.u32 %v7138_v24, %v6185_v39  ;;  %v6476_v28 = vor.u32 %v7210_v12, %v6473_v31 }
 0x6a4   :  { %4277 = vmatpush.bf16.msra.mxu1 %v5912_v61 }
 0x6a5   :  { %4365 = vmatpush.bf16.msrb.mxu2 %v6092_v14  ;;  %4288 = vmatpush.bf16.msra.mxu3 %v6072_v46  ;;  %v7212_v14 = vld [vmem:[%s11232_s12 + $0x474] sm:$0xf0]  ;;  %v6252_v46 = vor.u32 %v7154_v0, %v6249_v56 }
 0x6a6   :  { %4351 = vmatpush.bf16.msrb.mxu0 %v5980_v55  ;;  %v6472_v61 = vor.u32 %v7212_v14, %v6471_v33  ;;  %v6455_v55 = vld [vmem:[%s11232_s12 + $0x448] sm:$0xf]  ;;  %v7236_v14 = vld [vmem:[%s11232_s12 + $0x534] sm:$0xf0] }
 0x6a7   :  { %4278 = vmatmul.bf16.vlgmr.msra.gmra.mxu1 %v10116_v57  ;;  %v6567_v33 = vld [vmem:[%s11232_s12 + $0x528] sm:$0xf] }
 0x6a8   :  { %4322 = vmatpush.bf16.msrb.mxu1 %v6536_v50  ;;  %v7208_v50 = vld [vmem:[%s11232_s12 + $0x454] sm:$0xf0]  ;;  %v6568_v29 = vor.u32 %v7236_v14, %v6567_v33 }
 0x6a9   :  { %4366 = vmatpush.bf16.msrb.mxu2 %v6076_v38  ;;  %4289 = vmatpush.bf16.msra.mxu3 %v6056_v20  ;;  %v6572_v38 = vor.u32 %v7234_v9, %v6569_v2  ;;  %v6456_v17 = vor.u32 %v7208_v50, %v6455_v55  ;;  %v6439_v20 = vld [vmem:[%s11232_s12 + $0x428] sm:$0xf]  ;;  %v7232_v2 = vld [vmem:[%s11232_s12 + $0x514] sm:$0xf0] }
 0x6aa   :  { %4352 = vmatpush.bf16.msrb.mxu0 %v5964_v6  ;;  %v7204_v6 = vld [vmem:[%s11232_s12 + $0x434] sm:$0xf0]  ;;  %v6551_v9 = vld [vmem:[%s11232_s12 + $0x508] sm:$0xf] }
 0x6ab   :  { %v6440_v44 = vor.u32 %v7204_v6, %v6439_v20  ;;  %v6552_v55 = vor.u32 %v7232_v2, %v6551_v9  ;;  %v7178_v6 = vld [vmem:[%s11232_s12 + $0x36c] sm:$0xf] }
 0x6ac   :  { %4323 = vmatpush.bf16.msrb.mxu1 %v6520_v42  ;;  %v7146_v42 = vld [vmem:[%s11232_s12 + $0x26c] sm:$0xf] }
 0x6ad   :  { %4367 = vmatpush.bf16.msrb.mxu2 %v6060_v32  ;;  %4290 = vmatpush.bf16.msra.mxu3 %v6040_v41  ;;  %v6505_v32 = vld [vmem:[%s11232_s12 + $0x4b8] sm:$0xf0]  ;;  %v6220_v4 = vor.u32 %v7146_v42, %v6217_v16  ;;  %v7214_v41 = vld [vmem:[%s11232_s12 + $0x48c] sm:$0xf] }
 0x6ae   :  { %4353 = vmatpush.bf16.msrb.mxu0 %v5948_v11  ;;  %v6508_v40 = vor.u32 %v7218_v7, %v6505_v32  ;;  %v7244_v11 = vld [vmem:[%s11232_s12 + $0x574] sm:$0xf0]  ;;  %v7174_v16 = vld [vmem:[%s11232_s12 + $0x34c] sm:$0xf] }
 0x6af   :  { %v6600_v3 = vor.u32 %v7244_v11, %v6599_v45  ;;  %v7170_v32 = vld [vmem:[%s11232_s12 + $0x32c] sm:$0xf]  ;;  %v10749_v45 = vld [vmem:[%s11233_s13] sm:$0xf] }
 0x6b0   :  { %4324 = vmatpush.bf16.msrb.mxu1 %v6504_v47  ;;  %4291 = vmatmul.bf16.vlgmr.msra.gmra.mxu3 %v10049_v35  ;;  %v4103_v11 = vperm.slane %v10749_v45, 0 }
 0x6b1   :  { %4368 = vmatpush.bf16.msrb.mxu2 %v6044_v49  ;;  %4374 = vmatpush.bf16.msrb.mxu3 %v6284_v5  ;;  %v6204_v49 = vor.u32 %v7142_v30, %v6201_v37  ;;  %v6492_v5 = vor.u32 %v7214_v41, %v6489_v63 }
 0x6b2   :  { %4354 = vmatpush.bf16.msrb.mxu0 %v5932_v19 }
 0x6b4   :  { %4369 = vmatmul.bf16.vlgmr.msrb.gmra.mxu2 %v10049_v35  ;;  %4325 = vmatpush.bf16.msrb.mxu1 %v6488_v54  ;;  %v6233_v35 = vld [vmem:[%s11232_s12 + $0x298] sm:$0xf0] }
 0x6b5   :  { %4417 = vmatpush.bf16.msra.mxu2 %v6604_v10  ;;  %4375 = vmatpush.bf16.msrb.mxu3 %v6268_v62  ;;  %v6236_v25 = vor.u32 %v7150_v48, %v6233_v35  ;;  %v7240_v10 = vld [vmem:[%s11232_s12 + $0x554] sm:$0xf0]  ;;  %v6169_v54 = vld [vmem:[%s11232_s12 + $0x218] sm:$0xf0]  ;;  %v7206_v62 = vld [vmem:[%s11232_s12 + $0x44c] sm:$0xf] }
 0x6b6   :  { %4355 = vmatpush.bf16.msrb.mxu0 %v5916_v52  ;;  %v6584_v19 = vor.u32 %v7240_v10, %v6583_v60  ;;  %v6172_v0 = vor.u32 %v7134_v53, %v6169_v54  ;;  %v6460_v56 = vor.u32 %v7206_v62, %v6457_v8  ;;  %v7194_v52 = vld [vmem:[%s11232_s12 + $0x3ec] sm:$0xf]  ;;  %v6425_v48 = vld [vmem:[%s11232_s12 + $0x418] sm:$0xf0] }
 0x6b7   :  { %v7190_v35 = vld [vmem:[%s11232_s12 + $0x3cc] sm:$0xf] }
 0x6b8   :  { %4326 = vmatpush.bf16.msrb.mxu1 %v6472_v61  ;;  %v6409_v61 = vld [vmem:[%s11232_s12 + $0x3f8] sm:$0xf0]  ;;  %v6396_v18 = vor.u32 %v7190_v35, %v6393_v34 }
 0x6b9   :  { %4418 = vmatpush.bf16.msra.mxu2 %v6588_v26  ;;  %4376 = vmatpush.bf16.msrb.mxu3 %v6252_v46  ;;  %v7202_v26 = vld [vmem:[%s11232_s12 + $0x42c] sm:$0xf]  ;;  %v6412_v50 = vor.u32 %v7194_v52, %v6409_v61 }
 0x6ba   :  { %4400 = vmatpush.bf16.msra.mxu0 %v6540_v51  ;;  %v6444_v46 = vor.u32 %v7202_v26, %v6441_v21  ;;  %v7198_v51 = vld [vmem:[%s11232_s12 + $0x40c] sm:$0xf] }
 0x6bb   :  { %4356 = vmatmul.bf16.vlgmr.msrb.gmra.mxu0 %v10116_v57  ;;  %v7200_v57 = vld [vmem:[%s11232_s12 + $0x414] sm:$0xf0] }
 0x6bc   :  { %4327 = vmatpush.bf16.msrb.mxu1 %v6456_v17  ;;  %v6424_v47 = vor.u32 %v7200_v57, %v6423_v23  ;;  %v7182_v17 = vld [vmem:[%s11232_s12 + $0x38c] sm:$0xf]  ;;  %v6297_v57 = vld [vmem:[%s11232_s12 + $0x318] sm:$0xf0] }
 0x6bd   :  { %4419 = vmatpush.bf16.msra.mxu2 %v6572_v38  ;;  %4377 = vmatpush.bf16.msrb.mxu3 %v6236_v25  ;;  %v6428_v38 = vor.u32 %v7198_v51, %v6425_v48  ;;  %v6361_v25 = vld [vmem:[%s11232_s12 + $0x398] sm:$0xf0]  ;;  %v7166_v23 = vld [vmem:[%s11232_s12 + $0x30c] sm:$0xf] }
 0x6be   :  { %4401 = vmatpush.bf16.msra.mxu0 %v6524_v58  ;;  %v6364_v58 = vor.u32 %v7182_v17, %v6361_v25  ;;  %v6300_v37 = vor.u32 %v7166_v23, %v6297_v57  ;;  %v7275_v23 = vld [vmem:[%s11234_s14 + $0xec] sm:$0xf0]  ;;  %v7273_v57 = vld [vmem:[%s11234_s14 + $0xe4] sm:$0xf] }
 0x6c0   :  { %4328 = vmatpush.bf16.msrb.mxu1 %v6440_v44  ;;  %v6313_v44 = vld [vmem:[%s11232_s12 + $0x338] sm:$0xf0] }
 0x6c1   :  { %4420 = vmatpush.bf16.msra.mxu2 %v6556_v22  ;;  %4378 = vmatpush.bf16.msrb.mxu3 %v6220_v4  ;;  %v6316_v4 = vor.u32 %v7170_v32, %v6313_v44 }
 0x6c2   :  { %4402 = vmatpush.bf16.msra.mxu0 %v6508_v40 }
 0x6c4   :  { %6608 = vmatmul.msk.bf16.vlgmr.msra.gmra.mxu2 %vm755_vm2, %v10169_v13  ;;  %4329 = vmatpush.bf16.msrb.mxu1 %v6424_v47  ;;  %v4104_v47 = vperm.slane %v10749_v45, 1 }
 0x6c5   :  { %4379 = vmatpush.bf16.msrb.mxu3 %v6204_v49 }
 0x6c6   :  { %4403 = vmatpush.bf16.msra.mxu0 %v6492_v5 }
 0x6c7   :  { %4330 = vmatmul.bf16.vlgmr.msrb.gmra.mxu1 %v10227_v27 }
 0x6c8   :  { %4339 = vmatpush.bf16.msra.mxu1 %v6600_v3 }
 0x6c9   :  { %4380 = vmatpush.bf16.msrb.mxu3 %v6188_v43 }
 0x6ca   :  { %4404 = vmatpush.bf16.msra.mxu0 %v6476_v28 }
 0x6cc   :  { %4340 = vmatpush.bf16.msra.mxu1 %v6584_v19 }
 0x6cd   :  { %4381 = vmatpush.bf16.msrb.mxu3 %v6172_v0 }
 0x6ce   :  { %4405 = vmatpush.bf16.msra.mxu0 %v6460_v56 }
 0x6d0   :  { %4341 = vmatpush.bf16.msra.mxu1 %v6568_v29  ;;  %4382 = vmatmul.bf16.vlgmr.msrb.gmra.mxu3 %v9995_v36  ;;  %v6377_v36 = vld [vmem:[%s11232_s12 + $0x3b8] sm:$0xf0] }
 0x6d1   :  { %v6380_v59 = vor.u32 %v7186_v15, %v6377_v36  ;;  %v4105_v15 = vperm.slane %v10749_v45, 2 }
 0x6d2   :  { %4406 = vmatpush.bf16.msra.mxu0 %v6444_v46 }
 0x6d4   :  { %4342 = vmatpush.bf16.msra.mxu1 %v6552_v55 }
 0x6d6   :  { %4407 = vmatpush.bf16.msra.mxu0 %v6428_v38  ;;  %v4149_v20 = vpop.f32.mrf.mxu2 }
 0x6d7   :  { %6607 = vmatmul.msk.bf16.vlgmr.msra.gmra.mxu1 %vm755_vm2, %v10169_v13  ;;  %v6345_v13 = vld [vmem:[%s11232_s12 + $0x378] sm:$0xf0] }
 0x6d8   :  { %4387 = vmatpush.bf16.msrb.mxu1 %v6412_v50  ;;  %v6348_v42 = vor.u32 %v7178_v6, %v6345_v13 }
 0x6d9   :  { %4408 = vmatmul.bf16.vlgmr.msra.gmra.mxu0 %v10227_v27  ;;  %v6329_v27 = vld [vmem:[%s11232_s12 + $0x358] sm:$0xf0] }
 0x6da   :  { %v6332_v7 = vor.u32 %v7174_v16, %v6329_v27 }
 0x6dc   :  { %4388 = vmatpush.bf16.msrb.mxu1 %v6396_v18 }
 0x6de   :  { %v4151_v22 = vpop.f32.mrf.mxu2 }
 0x6e0   :  { %4389 = vmatpush.bf16.msrb.mxu1 %v6380_v59 }
 0x6e4   :  { %4390 = vmatpush.bf16.msrb.mxu1 %v6364_v58  ;;  %v4136_v40 = vpop.f32.mrf.mxu1  ;;  %v4162_v30 = vpop.f32.mrf.mxu0 }
 0x6e8   :  { %4391 = vmatpush.bf16.msrb.mxu1 %v6348_v42 }
 0x6ec   :  { %4392 = vmatpush.bf16.msrb.mxu1 %v6332_v7  ;;  %v4138_v41 = vpop.f32.mrf.mxu1  ;;  %v4164_v63 = vpop.f32.mrf.mxu0 }
 0x6ed   :  { %v6856_v41 = vld [vmem:[%s11234_s14 + $0x1f0] sm:$0xf0] }
 0x6f0   :  { %4393 = vmatpush.bf16.msrb.mxu1 %v6316_v4  ;;  %v6726_v4 = vld [vmem:[%s11234_s14 + $0xe0] sm:$0xf] }
 0x6f2   :  { %v4123_v49 = vpop.f32.mrf.mxu3  ;;  %v4201_v5 = vpop.f32.mrf.mxu2 }
 0x6f3   :  { %v4124_v3 = vadd.f32 %v4123_v49, %v4103_v11  ;;  %v4202_v24 = vadd.f32 %v4201_v5, %v4104_v47  ;;  %v6710_v49 = vld [vmem:[%s11234_s14 + $0xc0] sm:$0xf]  ;;  %v7271_v5 = vld [vmem:[%s11234_s14 + $0xcc] sm:$0xf0] }
 0x6f4   :  { %4394 = vmatpush.bf16.msrb.mxu1 %v6300_v37  ;;  %v4188_v39 = vpop.f32.mrf.mxu1  ;;  %v4214_v12 = vpop.f32.mrf.mxu0  ;;  %v7305_v37 = vld [vmem:[%s11234_s14 + $0x1e4] sm:$0xf] }
 0x6f5   :  { %v4137_v31 = vadd.f32 %v4136_v40, %v4124_v3  ;;  %v4215_v60 = vadd.f32 %v4214_v12, %v4202_v24  ;;  %v6727_v40 = vor.u32 %v7275_v23, %v6726_v4  ;;  %v6859_v47 = vor.u32 %v7305_v37, %v6856_v41  ;;  %v7269_v3 = vld [vmem:[%s11234_s14 + $0xc4] sm:$0xf]  ;;  %v6712_v12 = vld [vmem:[%s11234_s14 + $0xd0] sm:$0xf0]  ;;  %v7307_v4 = vld [vmem:[%s11234_s14 + $0x1ec] sm:$0xf0] }
 0x6f6   :  { %v6696_v23 = vld [vmem:[%s11234_s14 + $0xb0] sm:$0xf0] }
 0x6f7   :  { %4395 = vmatmul.bf16.vlgmr.msrb.gmra.mxu1 %v10047_v1  ;;  %v4150_v10 = vadd.f32 %v4149_v20, %v4137_v31  ;;  %4899 = vmatpush.bf16.msra.mxu3 %v6727_v40  ;;  %v7301_v31 = vld [vmem:[%s11234_s14 + $0x1c4] sm:$0xf]  ;;  %v6824_v37 = vld [vmem:[%s11234_s14 + $0x1b0] sm:$0xf0] }
 0x6f8   :  { %4938 = vmatpush.bf16.msrb.mxu0 %v6859_v47  ;;  %v7263_v47 = vld [vmem:[%s11234_s14 + $0x8c] sm:$0xf0] }
 0x6f9   :  { %v4163_v43 = vadd.f32 %v4162_v30, %v4150_v10  ;;  %v6728_v30 = vld [vmem:[%s11234_s14 + $0xf0] sm:$0xf0] }
 0x6fa   :  { %v4125_v28 = vpop.f32.mrf.mxu3  ;;  %v4203_v19 = vpop.f32.mrf.mxu2  ;;  %v6731_v11 = vor.u32 %v7273_v57, %v6728_v30  ;;  %v7297_v30 = vld [vmem:[%s11234_s14 + $0x1a4] sm:$0xf] }
 0x6fb   :  { %v6827_v41 = vor.u32 %v7297_v30, %v6824_v37  ;;  %v6616_v30 = vld [vmem:[%s11234_s14 + $0x10] sm:$0xf0] }
 0x6fc   :  { %v4190_v53 = vpop.f32.mrf.mxu1  ;;  %v4216_v54 = vpop.f32.mrf.mxu0  ;;  %4925 = vmatpush.bf16.msrb.mxu2 %v6731_v11  ;;  %v6678_v11 = vld [vmem:[%s11234_s14 + $0x80] sm:$0xf] }
 0x702   :  { %v4175_v62 = vpop.f32.mrf.mxu3  ;;  %v4253_v1 = vpop.f32.mrf.mxu2 }
 0x703   :  { %v4176_v8 = vadd.f32 %v4175_v62, %v4163_v43  ;;  %v6715_v43 = vor.u32 %v7269_v3, %v6712_v12  ;;  %v7261_v3 = vld [vmem:[%s11234_s14 + $0x84] sm:$0xf] }
 0x704   :  { %v4227_v33 = vpop.f32.mrf.mxu1  ;;  %v4266_v14 = vpop.f32.mrf.mxu0 }
 0x705   :  { %v4189_v0 = vadd.f32 %v4188_v39, %v4176_v8  ;;  %v4228_v56 = vadd.f32 %v4227_v33, %v4215_v60  ;;  %v6711_v39 = vor.u32 %v7271_v5, %v6710_v49  ;;  %v6840_v60 = vld [vmem:[%s11234_s14 + $0x1d0] sm:$0xf0]  ;;  %4926 = vmatpush.bf16.msrb.mxu2 %v6715_v43  ;;  %v6838_v49 = vld [vmem:[%s11234_s14 + $0x1c0] sm:$0xf]  ;;  %v6679_v5 = vor.u32 %v7263_v47, %v6678_v11 }
 0x706   :  { %v6843_v28 = vor.u32 %v7301_v31, %v6840_v60  ;;  %v7293_v31 = vld [vmem:[%s11234_s14 + $0x184] sm:$0xf]  ;;  %v6808_v60 = vld [vmem:[%s11234_s14 + $0x190] sm:$0xf0] }
 0x707   :  { %v6609_v36 = vmul.f32 -1.442695, %v4189_v0  ;;  %4900 = vmatpush.bf16.msra.mxu3 %v6711_v39  ;;  %v6811_v43 = vor.u32 %v7293_v31, %v6808_v60  ;;  %v6864_v31 = vld [vmem:[%s11234_s14 + $0x1f8] sm:$0xf0] }
 0x708   :  { %4939 = vmatpush.bf16.msrb.mxu0 %v6843_v28 }
 0x70a   :  { %v4177_v29 = vpop.f32.mrf.mxu3  ;;  %v4255_v26 = vpop.f32.mrf.mxu2 }
 0x70c   :  { %v4229_v21 = vpop.f32.mrf.mxu1  ;;  %v4268_v9 = vpop.f32.mrf.mxu0  ;;  %4940 = vmatpush.bf16.msrb.mxu0 %v6827_v41  ;;  %v7277_v41 = vld [vmem:[%s11234_s14 + $0x104] sm:$0xf] }
 0x710   :  { %4941 = vmatpush.bf16.msrb.mxu0 %v6811_v43 }
 0x712   :  { %v4240_v2 = vpop.f32.mrf.mxu3 }
 0x713   :  { %v4241_v52 = vadd.f32 %v4240_v2, %v4228_v56 }
 0x715   :  { %v4254_v46 = vadd.f32 %v4253_v1, %v4241_v52 }
 0x717   :  { %v4318_v61 = vpop.f32.mrf.mxu2  ;;  %v4267_v50 = vadd.f32 %v4266_v14, %v4254_v46 }
 0x718   :  { %v4305_v55 = vpop.f32.mrf.mxu0 }
 0x719   :  { %v6610_v38 = vmul.f32 -1.442695, %v4267_v50 }
 0x71a   :  { %v4242_v51 = vpop.f32.mrf.mxu3 }
 0x71b   :  { %7666 = vpow2.f32 %v6610_v38 }
 0x71c   :  { %7668 = vpow2.f32 %v6609_v36 }
 0x71f   :  { %v4320_v48 = vpop.f32.mrf.mxu2 }
 0x720   :  { %v4307_v35 = vpop.f32.mrf.mxu0 }
 0x721   :  { %v7667_v13 = vpop.eup %7666  ;;  %v7700_v35 = vld [vmem:[%s11271_s17] sm:$0x3] }
 0x722   :  { %v7669_v16 = vpop.eup %7668  ;;  %v10759_v27 = vadd.f32 1.0, %v7667_v13 }
 0x723   :  { %v10761_v7 = vadd.f32 1.0, %v7669_v16 }
 0x724   :  { %v4279_v34 = vpop.f32.mrf.mxu1  ;;  %7670 = vrcp.f32 %v10759_v27  ;;  %v4460_v2 = vand.u32 2147483648, %v10759_v27  ;;  %vm4454_vm12 = vweird.f32 %v10759_v27  ;;  %v4458_v46 = vand.u32 2147483647, %v10759_v27 }
 0x725   :  { %v4280_v59 = vadd.f32 %v4279_v34, %v4105_v15  ;;  %7672 = vrcp.f32 %v10761_v7  ;;  %vm4435_vm9 = vweird.f32 %v10761_v7  ;;  %v4439_v50 = vand.u32 2147483647, %v10761_v7 }
 0x726   :  { %v4461_v48 = vor.u32 1.1754944e-38, %v4460_v2  ;;  %v4484_v34 = vperm.slane %v7700_v35, 1  ;;  %vm4459_vm11 = vcmp.eq.f32.partialorder %v4458_v46, 8.507059e+37  ;;  %v7295_v46 = vld [vmem:[%s11234_s14 + $0x18c] sm:$0xf0] }
 0x727   :  { %vm4440_vm13 = vcmp.eq.f32.partialorder %v4439_v50, 8.507059e+37  ;;  %v6648_v35 = vld [vmem:[%s11234_s14 + $0x50] sm:$0xf0] }
 0x72a   :  { %v7671_v24 = vpop.eup %7670 }
 0x72b   :  { %v7673_v19 = vpop.eup %7672  ;;  %v4450_v53 = vmul.f32 %v7671_v24, %v10759_v27  ;;  %vm4455_vm2 = vweird.f32 %v7671_v24  ;;  %v4106_v27 = vperm.slane %v10749_v45, 3  ;;  %v7265_v45 = vld [vmem:[%s11234_s14 + $0xa4] sm:$0xf] }
 0x72c   :  { %v4281_v18 = vpop.f32.mrf.mxu1  ;;  %v4431_v54 = vmul.f32 %v7673_v19, %v10761_v7  ;;  %vm4436_vm6 = vweird.f32 %v7673_v19  ;;  %vm4456_vm8 = vmor %vm4454_vm12, %vm4455_vm2  ;;  %v6699_v40 = vor.u32 %v7265_v45, %v6696_v23  ;;  %v7247_v45 = vld [vmem:[%s11234_s14 + $0xc] sm:$0xf0]  ;;  %v6774_v23 = vld [vmem:[%s11234_s14 + $0x140] sm:$0xf] }
 0x72d   :  { %v4451_v62 = vsub.f32 1.0, %v4450_v53  ;;  %vm4437_vm10 = vmor %vm4435_vm9, %vm4436_vm6  ;;  %v7259_v53 = vld [vmem:[%s11234_s14 + $0x6c] sm:$0xf0] }
 0x72e   :  { %v4432_v8 = vsub.f32 1.0, %v4431_v54  ;;  %4927 = vmatpush.bf16.msrb.mxu2 %v6699_v40  ;;  %v6822_v54 = vld [vmem:[%s11234_s14 + $0x1a0] sm:$0xf]  ;;  %v7245_v40 = vld [vmem:[%s11234_s14 + $0x4] sm:$0xf] }
 0x72f   :  { %v4452_v14 = vmul.f32 %v7671_v24, %v4451_v62 }
 0x730   :  { %v4433_v56 = vmul.f32 %v7673_v19, %v4432_v8  ;;  %v6664_v8 = vld [vmem:[%s11234_s14 + $0x70] sm:$0xf0] }
 0x731   :  { %v4453_v21 = vadd.f32 %v7671_v24, %v4452_v14 }
 0x733   :  { %v4292_v17 = vpop.f32.mrf.mxu3  ;;  %v4457_v51 = vsel %vm4456_vm8, %v7671_v24, %v4453_v21  ;;  %v6680_v24 = vld [vmem:[%s11234_s14 + $0x90] sm:$0xf0]  ;;  %v6646_v21 = vld [vmem:[%s11234_s14 + $0x40] sm:$0xf] }
 0x734   :  { %v4293_v25 = vadd.f32 %v4292_v17, %v4280_v59  ;;  %v4462_v36 = vsel %vm4459_vm11, %v4461_v48, %v4457_v51  ;;  %v6683_v12 = vor.u32 %v7261_v3, %v6680_v24  ;;  %v7253_v48 = vld [vmem:[%s11234_s14 + $0x44] sm:$0xf]  ;;  %v6619_v24 = vor.u32 %v7245_v40, %v6616_v30  ;;  %v6830_v30 = vld [vmem:[%s11234_s14 + $0x1a8] sm:$0xf] }
 0x735   :  { %v4486_v13 = vmul.f32 %v4484_v34, %v4462_v36  ;;  %v7285_v34 = vld [vmem:[%s11234_s14 + $0x144] sm:$0xf]  ;;  %v7251_v36 = vld [vmem:[%s11234_s14 + $0x2c] sm:$0xf0] }
 0x736   :  { %v4306_v58 = vadd.f32 %v4305_v55, %v4293_v25  ;;  %v4441_v55 = vand.u32 2147483648, %v10761_v7  ;;  %v7267_v7 = vld [vmem:[%s11234_s14 + $0xac] sm:$0xf0]  ;;  %4928 = vmatpush.bf16.msrb.mxu2 %v6683_v12  ;;  %v7306_v12 = vld [vmem:[%s11234_s14 + $0x1ec] sm:$0xf] }
 0x737   :  { %v10755_v20 = vpop.f32.mrf.mxu2 }
 0x738   :  { %v10757_v6 = vpop.f32.mrf.mxu0  ;;  %v4319_v42 = vadd.f32 %v4318_v61, %v4306_v58  ;;  %v4434_v61 = vadd.f32 %v7673_v19, %v4433_v56  ;;  %v4442_v15 = vor.u32 1.1754944e-38, %v4441_v55 }
 0x73a   :  { %v4438_v38 = vsel %vm4437_vm10, %v7673_v19, %v4434_v61  ;;  %v6662_v19 = vld [vmem:[%s11234_s14 + $0x60] sm:$0xf] }
 0x73b   :  { %v4294_v22 = vpop.f32.mrf.mxu3  ;;  %v4443_v25 = vsel %vm4440_vm13, %v4442_v15, %v4438_v38  ;;  %v6663_v62 = vor.u32 %v7259_v53, %v6662_v19  ;;  %v6806_v61 = vld [vmem:[%s11234_s14 + $0x180] sm:$0xf]  ;;  %v6651_v38 = vor.u32 %v7253_v48, %v6648_v35  ;;  %v7283_v19 = vld [vmem:[%s11234_s14 + $0x12c] sm:$0xf0]  ;;  %v6704_v48 = vld [vmem:[%s11234_s14 + $0xb8] sm:$0xf0] }
 0x73c   :  { %v6694_v22 = vld [vmem:[%s11234_s14 + $0xa0] sm:$0xf]  ;;  %v6807_v51 = vor.u32 %v7295_v46, %v6806_v61 }
 0x73d   :  { %v6630_v15 = vld [vmem:[%s11234_s14 + $0x20] sm:$0xf] }
 0x73f   :  { %v4372_v32 = vpop.f32.mrf.mxu2 }
 0x740   :  { %v4359_v44 = vpop.f32.mrf.mxu0  ;;  %v6854_v32 = vld [vmem:[%s11234_s14 + $0x1e0] sm:$0xf] }
 0x741   :  { %v6695_v44 = vor.u32 %v7267_v7, %v6694_v22  ;;  %v6855_v57 = vor.u32 %v7307_v4, %v6854_v32  ;;  %v6760_v22 = vld [vmem:[%s11234_s14 + $0x130] sm:$0xf0]  ;;  %v6614_v4 = vld [vmem:[%s11234_s14] sm:$0xf] }
 0x742   :  { %v6615_v47 = vor.u32 %v7247_v45, %v6614_v4 }
 0x743   :  { %4901 = vmatpush.bf16.msra.mxu3 %v6695_v44  ;;  %4912 = vmatpush.bf16.msra.mxu1 %v6855_v57 }
 0x744   :  { %v4331_v63 = vpop.f32.mrf.mxu1 }
 0x745   :  { %v4332_v29 = vadd.f32 %v4331_v63, %v4319_v42  ;;  %v4358_v63 = vadd.f32 %v10757_v6, %v4106_v27  ;;  %v7303_v6 = vld [vmem:[%s11234_s14 + $0x1cc] sm:$0xf0]  ;;  %v6632_v27 = vld [vmem:[%s11234_s14 + $0x30] sm:$0xf0] }
 0x746   :  { %v6839_v39 = vor.u32 %v7303_v6, %v6838_v49  ;;  %v6734_v49 = vld [vmem:[%s11234_s14 + $0xe8] sm:$0xf]  ;;  %v7274_v6 = vld [vmem:[%s11234_s14 + $0xec] sm:$0xf] }
 0x747   :  { %v10801_v10 = vpop.f32.mrf.mxu2  ;;  %4902 = vmatpush.bf16.msra.mxu3 %v6679_v5  ;;  %v4371_v28 = vadd.f32 %v10755_v20, %v4358_v63  ;;  %v7299_v20 = vld [vmem:[%s11234_s14 + $0x1ac] sm:$0xf0]  ;;  %v6744_v63 = vld [vmem:[%s11234_s14 + $0x110] sm:$0xf0]  ;;  %v7276_v5 = vld [vmem:[%s11234_s14 + $0xf4] sm:$0xf0] }
 0x748   :  { %4913 = vmatpush.bf16.msra.mxu1 %v6839_v39  ;;  %v6823_v14 = vor.u32 %v7299_v20, %v6822_v54  ;;  %v6736_v39 = vld [vmem:[%s11234_s14 + $0xf8] sm:$0xf0]  ;;  %v6747_v60 = vor.u32 %v7277_v41, %v6744_v63  ;;  %v6735_v43 = vor.u32 %v7276_v5, %v6734_v49  ;;  %v6867_v54 = vor.u32 %v7306_v12, %v6864_v31  ;;  %v7272_v20 = vld [vmem:[%s11234_s14 + $0xd4] sm:$0xf0]  ;;  %v7258_v41 = vld [vmem:[%s11234_s14 + $0x6c] sm:$0xf] }
 0x749   :  { %v6739_v53 = vor.u32 %v7274_v6, %v6736_v39  ;;  %v6800_v49 = vld [vmem:[%s11234_s14 + $0x178] sm:$0xf0]  ;;  %v6654_v39 = vld [vmem:[%s11234_s14 + $0x48] sm:$0xf]  ;;  %v7256_v12 = vld [vmem:[%s11234_s14 + $0x54] sm:$0xf0] }
 0x74a   :  { %v6814_v31 = vld [vmem:[%s11234_s14 + $0x188] sm:$0xf] }
 0x74b   :  { %4903 = vmatpush.bf16.msra.mxu3 %v6663_v62  ;;  %v6718_v62 = vld [vmem:[%s11234_s14 + $0xc8] sm:$0xf] }
 0x74c   :  { %v4333_v1 = vpop.f32.mrf.mxu1  ;;  %4914 = vmatpush.bf16.msra.mxu1 %v6823_v14  ;;  %v6848_v14 = vld [vmem:[%s11234_s14 + $0x1d8] sm:$0xf0] }
 0x74d   :  { %v7257_v1 = vld [vmem:[%s11234_s14 + $0x64] sm:$0xf] }
 0x74e   :  { %v6667_v56 = vor.u32 %v7257_v1, %v6664_v8  ;;  %v7270_v1 = vld [vmem:[%s11234_s14 + $0xcc] sm:$0xf]  ;;  %v6720_v8 = vld [vmem:[%s11234_s14 + $0xd8] sm:$0xf0] }
 0x74f   :  { %v4424_v33 = vpop.f32.mrf.mxu2  ;;  %v6723_v46 = vor.u32 %v7270_v1, %v6720_v8  ;;  %v6784_v1 = vld [vmem:[%s11234_s14 + $0x158] sm:$0xf0] }
 0x750   :  { %4929 = vmatpush.bf16.msrb.mxu2 %v6667_v56  ;;  %4915 = vmatpush.bf16.msra.mxu1 %v6807_v51  ;;  %v7266_v51 = vld [vmem:[%s11234_s14 + $0xac] sm:$0xf] }
 0x753   :  { %v10805_v0 = vpop.f32.mrf.mxu3 }
 0x754   :  { %v4344_v26 = vpop.f32.mrf.mxu1  ;;  %v4384_v33 = vadd.f32 %v10805_v0, %v4371_v28  ;;  %v7255_v0 = vld [vmem:[%s11234_s14 + $0x4c] sm:$0xf0]  ;;  %4930 = vmatpush.bf16.msrb.mxu2 %v6651_v38  ;;  %v6758_v28 = vld [vmem:[%s11234_s14 + $0x120] sm:$0xf]  ;;  %v6832_v38 = vld [vmem:[%s11234_s14 + $0x1b8] sm:$0xf0] }
 0x755   :  { %v4345_v9 = vadd.f32 %v4344_v26, %v4332_v29  ;;  %v7289_v29 = vld [vmem:[%s11234_s14 + $0x164] sm:$0xf]  ;;  %v6792_v26 = vld [vmem:[%s11234_s14 + $0x170] sm:$0xf0]  ;;  %v6647_v50 = vor.u32 %v7255_v0, %v6646_v21  ;;  %v6759_v56 = vor.u32 %v7283_v19, %v6758_v28  ;;  %v6719_v21 = vor.u32 %v7272_v20, %v6718_v62  ;;  %v6862_v0 = vld [vmem:[%s11234_s14 + $0x1e8] sm:$0xf] }
 0x756   :  { %v10808_v52 = vpop.f32.mrf.mxu0  ;;  %v6795_v2 = vor.u32 %v7289_v29, %v6792_v26  ;;  %v6742_v29 = vld [vmem:[%s11234_s14 + $0x100] sm:$0xf]  ;;  %v7279_v26 = vld [vmem:[%s11234_s14 + $0x10c] sm:$0xf0]  ;;  %v6656_v62 = vld [vmem:[%s11234_s14 + $0x58] sm:$0xf0] }
 0x757   :  { %7674 = vtanh.f32 %v4345_v9  ;;  %4904 = vmatpush.bf16.msra.mxu3 %v6647_v50  ;;  %v7308_v50 = vld [vmem:[%s11234_s14 + $0x1f4] sm:$0xf0]  ;;  %v7286_v20 = vld [vmem:[%s11234_s14 + $0x14c] sm:$0xf] }
 0x758   :  { %4942 = vmatpush.bf16.msrb.mxu0 %v6795_v2  ;;  %v7268_v2 = vld [vmem:[%s11234_s14 + $0xb4] sm:$0xf0] }
 0x75b   :  { %v4385_v18 = vpop.f32.mrf.mxu3 }
 0x75c   :  { %v4346_v59 = vpop.f32.mrf.mxu1  ;;  %v6776_v18 = vld [vmem:[%s11234_s14 + $0x150] sm:$0xf0] }
 0x75d   :  { %v7675_v17 = vpop.eup %7674 }
 0x75e   :  { %v4411_v58 = vpop.f32.mrf.mxu0  ;;  %v4487_v42 = vmul.f32 %v7675_v17, %v4443_v25  ;;  %v6779_v17 = vor.u32 %v7285_v34, %v6776_v18  ;;  %v6790_v25 = vld [vmem:[%s11234_s14 + $0x160] sm:$0xf]  ;;  %v7298_v34 = vld [vmem:[%s11234_s14 + $0x1ac] sm:$0xf]  ;;  %v6743_v18 = vor.u32 %v7279_v26, %v6742_v29  ;;  %v6638_v29 = vld [vmem:[%s11234_s14 + $0x28] sm:$0xf] }
 0x75f   :  { %v7291_v58 = vld [vmem:[%s11234_s14 + $0x16c] sm:$0xf0] }
 0x760   :  { %v10818_v16 = vadd.f32 %v4487_v42, %v4486_v13  ;;  %v7249_v13 = vld [vmem:[%s11234_s14 + $0x24] sm:$0xf]  ;;  %v6631_v42 = vor.u32 %v7251_v36, %v6630_v15  ;;  %v6791_v32 = vor.u32 %v7291_v58, %v6790_v25  ;;  %4943 = vmatpush.bf16.msrb.mxu0 %v6779_v17  ;;  %v6863_v36 = vor.u32 %v7308_v50, %v6862_v0  ;;  %v7264_v17 = vld [vmem:[%s11234_s14 + $0x94] sm:$0xf0]  ;;  %v6846_v25 = vld [vmem:[%s11234_s14 + $0x1c8] sm:$0xf] }
 0x761   :  { %v6635_v44 = vor.u32 %v7249_v13, %v6632_v27  ;;  %v6707_v58 = vor.u32 %v7266_v51, %v6704_v48  ;;  %v6835_v13 = vor.u32 %v7298_v34, %v6832_v38  ;;  %v7262_v27 = vld [vmem:[%s11234_s14 + $0x8c] sm:$0xf]  ;;  %v6798_v0 = vld [vmem:[%s11234_s14 + $0x168] sm:$0xf]  ;;  %v6640_v48 = vld [vmem:[%s11234_s14 + $0x38] sm:$0xf0] }
 0x762   :  { %4905 = vmatpush.bf16.msra.mxu3 %v6631_v42  ;;  %4916 = vmatpush.bf16.msra.mxu1 %v6791_v32  ;;  %v7304_v42 = vld [vmem:[%s11234_s14 + $0x1d4] sm:$0xf0]  ;;  %v6816_v32 = vld [vmem:[%s11234_s14 + $0x198] sm:$0xf0]  ;;  %v7250_v50 = vld [vmem:[%s11234_s14 + $0x2c] sm:$0xf] }
 0x763   :  { %4931 = vmatpush.bf16.msrb.mxu2 %v6635_v44  ;;  %v6847_v45 = vor.u32 %v7304_v42, %v6846_v25  ;;  %v7248_v25 = vld [vmem:[%s11234_s14 + $0x14] sm:$0xf0]  ;;  %v6643_v42 = vor.u32 %v7250_v50, %v6640_v48 }
 0x766   :  { %4906 = vmatpush.bf16.msra.mxu3 %v6615_v47  ;;  %v7290_v47 = vld [vmem:[%s11234_s14 + $0x16c] sm:$0xf] }
 0x767   :  { %4932 = vmatpush.bf16.msrb.mxu2 %v6619_v24  ;;  %v6803_v19 = vor.u32 %v7290_v47, %v6800_v49  ;;  %v7280_v47 = vld [vmem:[%s11234_s14 + $0x114] sm:$0xf0] }
 0x76a   :  { %4951 = vmatpush.bf16.msrb.mxu3 %v6735_v43 }
 0x76b   :  { %4977 = vmatpush.bf16.msra.mxu2 %v6739_v53  ;;  %v7296_v53 = vld [vmem:[%s11234_s14 + $0x194] sm:$0xf0] }
 0x76e   :  { %4952 = vmatpush.bf16.msrb.mxu3 %v6719_v21 }
 0x76f   :  { %4978 = vmatpush.bf16.msra.mxu2 %v6723_v46  ;;  %v4493_v46 = vrot.slane %v10818_v16, 7 }
 0x773   :  { %4979 = vmatpush.bf16.msra.mxu2 %v6707_v58  ;;  %v6782_v58 = vld [vmem:[%s11234_s14 + $0x148] sm:$0xf] }
 0x774   :  { %v4396_v9 = vpop.f32.mrf.mxu1 }
 0x775   :  { %v4397_v55 = vadd.f32 %v4396_v9, %v4384_v33  ;;  %v7302_v33 = vld [vmem:[%s11234_s14 + $0x1cc] sm:$0xf]  ;;  %v6702_v9 = vld [vmem:[%s11234_s14 + $0xa8] sm:$0xf] }
 0x776   :  { %v6703_v15 = vor.u32 %v7268_v2, %v6702_v9  ;;  %v6787_v9 = vor.u32 %v7286_v20, %v6784_v1  ;;  %v7252_v2 = vld [vmem:[%s11234_s14 + $0x34] sm:$0xf0] }
 0x777   :  { %v4410_v59 = vadd.f32 %v10808_v52, %v4397_v55  ;;  %v7281_v52 = vld [vmem:[%s11234_s14 + $0x124] sm:$0xf]  ;;  %v6851_v55 = vor.u32 %v7302_v33, %v6848_v14  ;;  %v4497_v33 = vlaneseq  ;;  %v6655_v14 = vor.u32 %v7256_v12, %v6654_v39  ;;  %v4569_v39 = vld [vmem:[%s11235_s15] sm:$0xf] }
 0x778   :  { %v6763_v57 = vor.u32 %v7281_v52, %v6760_v22  ;;  %v11063_v52 = vld [vmem:[%s11227_s7] sm:$0x3]  ;;  %v6688_v22 = vld [vmem:[%s11234_s14 + $0x98] sm:$0xf0]  ;;  %4953 = vmatpush.bf16.msrb.mxu3 %v6703_v15  ;;  %v6639_v15 = vor.u32 %v7252_v2, %v6638_v29  ;;  %v4891_v12 = vperm.slane %v4569_v39, 0  ;;  %v4894_v2 = vperm.slane %v4569_v39, 3 }
 0x779   :  { %v4423_v7 = vadd.f32 %v10801_v10, %v4410_v59  ;;  %v7287_v10 = vld [vmem:[%s11234_s14 + $0x14c] sm:$0xf0]  ;;  %v6686_v59 = vld [vmem:[%s11234_s14 + $0x88] sm:$0xf]  ;;  %v11076_v44 = vpack.c.bf16 %v11063_v52, %v11063_v52  ;;  %vm11159_vm7 = vcmp.lt.s32.totalorder %v4497_v33, 256  ;;  %v7315_v29 = vld [vmem:[#allocation13 + $0x30] sm:$0xff] }
 0x77a   :  { %v6775_v3 = vor.u32 %v7287_v10, %v6774_v23  ;;  %4944 = vmatpush.bf16.msrb.mxu0 %v6763_v57  ;;  %v6687_v4 = vor.u32 %v7264_v17, %v6686_v59  ;;  %v6670_v23 = vld [vmem:[%s11234_s14 + $0x68] sm:$0xf]  ;;  %v7260_v57 = vld [vmem:[%s11234_s14 + $0x74] sm:$0xf0]  ;;  %v6691_v10 = vor.u32 %v7262_v27, %v6688_v22  ;;  %v7246_v22 = vld [vmem:[%s11234_s14 + $0xc] sm:$0xf] }
 0x77b   :  { %v6611_v37 = vmul.f32 -1.442695, %v4423_v7  ;;  %v7294_v7 = vld [vmem:[%s11234_s14 + $0x18c] sm:$0xf]  ;;  %v6622_v59 = vld [vmem:[%s11234_s14 + $0x8] sm:$0xf] }
 0x77c   :  { %v4398_v11 = vpop.f32.mrf.mxu1  ;;  %4917 = vmatpush.bf16.msra.mxu1 %v6775_v3  ;;  %v6819_v40 = vor.u32 %v7294_v7, %v6816_v32  ;;  %4954 = vmatpush.bf16.msrb.mxu3 %v6687_v4  ;;  %v6671_v3 = vor.u32 %v7260_v57, %v6670_v23  ;;  %v6624_v4 = vld [vmem:[%s11234_s14 + $0x18] sm:$0xf0]  ;;  %v6623_v57 = vor.u32 %v7248_v25, %v6622_v59 }
 0x77d   :  { %7676 = vpow2.f32 %v6611_v37  ;;  %v7300_v37 = vld [vmem:[%s11234_s14 + $0x1b4] sm:$0xf0]  ;;  %v6672_v11 = vld [vmem:[%s11234_s14 + $0x78] sm:$0xf0]  ;;  %4980 = vmatpush.bf16.msra.mxu2 %v6691_v10 }
 0x77e   :  { %4945 = vmatpush.bf16.msrb.mxu0 %v6747_v60  ;;  %v6831_v24 = vor.u32 %v7300_v37, %v6830_v30  ;;  %v6675_v28 = vor.u32 %v7258_v41, %v6672_v11  ;;  %v6752_v23 = vld [vmem:[%s11234_s14 + $0x118] sm:$0xf0]  ;;  %v7284_v30 = vld [vmem:[%s11234_s14 + $0x134] sm:$0xf0]  ;;  %v6627_v37 = vor.u32 %v7246_v22, %v6624_v4  ;;  %v6750_v11 = vld [vmem:[%s11234_s14 + $0x108] sm:$0xf] }
 0x77f   :  { %v6751_v49 = vor.u32 %v7280_v47, %v6750_v11 }
 0x780   :  { %4918 = vmatpush.bf16.msra.mxu1 %v6759_v56  ;;  %4955 = vmatpush.bf16.msrb.mxu3 %v6671_v3  ;;  %v6815_v56 = vor.u32 %v7296_v53, %v6814_v31  ;;  %v4892_v31 = vperm.slane %v4569_v39, 1 }
 0x781   :  { %4946 = vmatmul.bf16.vlgmr.msrb.gmra.mxu0 %v11076_v44  ;;  %4981 = vmatpush.bf16.msra.mxu2 %v6675_v28 }
 0x782   :  { %4990 = vmatpush.bf16.msra.mxu0 %v6867_v54  ;;  %v7254_v54 = vld [vmem:[%s11234_s14 + $0x4c] sm:$0xf] }
 0x783   :  { %v7677_v61 = vpop.eup %7676  ;;  %v6659_v21 = vor.u32 %v7254_v54, %v6656_v62 }
 0x784   :  { %v11036_v35 = vadd.f32 1.0, %v7677_v61  ;;  %4919 = vmatpush.bf16.msra.mxu1 %v6743_v18  ;;  %v7292_v61 = vld [vmem:[%s11234_s14 + $0x174] sm:$0xf0]  ;;  %4956 = vmatpush.bf16.msrb.mxu3 %v6655_v14  ;;  %v7316_v14 = vld [vmem:[#allocation13 + $0x38] sm:$0xff] }
 0x785   :  { %4982 = vmatpush.bf16.msra.mxu2 %v6659_v21 }
 0x786   :  { %7678 = vrcp.f32 %v11036_v35  ;;  %4991 = vmatpush.bf16.msra.mxu0 %v6851_v55  ;;  %v4478_v6 = vand.u32 2147483647, %v11036_v35  ;;  %v4480_v43 = vand.u32 2147483648, %v11036_v35  ;;  %vm4474_vm15 = vweird.f32 %v11036_v35 }
 0x787   :  { %4920 = vmatmul.bf16.vlgmr.msra.gmra.mxu1 %v11076_v44  ;;  %7680 = vtanh.f32 %v10818_v16  ;;  %v6768_v16 = vld [vmem:[%s11234_s14 + $0x138] sm:$0xf0] }
 0x788   :  { %4964 = vmatpush.bf16.msrb.mxu1 %v6863_v36  ;;  %vm4479_vm4 = vcmp.eq.f32.partialorder %v4478_v6, 8.507059e+37  ;;  %v4481_v55 = vor.u32 1.1754944e-38, %v4480_v43  ;;  %v6799_v36 = vor.u32 %v7292_v61, %v6798_v0  ;;  %4957 = vmatpush.bf16.msrb.mxu3 %v6639_v15  ;;  %v7314_v61 = vld [vmem:[#allocation13 + $0x28] sm:$0xff] }
 0x789   :  { %4983 = vmatpush.bf16.msra.mxu2 %v6643_v42 }
 0x78a   :  { %4992 = vmatpush.bf16.msra.mxu0 %v6835_v13  ;;  %v7288_v13 = vld [vmem:[%s11234_s14 + $0x154] sm:$0xf0] }
 0x78b   :  { %v6783_v10 = vor.u32 %v7288_v13, %v6782_v58 }
 0x78c   :  { %v7679_v63 = vpop.eup %7678  ;;  %4965 = vmatpush.bf16.msrb.mxu1 %v6847_v45  ;;  %v7278_v45 = vld [vmem:[%s11234_s14 + $0x10c] sm:$0xf]  ;;  %4958 = vmatpush.bf16.msrb.mxu3 %v6623_v57 }
 0x78d   :  { %v4470_v5 = vmul.f32 %v7679_v63, %v11036_v35  ;;  %vm4475_vm14 = vweird.f32 %v7679_v63  ;;  %v7282_v35 = vld [vmem:[%s11234_s14 + $0x12c] sm:$0xf]  ;;  %v7681_v34 = vpop.eup %7680  ;;  %v6755_v41 = vor.u32 %v7278_v45, %v6752_v23  ;;  %4984 = vmatpush.bf16.msra.mxu2 %v6627_v37  ;;  %v7311_v23 = vld [vmem:[#allocation13 + $0x10] sm:$0xff] }
 0x78e   :  { %4993 = vmatpush.bf16.msra.mxu0 %v6819_v40  ;;  %vm4476_vm1 = vmor %vm4474_vm15, %vm4475_vm14  ;;  %v6771_v27 = vor.u32 %v7282_v35, %v6768_v16  ;;  %v6766_v40 = vld [vmem:[%s11234_s14 + $0x128] sm:$0xf] }
 0x78f   :  { %v4471_v60 = vsub.f32 1.0, %v4470_v5  ;;  %v7313_v35 = vld [vmem:[#allocation13 + $0x20] sm:$0xff] }
 0x790   :  { %4966 = vmatpush.bf16.msrb.mxu1 %v6831_v24 }
 0x791   :  { %v4472_v8 = vmul.f32 %v7679_v63, %v4471_v60 }
 0x792   :  { %4994 = vmatpush.bf16.msra.mxu0 %v6803_v19 }
 0x793   :  { %v4473_v26 = vadd.f32 %v7679_v63, %v4472_v8 }
 0x794   :  { %4967 = vmatpush.bf16.msrb.mxu1 %v6815_v56 }
 0x795   :  { %v4477_v51 = vsel %vm4476_vm1, %v7679_v63, %v4473_v26  ;;  %v6767_v63 = vor.u32 %v7284_v30, %v6766_v40 }
 0x796   :  { %v4482_v38 = vsel %vm4479_vm4, %v4481_v55, %v4477_v51  ;;  %4995 = vmatpush.bf16.msra.mxu0 %v6787_v9 }
 0x797   :  { %v4490_v17 = vmul.f32 %v7681_v34, %v4482_v38 }
 0x798   :  { %4968 = vmatpush.bf16.msrb.mxu1 %v6799_v36 }
 0x799   :  { %v4495_v7 = vsel %vm171_vm5, %v4490_v17, %v4493_v46  ;;  %v4503_v32 = vpack.c.bf16 %v4490_v17, %v4490_v17  ;;  %v4893_v46 = vperm.slane %v4569_v39, 2  ;;  %v7312_v17 = vld [vmem:[#allocation13 + $0x18] sm:$0xff] }
 0x79a   :  { %4501 = vst.msk [vmem:[%s11241_s21] sm:$0x3] %vm11159_vm7, %v4495_v7  ;;  %4996 = vmatpush.bf16.msra.mxu0 %v6771_v27 }
 0x79b   :  { %4907 = vmatmul.bf16.vlgmr.msra.gmra.mxu3 %v4503_v32  ;;  %4933 = vmatmul.bf16.vlgmr.msrb.gmra.mxu2 %v4503_v32 }
 0x79c   :  { %4969 = vmatpush.bf16.msrb.mxu1 %v6783_v10  ;;  %5141 = vmatpush.bf16.msra.mxu3 %v7316_v14 }
 0x79e   :  { %4997 = vmatpush.bf16.msra.mxu0 %v6755_v41 }
 0x7a0   :  { %4970 = vmatpush.bf16.msrb.mxu1 %v6767_v63  ;;  %5142 = vmatpush.bf16.msra.mxu3 %v7315_v29  ;;  %v5062_v63 = vperm.slane %v11063_v52, 1 }
 0x7a1   :  { %4998 = vmatmul.bf16.vlgmr.msra.gmra.mxu0 %v11076_v44 }
 0x7a4   :  { %4971 = vmatpush.bf16.msrb.mxu1 %v6751_v49  ;;  %5143 = vmatpush.bf16.msra.mxu3 %v7314_v61 }
 0x7a7   :  { %4972 = vmatmul.bf16.vlgmr.msrb.gmra.mxu1 %v11076_v44 }
 0x7a8   :  { %5144 = vmatpush.bf16.msra.mxu3 %v7313_v35 }
 0x7ab   :  { %4959 = vmatmul.bf16.vlgmr.msrb.gmra.mxu3 %v4503_v32  ;;  %4985 = vmatmul.bf16.vlgmr.msra.gmra.mxu2 %v4503_v32 }
 0x7ac   :  { %5145 = vmatpush.bf16.msra.mxu3 %v7312_v17 }
 0x7b0   :  { %5146 = vmatpush.bf16.msra.mxu3 %v7311_v23 }
 0x7fe   :  { %v4947_v5 = vpop.f32.mrf.mxu0 }
 0x804   :  { %v4921_v6 = vpop.f32.mrf.mxu1 }
 0x806   :  { %v4949_v3 = vpop.f32.mrf.mxu0 }
 0x80c   :  { %v4923_v24 = vpop.f32.mrf.mxu1 }
 0x81e   :  { %v4908_v60 = vpop.f32.mrf.mxu3  ;;  %v4934_v43 = vpop.f32.mrf.mxu2 }
 0x81f   :  { %v4909_v28 = vadd.f32 %v4908_v60, %v4891_v12  ;;  %v4935_v19 = vadd.f32 %v4934_v43, %v4892_v31  ;;  %v4999_v53 = vpop.f32.mrf.mxu0  ;;  %v7309_v60 = vld [vmem:[#allocation13] sm:$0xff] }
 0x821   :  { %v4922_v54 = vadd.f32 %v4921_v6, %v4909_v28  ;;  %v4948_v62 = vadd.f32 %v4947_v5, %v4935_v19  ;;  %v7310_v5 = vld [vmem:[#allocation13 + $0x8] sm:$0xff] }
 0x822   :  { %5147 = vmatpush.bf16.msra.mxu3 %v7310_v5 }
 0x823   :  { %v6868_v44 = vmul.f32 -1.442695, %v4922_v54  ;;  %v6869_v20 = vmul.f32 -1.442695, %v4948_v62 }
 0x824   :  { %v4973_v33 = vpop.f32.mrf.mxu1 }
 0x825   :  { %7682 = vpow2.f32 %v6868_v44 }
 0x826   :  { %7684 = vpow2.f32 %v6869_v20  ;;  %v4910_v1 = vpop.f32.mrf.mxu3  ;;  %v4936_v8 = vpop.f32.mrf.mxu2  ;;  %5148 = vmatpush.bf16.msra.mxu3 %v7309_v60 }
 0x827   :  { %v5001_v56 = vpop.f32.mrf.mxu0 }
 0x82b   :  { %v7683_v26 = vpop.eup %7682 }
 0x82c   :  { %v7685_v21 = vpop.eup %7684  ;;  %v5006_v9 = vadd.f32 1.0, %v7683_v26  ;;  %v4975_v51 = vpop.f32.mrf.mxu1 }
 0x82d   :  { %v5025_v0 = vadd.f32 1.0, %v7685_v21  ;;  %v5092_v21 = vld [vmem:[#allocation14] sm:$0x1] }
 0x82e   :  { %7686 = vrcp.f32 %v5006_v9  ;;  %v4960_v55 = vpop.f32.mrf.mxu3  ;;  %v4986_v50 = vpop.f32.mrf.mxu2  ;;  %v5018_v7 = vand.u32 2147483648, %v5006_v9  ;;  %v5016_v45 = vand.u32 2147483647, %v5006_v9  ;;  %vm5012_vm2 = vweird.f32 %v5006_v9 }
 0x82f   :  { %7688 = vrcp.f32 %v5025_v0  ;;  %v4987_v48 = vadd.f32 %v4986_v50, %v4894_v2  ;;  %v4961_v16 = vadd.f32 %v4960_v55, %v4893_v46  ;;  %v5037_v32 = vand.u32 2147483648, %v5025_v0 }
 0x830   :  { %v5035_v10 = vand.u32 2147483647, %v5025_v0  ;;  %vm5031_vm6 = vweird.f32 %v5025_v0  ;;  %v5019_v37 = vor.u32 1.1754944e-38, %v5018_v7  ;;  %vm5017_vm8 = vcmp.eq.f32.partialorder %v5016_v45, 8.507059e+37 }
 0x831   :  { %v5000_v34 = vadd.f32 %v4999_v53, %v4987_v48  ;;  %v4974_v58 = vadd.f32 %v4973_v33, %v4961_v16  ;;  %v5038_v49 = vor.u32 1.1754944e-38, %v5037_v32 }
 0x832   :  { %vm5036_vm10 = vcmp.eq.f32.partialorder %v5035_v10, 8.507059e+37 }
 0x833   :  { %v6870_v15 = vmul.f32 -1.442695, %v5000_v34 }
 0x834   :  { %v7687_v38 = vpop.eup %7686 }
 0x835   :  { %v7689_v36 = vpop.eup %7688  ;;  %v5008_v59 = vmul.f32 %v7687_v38, %v5006_v9  ;;  %7690 = vpow2.f32 %v6870_v15  ;;  %vm5013_vm0 = vweird.f32 %v7687_v38 }
 0x836   :  { %v5027_v25 = vmul.f32 %v7689_v36, %v5025_v0  ;;  %v4962_v13 = vpop.f32.mrf.mxu3  ;;  %v4988_v42 = vpop.f32.mrf.mxu2  ;;  %vm5032_vm3 = vweird.f32 %v7689_v36  ;;  %7692 = vtanh.f32 %v4974_v58  ;;  %vm5014_vm12 = vmor %vm5012_vm2, %vm5013_vm0 }
 0x837   :  { %v5009_v27 = vsub.f32 1.0, %v5008_v59  ;;  %vm5033_vm9 = vmor %vm5031_vm6, %vm5032_vm3  ;;  %v5171_v59 = vld [vmem:[#allocation6] sm:$0x1] }
 0x838   :  { %v5028_v22 = vsub.f32 1.0, %v5027_v25 }
 0x839   :  { %v5010_v4 = vmul.f32 %v7687_v38, %v5009_v27 }
 0x83a   :  { %v5029_v57 = vmul.f32 %v7689_v36, %v5028_v22 }
 0x83b   :  { %v5011_v40 = vadd.f32 %v7687_v38, %v5010_v4  ;;  %v7691_v30 = vpop.eup %7690 }
 0x83c   :  { %v5030_v41 = vadd.f32 %v7689_v36, %v5029_v57  ;;  %v5045_v11 = vadd.f32 1.0, %v7691_v30  ;;  %v7693_v39 = vpop.eup %7692 }
 0x83d   :  { %v5015_v47 = vsel %vm5014_vm12, %v7687_v38, %v5011_v40 }
 0x83e   :  { %v5020_v6 = vsel %vm5017_vm8, %v5019_v37, %v5015_v47  ;;  %v5034_v3 = vsel %vm5033_vm9, %v7689_v36, %v5030_v41  ;;  %7694 = vrcp.f32 %v5045_v11  ;;  %v5057_v53 = vand.u32 2147483648, %v5045_v11 }
 0x83f   :  { %v5039_v24 = vsel %vm5036_vm10, %v5038_v49, %v5034_v3  ;;  %v5065_v31 = vmul.f32 %v7693_v39, %v5020_v6  ;;  %v5055_v62 = vand.u32 2147483647, %v5045_v11  ;;  %vm5051_vm13 = vweird.f32 %v5045_v11 }
 0x840   :  { %v5064_v12 = vmul.f32 %v5062_v63, %v5039_v24  ;;  %v5058_v20 = vor.u32 1.1754944e-38, %v5057_v53 }
 0x841   :  { %vm5056_vm15 = vcmp.eq.f32.partialorder %v5055_v62, 8.507059e+37 }
 0x842   :  { %v5066_v28 = vadd.f32 %v5065_v31, %v5064_v12 }
 0x844   :  { %v7695_v43 = vpop.eup %7694  ;;  %7696 = vtanh.f32 %v5066_v28  ;;  %v5071_v14 = vrot.slane %v5066_v28, 7 }
 0x845   :  { %v5047_v52 = vmul.f32 %v7695_v43, %v5045_v11  ;;  %vm5052_vm11 = vweird.f32 %v7695_v43 }
 0x846   :  { %vm5053_vm14 = vmor %vm5051_vm13, %vm5052_vm11 }
 0x847   :  { %v5048_v19 = vsub.f32 1.0, %v5047_v52 }
 0x849   :  { %v5049_v54 = vmul.f32 %v7695_v43, %v5048_v19 }
 0x84a   :  { %v7697_v8 = vpop.eup %7696 }
 0x84b   :  { %v5050_v44 = vadd.f32 %v7695_v43, %v5049_v54 }
 0x84d   :  { %v5054_v1 = vsel %vm5053_vm14, %v7695_v43, %v5050_v44 }
 0x84e   :  { %v5059_v33 = vsel %vm5056_vm15, %v5058_v20, %v5054_v1 }
 0x84f   :  { %v5068_v56 = vmul.f32 %v7697_v8, %v5059_v33 }
 0x851   :  { %v5072_v29 = vsel %vm171_vm5, %v5068_v56, %v5071_v14  ;;  %v5075_v26 = vpack.c.bf16 %v5068_v56, %v5068_v56 }
 0x852   :  { %5074 = vst.msk [vmem:[%s11242_s22] sm:$0x3] %vm11159_vm7, %v5072_v29 }
 0x853   :  { %5149 = vmatmul.bf16.vlgmr.msra.gmra.mxu3 %v5075_v26 }
 0x8d6   :  { %v5150_v9 = vpop.f32.mrf.mxu3 }
 0x8d7   :  { %v5151_v2 = vadd.f32 %v5150_v9, %v5092_v21 }
 0x8d9   :  { %v5154_v0 = vand.u32 2147483647, %v5151_v2 }
 0x8db   :  { %v5155_v61 = vadd.f32 1.0, %v5154_v0 }
 0x8dd   :  { %7698 = vrcp.f32 %v5155_v61  ;;  %v5167_v48 = vand.u32 2147483648, %v5155_v61  ;;  %v5165_v16 = vand.u32 2147483647, %v5155_v61  ;;  %vm5161_vm1 = vweird.f32 %v5155_v61 }
 0x8de   :  { %v5152_v46 = vpop.f32.mrf.mxu3 }
 0x8df   :  { %v5168_v34 = vor.u32 1.1754944e-38, %v5167_v48  ;;  %vm5166_vm7 = vcmp.eq.f32.partialorder %v5165_v16, 8.507059e+37 }
 0x8e3   :  { %v7699_v55 = vpop.eup %7698 }
 0x8e4   :  { %v5157_v50 = vmul.f32 %v7699_v55, %v5155_v61  ;;  %vm5162_vm5 = vweird.f32 %v7699_v55 }
 0x8e5   :  { %vm5163_vm4 = vmor %vm5161_vm1, %vm5162_vm5 }
 0x8e6   :  { %v5158_v51 = vsub.f32 1.0, %v5157_v50 }
 0x8e8   :  { %v5159_v35 = vmul.f32 %v7699_v55, %v5158_v51 }
 0x8ea   :  { %v5160_v18 = vadd.f32 %v7699_v55, %v5159_v35 }
 0x8ec   :  { %v5164_v38 = vsel %vm5163_vm4, %v7699_v55, %v5160_v18 }
 0x8ed   :  { %v5169_v15 = vsel %vm5166_vm7, %v5168_v34, %v5164_v38 }
 0x8ee   :  { %v5170_v36 = vmul.f32 %v5169_v15, %v5151_v2 }
 0x8f0   :  { %v5172_v17 = vsub.f32 %v5170_v36, %v5151_v2 }
 0x8f2   :  { %v5173_v25 = vmul.f32 %v5172_v17, %v5171_v59 }
 0x8f4   :  { %v5174_v58 = vadd.f32 %v5173_v25, %v5151_v2 }
 0x8f6   :  { %5175 = vst [vmem:[%s11238_s18] sm:$0x1] %v5174_v58 }
 0x8f7   :  { %5196 = vsyncpa [#allocation7], 1 }
 0x8f8   :  { %5197 = vsyncpa [#allocation9], 1 }
 0x8f9   :  { %5198 = vsyncpa [#allocation12], 1 }
 0x8fa   :  { %5199 = vsyncpa [#allocation15], 1 }

</bundles_post_ra>
